<compile_context>
chip_gen: v7x
topology: tpu7x:2x2x1
jax: 0.10.0
libtpu: 0.0.40
codegen_flags: <defaults>
</compile_context>

<pallas_src>
import functools

import numpy as np
import jax
import jax.numpy as jnp
from jax.experimental import pallas as pl
from jax.experimental.pallas import tpu as pltpu


# -----------------------------------------------------------------------------
# Model configuration (matches acModel.__init__)
# -----------------------------------------------------------------------------
NUM_JOINTS = 21
INPUT_SIZE = NUM_JOINTS * 3          # 63
HIDDEN_SIZE = 32
D_PAD = 128                          # lane-padded frame width (multiple of 128)
RESIDUAL_VELOCITIES = False


def get_condition_list(seq_len, condition_length=5, ground_truth_length=5):
    """Same as acModel.get_condition_list (static / compile-time)."""
    gt_lst = np.ones((100, ground_truth_length))
    con_lst = np.zeros((100, condition_length))
    lst = np.concatenate((gt_lst, con_lst), 1).reshape(-1)
    return lst[0:seq_len]


# -----------------------------------------------------------------------------
# Pallas kernel
# -----------------------------------------------------------------------------
def _ac_kernel(x_ref,                                   # (S, BP, D_PAD)  f32
               w1x_ref,                                 # (D_PAD, 4H)     bf16
               whh1_ref,                                # (H, 4H)         bf16
               wcomb_ref,                               # (H, 4H)         bf16
               b1_ref, b1c_ref,                         # (1, 4H)         f32
               wih2_ref, whh2_ref, b2_ref,              # bf16, bf16, f32
               wih3_ref, whh3_ref, b3_ref,              # bf16, bf16, f32
               wp_ref, bp_ref,                          # (H, D_PAD) bf16, (1, D_PAD) f32
               out_ref,                                 # (S, BP, D_PAD)  f32
               *, seq_len, batch_pad, hidden, d_pad, cond_list, residual):
    H = hidden
    BP = batch_pad
    bf16 = jnp.bfloat16

    # --- hoisted small weight loads (reused across every unrolled iteration) -
    whh1 = whh1_ref[...]
    wcomb = wcomb_ref[...]
    wih2 = wih2_ref[...]
    whh2 = whh2_ref[...]
    wih3 = wih3_ref[...]
    whh3 = whh3_ref[...]
    wp = wp_ref[...]

    # --- hoisted bias broadcasts (JAX does not CSE broadcast_in_dim) ---------
    b1_row = b1_ref[...]
    b2b = jnp.broadcast_to(b2_ref[...], (BP, 4 * H))
    b3b = jnp.broadcast_to(b3_ref[...], (BP, 4 * H))
    bpb = jnp.broadcast_to(bp_ref[...], (BP, d_pad))
    if residual:
        b1b = jnp.broadcast_to(b1_row, (BP, 4 * H))
    else:
        b1cb = jnp.broadcast_to(b1c_ref[...], (BP, 4 * H))

    # --- one batched MXU matmul for ALL ground-truth layer-1 projections ----
    # x is lane-padded with zeros and w1x rows >= INPUT_SIZE are zero, so this
    # equals real_frame @ W_ih1 exactly; b1 is folded in here.
    x_all = x_ref[...].reshape(seq_len * BP, d_pad).astype(bf16)
    pre_all = jnp.dot(x_all, w1x_ref[...],
                      preferred_element_type=jnp.float32) + b1_row
    pre_all = pre_all.reshape(seq_len, BP, 4 * H)                 # (S, BP, 4H)

    def cell_update(gates, c):
        # Full-tile transcendentals (one sigmoid + one tanh over all 4 gates),
        # then cheap lane slices. Gate order matches nn.LSTMCell: i, f, g, o.
        sg = jax.nn.sigmoid(gates)
        tg = jnp.tanh(gates)
        i_g = sg[:, 0 * H:1 * H]
        f_g = sg[:, 1 * H:2 * H]
        g_g = tg[:, 2 * H:3 * H]
        o_g = sg[:, 3 * H:4 * H]
        c_new = f_g * c + i_g * g_g
        h_new = o_g * jnp.tanh(c_new)
        return h_new, c_new

    zeros_h = jnp.zeros((BP, H), jnp.float32)
    h1 = h2 = h3 = zeros_h
    c1 = c2 = c3 = zeros_h
    prev = jnp.zeros((BP, d_pad), jnp.float32)    # only consumed if residual

    # seq_len is static and small -> fully unrolled (LLO-visible) loop.
    for i in range(seq_len):
        step_in = None
        if cond_list[i] == 1:
            # ground-truth frame: input projection (+b1) precomputed above.
            gates1 = (pre_all[i]
                      + jnp.dot(h1.astype(bf16), whh1,
                                preferred_element_type=jnp.float32))
            if residual:
                step_in = x_ref[i]
        else:
            if residual:
                # residual path needs the actual previous output as input.
                gates1 = (jnp.dot(prev.astype(bf16), w1x_ref[...],
                                  preferred_element_type=jnp.float32)
                          + jnp.dot(h1.astype(bf16), whh1,
                                    preferred_element_type=jnp.float32)
                          + b1b)
                step_in = prev
            else:
                # projector folded into layer 1: gates directly from h3,
                # removing prev (projector -> feedback) from the serial chain.
                gates1 = (jnp.dot(h3.astype(bf16), wcomb,
                                  preferred_element_type=jnp.float32)
                          + jnp.dot(h1.astype(bf16), whh1,
                                    preferred_element_type=jnp.float32)
                          + b1cb)
        h1, c1 = cell_update(gates1, c1)

        # layers 2/3: two independent K=32 dots (no lane concat); the W_hh
        # term only depends on the previous step, so it is off the chain.
        gates2 = (jnp.dot(h1.astype(bf16), wih2, preferred_element_type=jnp.float32)
                  + jnp.dot(h2.astype(bf16), whh2, preferred_element_type=jnp.float32)
                  + b2b)
        h2, c2 = cell_update(gates2, c2)

        gates3 = (jnp.dot(h2.astype(bf16), wih3, preferred_element_type=jnp.float32)
                  + jnp.dot(h3.astype(bf16), whh3, preferred_element_type=jnp.float32)
                  + b3b)
        h3, c3 = cell_update(gates3, c3)

        # projector: feeds only the output store (and prev when residual).
        out = jnp.dot(h3.astype(bf16), wp,
                      preferred_element_type=jnp.float32) + bpb   # (BP, 128)
        if residual:
            out = step_in + out              # padded lanes of both are zero
            prev = out
        out_ref[i] = out                     # full (8,128) unmasked vst


# -----------------------------------------------------------------------------
# Parameter packing into kernel layout (padded, bf16, folded projector)
# -----------------------------------------------------------------------------
def _pack_params(params, d_pad=D_PAD):
    D, H = INPUT_SIZE, HIDDEN_SIZE
    f32, bf16 = jnp.float32, jnp.bfloat16

    wih1 = params["wih1"].astype(f32)                       # (D, 4H)
    w1x = jnp.zeros((d_pad, 4 * H), f32).at[:D, :].set(wih1)
    wp = params["wp"].astype(f32)                           # (H, D)
    bp = params["bp"].astype(f32)                           # (1, D)

    # projector folded into layer-1 (used by the non-residual AR branch)
    wcomb = wp @ wih1                                       # (H, 4H)
    bcomb = bp @ wih1                                       # (1, 4H)

    # projector padded 63 -> 128 output lanes (keeps padded lanes exactly 0)
    wp_pad = jnp.zeros((H, d_pad), f32).at[:, :D].set(wp)
    bp_pad = jnp.zeros((1, d_pad), f32).at[:, :D].set(bp)

    return dict(
        w1x=w1x.astype(bf16),
        whh1=params["whh1"].astype(bf16),
        wcomb=wcomb.astype(bf16),
        b1=params["b1"].astype(f32),
        b1c=(params["b1"].astype(f32) + bcomb),
        wih2=params["wih2"].astype(bf16), whh2=params["whh2"].astype(bf16),
        b2=params["b2"].astype(f32),
        wih3=params["wih3"].astype(bf16), whh3=params["whh3"].astype(bf16),
        b3=params["b3"].astype(f32),
        wp=wp_pad.astype(bf16), bp=bp_pad,
    )


# -----------------------------------------------------------------------------
# Wrapper
# -----------------------------------------------------------------------------
def ac_model_forward(real_seq, params, condition_length=5, ground_truth_length=5,
                     residual_velocities=RESIDUAL_VELOCITIES):
    """real_seq: (B, S, num_joints*3) float32 -> (B, S, num_joints, 3)."""
    B, S, D = real_seq.shape
    assert D == INPUT_SIZE
    BP = max(8, -(-B // 8) * 8)                  # batch padded to full sublanes
    cond_list = tuple(int(v) for v in
                      get_condition_list(S, condition_length, ground_truth_length))

    # time-major + sublane-pad B -> BP + lane-pad 63 -> 128: (S, BP, 128).
    x = jnp.transpose(real_seq.astype(jnp.float32), (1, 0, 2))        # (S, B, 63)
    x = jnp.pad(x, ((0, 0), (0, BP - B), (0, D_PAD - D)))             # (S, BP, 128)

    kp = _pack_params(params)

    kernel = functools.partial(
        _ac_kernel,
        seq_len=S, batch_pad=BP, hidden=HIDDEN_SIZE, d_pad=D_PAD,
        cond_list=cond_list, residual=residual_velocities,
    )

    flat_params = (kp["w1x"], kp["whh1"], kp["wcomb"], kp["b1"], kp["b1c"],
                   kp["wih2"], kp["whh2"], kp["b2"],
                   kp["wih3"], kp["whh3"], kp["b3"],
                   kp["wp"], kp["bp"])
    n_in = 1 + len(flat_params)

    out_pad = pl.pallas_call(
        kernel,
        out_shape=jax.ShapeDtypeStruct((S, BP, D_PAD), jnp.float32),
        in_specs=[pl.BlockSpec(memory_space=pltpu.MemorySpace.VMEM)] * n_in,
        out_specs=pl.BlockSpec(memory_space=pltpu.MemorySpace.VMEM),
    )(x, *flat_params)

    out_bsd = jnp.transpose(out_pad[:, :B, :D], (1, 0, 2))            # (B, S, 63)
    return out_bsd.reshape(B, S, NUM_JOINTS, 3)


# -----------------------------------------------------------------------------
# Deterministic parameter init (PyTorch-style uniform(-1/sqrt(H), 1/sqrt(H)))
# -----------------------------------------------------------------------------
def init_params(key, hidden_size=HIDDEN_SIZE, input_size=INPUT_SIZE):
    H = hidden_size
    bound_lstm = 1.0 / np.sqrt(H)
    bound_lin = 1.0 / np.sqrt(H)
    keys = jax.random.split(key, 16)

    def u(k, shape, bound):
        return jax.random.uniform(k, shape, jnp.float32, -bound, bound)

    def lstm_params(ks, in_dim):
        w_ih = u(ks[0], (4 * H, in_dim), bound_lstm)
        w_hh = u(ks[1], (4 * H, H), bound_lstm)
        b_ih = u(ks[2], (4 * H,), bound_lstm)
        b_hh = u(ks[3], (4 * H,), bound_lstm)
        # store transposed + fused bias for the kernel / reference
        return w_ih.T, w_hh.T, (b_ih + b_hh).reshape(1, 4 * H)

    wih1, whh1, b1 = lstm_params(keys[0:4], input_size)
    wih2, whh2, b2 = lstm_params(keys[4:8], H)
    wih3, whh3, b3 = lstm_params(keys[8:12], H)
    wp = u(keys[12], (input_size, H), bound_lin).T        # (H, input_size)
    bp = u(keys[13], (input_size,), bound_lin).reshape(1, input_size)

    return dict(wih1=wih1, whh1=whh1, b1=b1,
                wih2=wih2, whh2=whh2, b2=b2,
                wih3=wih3, whh3=whh3, b3=b3,
                wp=wp, bp=bp)


# -----------------------------------------------------------------------------
# Pure-JAX f32 reference (same math, no Pallas) for a correctness check
# -----------------------------------------------------------------------------
def ac_model_reference(real_seq, params, condition_length=5, ground_truth_length=5,
                       residual_velocities=RESIDUAL_VELOCITIES):
    B, S, D = real_seq.shape
    H = HIDDEN_SIZE
    cond_list = get_condition_list(S, condition_length, ground_truth_length)

    def cell(x, h, c, w_ih, w_hh, b):
        g = x @ w_ih + h @ w_hh + b
        i = jax.nn.sigmoid(g[:, 0:H]); f = jax.nn.sigmoid(g[:, H:2 * H])
        gg = jnp.tanh(g[:, 2 * H:3 * H]); o = jax.nn.sigmoid(g[:, 3 * H:4 * H])
        c_new = f * c + i * gg
        return o * jnp.tanh(c_new), c_new

    h1 = h2 = h3 = jnp.zeros((B, H), jnp.float32)
    c1 = c2 = c3 = jnp.zeros((B, H), jnp.float32)
    prev = jnp.zeros((B, D), jnp.float32)
    outs = []
    for i in range(S):
        inp = real_seq[:, i, :] if cond_list[i] == 1 else prev
        h1, c1 = cell(inp, h1, c1, params["wih1"], params["whh1"], params["b1"])
        h2, c2 = cell(h1, h2, c2, params["wih2"], params["whh2"], params["b2"])
        h3, c3 = cell(h2, h3, c3, params["wih3"], params["whh3"], params["b3"])
        out = h3 @ params["wp"] + params["bp"]
        if residual_velocities:
            out = inp + out
        prev = out
        outs.append(out)
    out = jnp.stack(outs, axis=1)
    return out.reshape(B, S, NUM_JOINTS, 3)


# -----------------------------------------------------------------------------
if __name__ == "__main__":
    key = jax.random.PRNGKey(0)
    pkey, xkey = jax.random.split(key)

    params = init_params(pkey)

    batch, seq_len = 2, 8
    real_seq = jax.random.normal(xkey, (batch, seq_len, INPUT_SIZE), jnp.float32)

    out = ac_model_forward(real_seq, params)
    out = jax.block_until_ready(out)
    assert out.shape == (batch, seq_len, NUM_JOINTS, 3)

    ref = jax.block_until_ready(ac_model_reference(real_seq, params))
    # Kernel uses bf16 MXU operands with f32 accumulation (single-pass MXU,
    # per the perf review), while the reference runs default-precision f32
    # matmuls, so comparison tolerance is set at the bf16 level.
    np.testing.assert_allclose(np.asarray(out), np.asarray(ref),
                               rtol=5e-2, atol=5e-2)

    print("KERNEL_OK")
</pallas_src>

<mosaic_0001>
module attributes {stable_mosaic.version = 11 : i64} {
  func.func @_ac_kernel(%arg0: memref<8x8x128xf32, #tpu.memory_space<vmem>>, %arg1: memref<128x128xbf16, #tpu.memory_space<vmem>>, %arg2: memref<32x128xbf16, #tpu.memory_space<vmem>>, %arg3: memref<32x128xbf16, #tpu.memory_space<vmem>>, %arg4: memref<1x128xf32, #tpu.memory_space<vmem>>, %arg5: memref<1x128xf32, #tpu.memory_space<vmem>>, %arg6: memref<32x128xbf16, #tpu.memory_space<vmem>>, %arg7: memref<32x128xbf16, #tpu.memory_space<vmem>>, %arg8: memref<1x128xf32, #tpu.memory_space<vmem>>, %arg9: memref<32x128xbf16, #tpu.memory_space<vmem>>, %arg10: memref<32x128xbf16, #tpu.memory_space<vmem>>, %arg11: memref<1x128xf32, #tpu.memory_space<vmem>>, %arg12: memref<32x128xbf16, #tpu.memory_space<vmem>>, %arg13: memref<1x128xf32, #tpu.memory_space<vmem>>, %arg14: memref<8x8x128xf32, #tpu.memory_space<vmem>>) attributes {dimension_semantics = [], scalar_prefetch = 0 : i64, scratch_operands = 0 : i64, tpu.core_type = #tpu.core_type<tc>} {
    %c0 = arith.constant 0 : index
    %c0_0 = arith.constant 0 : index
    %0 = vector.load %arg2[%c0, %c0_0] : memref<32x128xbf16, #tpu.memory_space<vmem>>, vector<32x128xbf16>
    %c0_1 = arith.constant 0 : index
    %c0_2 = arith.constant 0 : index
    %1 = vector.load %arg3[%c0_1, %c0_2] : memref<32x128xbf16, #tpu.memory_space<vmem>>, vector<32x128xbf16>
    %c0_3 = arith.constant 0 : index
    %c0_4 = arith.constant 0 : index
    %2 = vector.load %arg6[%c0_3, %c0_4] : memref<32x128xbf16, #tpu.memory_space<vmem>>, vector<32x128xbf16>
    %c0_5 = arith.constant 0 : index
    %c0_6 = arith.constant 0 : index
    %3 = vector.load %arg7[%c0_5, %c0_6] : memref<32x128xbf16, #tpu.memory_space<vmem>>, vector<32x128xbf16>
    %c0_7 = arith.constant 0 : index
    %c0_8 = arith.constant 0 : index
    %4 = vector.load %arg9[%c0_7, %c0_8] : memref<32x128xbf16, #tpu.memory_space<vmem>>, vector<32x128xbf16>
    %c0_9 = arith.constant 0 : index
    %c0_10 = arith.constant 0 : index
    %5 = vector.load %arg10[%c0_9, %c0_10] : memref<32x128xbf16, #tpu.memory_space<vmem>>, vector<32x128xbf16>
    %c0_11 = arith.constant 0 : index
    %c0_12 = arith.constant 0 : index
    %6 = vector.load %arg12[%c0_11, %c0_12] : memref<32x128xbf16, #tpu.memory_space<vmem>>, vector<32x128xbf16>
    %c0_13 = arith.constant 0 : index
    %c0_14 = arith.constant 0 : index
    %7 = vector.load %arg4[%c0_13, %c0_14] : memref<1x128xf32, #tpu.memory_space<vmem>>, vector<1x128xf32>
    %c0_15 = arith.constant 0 : index
    %c0_16 = arith.constant 0 : index
    %8 = vector.load %arg8[%c0_15, %c0_16] : memref<1x128xf32, #tpu.memory_space<vmem>>, vector<1x128xf32>
    %9 = vector.shape_cast %8 : vector<1x128xf32> to vector<1x128xf32>
    %10 = vector.broadcast %9 : vector<1x128xf32> to vector<8x128xf32>
    %c0_17 = arith.constant 0 : index
    %c0_18 = arith.constant 0 : index
    %11 = vector.load %arg11[%c0_17, %c0_18] : memref<1x128xf32, #tpu.memory_space<vmem>>, vector<1x128xf32>
    %12 = vector.shape_cast %11 : vector<1x128xf32> to vector<1x128xf32>
    %13 = vector.broadcast %12 : vector<1x128xf32> to vector<8x128xf32>
    %c0_19 = arith.constant 0 : index
    %c0_20 = arith.constant 0 : index
    %14 = vector.load %arg13[%c0_19, %c0_20] : memref<1x128xf32, #tpu.memory_space<vmem>>, vector<1x128xf32>
    %15 = vector.shape_cast %14 : vector<1x128xf32> to vector<1x128xf32>
    %16 = vector.broadcast %15 : vector<1x128xf32> to vector<8x128xf32>
    %c0_21 = arith.constant 0 : index
    %c0_22 = arith.constant 0 : index
    %17 = vector.load %arg5[%c0_21, %c0_22] : memref<1x128xf32, #tpu.memory_space<vmem>>, vector<1x128xf32>
    %18 = vector.shape_cast %17 : vector<1x128xf32> to vector<1x128xf32>
    %19 = vector.broadcast %18 : vector<1x128xf32> to vector<8x128xf32>
    %c0_23 = arith.constant 0 : index
    %c0_24 = arith.constant 0 : index
    %c0_25 = arith.constant 0 : index
    %20 = vector.load %arg0[%c0_23, %c0_24, %c0_25] : memref<8x8x128xf32, #tpu.memory_space<vmem>>, vector<8x8x128xf32>
    %21 = vector.shape_cast %20 : vector<8x8x128xf32> to vector<64x128xf32>
    %22 = arith.truncf %21 : vector<64x128xf32> to vector<64x128xbf16>
    %c0_26 = arith.constant 0 : index
    %c0_27 = arith.constant 0 : index
    %23 = vector.load %arg1[%c0_26, %c0_27] : memref<128x128xbf16, #tpu.memory_space<vmem>>, vector<128x128xbf16>
    %cst = arith.constant dense<0.000000e+00> : vector<64x128xf32>
    %24 = tpu.matmul %22, %23, %cst {dimension_numbers = #tpu.dot_dimension_numbers<[1], [0], [0], [1], [0, 0, 1, 1], [], []>} : vector<64x128xbf16>, vector<128x128xbf16>, vector<64x128xf32> -> vector<64x128xf32>
    %25 = vector.broadcast %7 : vector<1x128xf32> to vector<64x128xf32>
    %26 = arith.addf %24, %25 : vector<64x128xf32>
    %27 = vector.shape_cast %26 : vector<64x128xf32> to vector<8x8x128xf32>
    %cst_28 = arith.constant 0.000000e+00 : f32
    %28 = vector.broadcast %cst_28 : f32 to vector<8x32xf32>
    %29 = vector.extract_strided_slice %27 {offsets = [0, 0, 0], sizes = [1, 8, 128], strides = [1, 1, 1]} : vector<8x8x128xf32> to vector<1x8x128xf32>
    %30 = vector.shape_cast %29 : vector<1x8x128xf32> to vector<8x128xf32>
    %31 = arith.truncf %28 : vector<8x32xf32> to vector<8x32xbf16>
    %cst_29 = arith.constant dense<0.000000e+00> : vector<8x128xf32>
    %32 = tpu.matmul %31, %0, %cst_29 {dimension_numbers = #tpu.dot_dimension_numbers<[1], [0], [0], [1], [0, 0, 1, 1], [], []>} : vector<8x32xbf16>, vector<32x128xbf16>, vector<8x128xf32> -> vector<8x128xf32>
    %33 = arith.addf %30, %32 : vector<8x128xf32>
    %34 = arith.negf %33 : vector<8x128xf32>
    %35 = math.exp %34 : vector<8x128xf32>
    %cst_30 = arith.constant 1.000000e+00 : f32
    %36 = vector.broadcast %cst_30 : f32 to vector<8x128xf32>
    %37 = arith.addf %36, %35 : vector<8x128xf32>
    %38 = arith.divf %36, %37 : vector<8x128xf32>
    %39 = math.tanh %33 : vector<8x128xf32>
    %40 = vector.extract_strided_slice %38 {offsets = [0, 0], sizes = [8, 32], strides = [1, 1]} : vector<8x128xf32> to vector<8x32xf32>
    %41 = vector.extract_strided_slice %38 {offsets = [0, 32], sizes = [8, 32], strides = [1, 1]} : vector<8x128xf32> to vector<8x32xf32>
    %42 = vector.extract_strided_slice %39 {offsets = [0, 64], sizes = [8, 32], strides = [1, 1]} : vector<8x128xf32> to vector<8x32xf32>
    %43 = vector.extract_strided_slice %38 {offsets = [0, 96], sizes = [8, 32], strides = [1, 1]} : vector<8x128xf32> to vector<8x32xf32>
    %44 = arith.mulf %41, %28 : vector<8x32xf32>
    %45 = arith.mulf %40, %42 : vector<8x32xf32>
    %46 = arith.addf %44, %45 : vector<8x32xf32>
    %47 = math.tanh %46 : vector<8x32xf32>
    %48 = arith.mulf %43, %47 : vector<8x32xf32>
    %49 = arith.truncf %48 : vector<8x32xf32> to vector<8x32xbf16>
    %cst_31 = arith.constant dense<0.000000e+00> : vector<8x128xf32>
    %50 = tpu.matmul %49, %2, %cst_31 {dimension_numbers = #tpu.dot_dimension_numbers<[1], [0], [0], [1], [0, 0, 1, 1], [], []>} : vector<8x32xbf16>, vector<32x128xbf16>, vector<8x128xf32> -> vector<8x128xf32>
    %51 = arith.truncf %28 : vector<8x32xf32> to vector<8x32xbf16>
    %cst_32 = arith.constant dense<0.000000e+00> : vector<8x128xf32>
    %52 = tpu.matmul %51, %3, %cst_32 {dimension_numbers = #tpu.dot_dimension_numbers<[1], [0], [0], [1], [0, 0, 1, 1], [], []>} : vector<8x32xbf16>, vector<32x128xbf16>, vector<8x128xf32> -> vector<8x128xf32>
    %53 = arith.addf %50, %52 : vector<8x128xf32>
    %54 = arith.addf %53, %10 : vector<8x128xf32>
    %55 = arith.negf %54 : vector<8x128xf32>
    %56 = math.exp %55 : vector<8x128xf32>
    %cst_33 = arith.constant 1.000000e+00 : f32
    %57 = vector.broadcast %cst_33 : f32 to vector<8x128xf32>
    %58 = arith.addf %57, %56 : vector<8x128xf32>
    %59 = arith.divf %57, %58 : vector<8x128xf32>
    %60 = math.tanh %54 : vector<8x128xf32>
    %61 = vector.extract_strided_slice %59 {offsets = [0, 0], sizes = [8, 32], strides = [1, 1]} : vector<8x128xf32> to vector<8x32xf32>
    %62 = vector.extract_strided_slice %59 {offsets = [0, 32], sizes = [8, 32], strides = [1, 1]} : vector<8x128xf32> to vector<8x32xf32>
    %63 = vector.extract_strided_slice %60 {offsets = [0, 64], sizes = [8, 32], strides = [1, 1]} : vector<8x128xf32> to vector<8x32xf32>
    %64 = vector.extract_strided_slice %59 {offsets = [0, 96], sizes = [8, 32], strides = [1, 1]} : vector<8x128xf32> to vector<8x32xf32>
    %65 = arith.mulf %62, %28 : vector<8x32xf32>
    %66 = arith.mulf %61, %63 : vector<8x32xf32>
    %67 = arith.addf %65, %66 : vector<8x32xf32>
    %68 = math.tanh %67 : vector<8x32xf32>
    %69 = arith.mulf %64, %68 : vector<8x32xf32>
    %70 = arith.truncf %69 : vector<8x32xf32> to vector<8x32xbf16>
    %cst_34 = arith.constant dense<0.000000e+00> : vector<8x128xf32>
    %71 = tpu.matmul %70, %4, %cst_34 {dimension_numbers = #tpu.dot_dimension_numbers<[1], [0], [0], [1], [0, 0, 1, 1], [], []>} : vector<8x32xbf16>, vector<32x128xbf16>, vector<8x128xf32> -> vector<8x128xf32>
    %72 = arith.truncf %28 : vector<8x32xf32> to vector<8x32xbf16>
    %cst_35 = arith.constant dense<0.000000e+00> : vector<8x128xf32>
    %73 = tpu.matmul %72, %5, %cst_35 {dimension_numbers = #tpu.dot_dimension_numbers<[1], [0], [0], [1], [0, 0, 1, 1], [], []>} : vector<8x32xbf16>, vector<32x128xbf16>, vector<8x128xf32> -> vector<8x128xf32>
    %74 = arith.addf %71, %73 : vector<8x128xf32>
    %75 = arith.addf %74, %13 : vector<8x128xf32>
    %76 = arith.negf %75 : vector<8x128xf32>
    %77 = math.exp %76 : vector<8x128xf32>
    %cst_36 = arith.constant 1.000000e+00 : f32
    %78 = vector.broadcast %cst_36 : f32 to vector<8x128xf32>
    %79 = arith.addf %78, %77 : vector<8x128xf32>
    %80 = arith.divf %78, %79 : vector<8x128xf32>
    %81 = math.tanh %75 : vector<8x128xf32>
    %82 = vector.extract_strided_slice %80 {offsets = [0, 0], sizes = [8, 32], strides = [1, 1]} : vector<8x128xf32> to vector<8x32xf32>
    %83 = vector.extract_strided_slice %80 {offsets = [0, 32], sizes = [8, 32], strides = [1, 1]} : vector<8x128xf32> to vector<8x32xf32>
    %84 = vector.extract_strided_slice %81 {offsets = [0, 64], sizes = [8, 32], strides = [1, 1]} : vector<8x128xf32> to vector<8x32xf32>
    %85 = vector.extract_strided_slice %80 {offsets = [0, 96], sizes = [8, 32], strides = [1, 1]} : vector<8x128xf32> to vector<8x32xf32>
    %86 = arith.mulf %83, %28 : vector<8x32xf32>
    %87 = arith.mulf %82, %84 : vector<8x32xf32>
    %88 = arith.addf %86, %87 : vector<8x32xf32>
    %89 = math.tanh %88 : vector<8x32xf32>
    %90 = arith.mulf %85, %89 : vector<8x32xf32>
    %91 = arith.truncf %90 : vector<8x32xf32> to vector<8x32xbf16>
    %cst_37 = arith.constant dense<0.000000e+00> : vector<8x128xf32>
    %92 = tpu.matmul %91, %6, %cst_37 {dimension_numbers = #tpu.dot_dimension_numbers<[1], [0], [0], [1], [0, 0, 1, 1], [], []>} : vector<8x32xbf16>, vector<32x128xbf16>, vector<8x128xf32> -> vector<8x128xf32>
    %93 = arith.addf %92, %16 : vector<8x128xf32>
    %c0_38 = arith.constant 0 : index
    %c0_39 = arith.constant 0 : index
    %c0_40 = arith.constant 0 : index
    %94 = vector.load %arg14[%c0_38, %c0_39, %c0_40] : memref<8x8x128xf32, #tpu.memory_space<vmem>>, vector<1x8x128xf32>
    %95 = vector.shape_cast %94 : vector<1x8x128xf32> to vector<8x128xf32>
    %96 = vector.shape_cast %93 : vector<8x128xf32> to vector<1x8x128xf32>
    tpu.vector_store %arg14[%c0_38, %c0_39, %c0_40], %96 {strides = array<i32>} : memref<8x8x128xf32, #tpu.memory_space<vmem>>, vector<1x8x128xf32>,
    %97 = vector.extract_strided_slice %27 {offsets = [1, 0, 0], sizes = [1, 8, 128], strides = [1, 1, 1]} : vector<8x8x128xf32> to vector<1x8x128xf32>
    %98 = vector.shape_cast %97 : vector<1x8x128xf32> to vector<8x128xf32>
    %99 = arith.truncf %48 : vector<8x32xf32> to vector<8x32xbf16>
    %cst_41 = arith.constant dense<0.000000e+00> : vector<8x128xf32>
    %100 = tpu.matmul %99, %0, %cst_41 {dimension_numbers = #tpu.dot_dimension_numbers<[1], [0], [0], [1], [0, 0, 1, 1], [], []>} : vector<8x32xbf16>, vector<32x128xbf16>, vector<8x128xf32> -> vector<8x128xf32>
    %101 = arith.addf %98, %100 : vector<8x128xf32>
    %102 = arith.negf %101 : vector<8x128xf32>
    %103 = math.exp %102 : vector<8x128xf32>
    %cst_42 = arith.constant 1.000000e+00 : f32
    %104 = vector.broadcast %cst_42 : f32 to vector<8x128xf32>
    %105 = arith.addf %104, %103 : vector<8x128xf32>
    %106 = arith.divf %104, %105 : vector<8x128xf32>
    %107 = math.tanh %101 : vector<8x128xf32>
    %108 = vector.extract_strided_slice %106 {offsets = [0, 0], sizes = [8, 32], strides = [1, 1]} : vector<8x128xf32> to vector<8x32xf32>
    %109 = vector.extract_strided_slice %106 {offsets = [0, 32], sizes = [8, 32], strides = [1, 1]} : vector<8x128xf32> to vector<8x32xf32>
    %110 = vector.extract_strided_slice %107 {offsets = [0, 64], sizes = [8, 32], strides = [1, 1]} : vector<8x128xf32> to vector<8x32xf32>
    %111 = vector.extract_strided_slice %106 {offsets = [0, 96], sizes = [8, 32], strides = [1, 1]} : vector<8x128xf32> to vector<8x32xf32>
    %112 = arith.mulf %109, %46 : vector<8x32xf32>
    %113 = arith.mulf %108, %110 : vector<8x32xf32>
    %114 = arith.addf %112, %113 : vector<8x32xf32>
    %115 = math.tanh %114 : vector<8x32xf32>
    %116 = arith.mulf %111, %115 : vector<8x32xf32>
    %117 = arith.truncf %116 : vector<8x32xf32> to vector<8x32xbf16>
    %cst_43 = arith.constant dense<0.000000e+00> : vector<8x128xf32>
    %118 = tpu.matmul %117, %2, %cst_43 {dimension_numbers = #tpu.dot_dimension_numbers<[1], [0], [0], [1], [0, 0, 1, 1], [], []>} : vector<8x32xbf16>, vector<32x128xbf16>, vector<8x128xf32> -> vector<8x128xf32>
    %119 = arith.truncf %69 : vector<8x32xf32> to vector<8x32xbf16>
    %cst_44 = arith.constant dense<0.000000e+00> : vector<8x128xf32>
    %120 = tpu.matmul %119, %3, %cst_44 {dimension_numbers = #tpu.dot_dimension_numbers<[1], [0], [0], [1], [0, 0, 1, 1], [], []>} : vector<8x32xbf16>, vector<32x128xbf16>, vector<8x128xf32> -> vector<8x128xf32>
    %121 = arith.addf %118, %120 : vector<8x128xf32>
    %122 = arith.addf %121, %10 : vector<8x128xf32>
    %123 = arith.negf %122 : vector<8x128xf32>
    %124 = math.exp %123 : vector<8x128xf32>
    %cst_45 = arith.constant 1.000000e+00 : f32
    %125 = vector.broadcast %cst_45 : f32 to vector<8x128xf32>
    %126 = arith.addf %125, %124 : vector<8x128xf32>
    %127 = arith.divf %125, %126 : vector<8x128xf32>
    %128 = math.tanh %122 : vector<8x128xf32>
    %129 = vector.extract_strided_slice %127 {offsets = [0, 0], sizes = [8, 32], strides = [1, 1]} : vector<8x128xf32> to vector<8x32xf32>
    %130 = vector.extract_strided_slice %127 {offsets = [0, 32], sizes = [8, 32], strides = [1, 1]} : vector<8x128xf32> to vector<8x32xf32>
    %131 = vector.extract_strided_slice %128 {offsets = [0, 64], sizes = [8, 32], strides = [1, 1]} : vector<8x128xf32> to vector<8x32xf32>
    %132 = vector.extract_strided_slice %127 {offsets = [0, 96], sizes = [8, 32], strides = [1, 1]} : vector<8x128xf32> to vector<8x32xf32>
    %133 = arith.mulf %130, %67 : vector<8x32xf32>
    %134 = arith.mulf %129, %131 : vector<8x32xf32>
    %135 = arith.addf %133, %134 : vector<8x32xf32>
    %136 = math.tanh %135 : vector<8x32xf32>
    %137 = arith.mulf %132, %136 : vector<8x32xf32>
    %138 = arith.truncf %137 : vector<8x32xf32> to vector<8x32xbf16>
    %cst_46 = arith.constant dense<0.000000e+00> : vector<8x128xf32>
    %139 = tpu.matmul %138, %4, %cst_46 {dimension_numbers = #tpu.dot_dimension_numbers<[1], [0], [0], [1], [0, 0, 1, 1], [], []>} : vector<8x32xbf16>, vector<32x128xbf16>, vector<8x128xf32> -> vector<8x128xf32>
    %140 = arith.truncf %90 : vector<8x32xf32> to vector<8x32xbf16>
    %cst_47 = arith.constant dense<0.000000e+00> : vector<8x128xf32>
    %141 = tpu.matmul %140, %5, %cst_47 {dimension_numbers = #tpu.dot_dimension_numbers<[1], [0], [0], [1], [0, 0, 1, 1], [], []>} : vector<8x32xbf16>, vector<32x128xbf16>, vector<8x128xf32> -> vector<8x128xf32>
    %142 = arith.addf %139, %141 : vector<8x128xf32>
    %143 = arith.addf %142, %13 : vector<8x128xf32>
    %144 = arith.negf %143 : vector<8x128xf32>
    %145 = math.exp %144 : vector<8x128xf32>
    %cst_48 = arith.constant 1.000000e+00 : f32
    %146 = vector.broadcast %cst_48 : f32 to vector<8x128xf32>
    %147 = arith.addf %146, %145 : vector<8x128xf32>
    %148 = arith.divf %146, %147 : vector<8x128xf32>
    %149 = math.tanh %143 : vector<8x128xf32>
    %150 = vector.extract_strided_slice %148 {offsets = [0, 0], sizes = [8, 32], strides = [1, 1]} : vector<8x128xf32> to vector<8x32xf32>
    %151 = vector.extract_strided_slice %148 {offsets = [0, 32], sizes = [8, 32], strides = [1, 1]} : vector<8x128xf32> to vector<8x32xf32>
    %152 = vector.extract_strided_slice %149 {offsets = [0, 64], sizes = [8, 32], strides = [1, 1]} : vector<8x128xf32> to vector<8x32xf32>
    %153 = vector.extract_strided_slice %148 {offsets = [0, 96], sizes = [8, 32], strides = [1, 1]} : vector<8x128xf32> to vector<8x32xf32>
    %154 = arith.mulf %151, %88 : vector<8x32xf32>
    %155 = arith.mulf %150, %152 : vector<8x32xf32>
    %156 = arith.addf %154, %155 : vector<8x32xf32>
    %157 = math.tanh %156 : vector<8x32xf32>
    %158 = arith.mulf %153, %157 : vector<8x32xf32>
    %159 = arith.truncf %158 : vector<8x32xf32> to vector<8x32xbf16>
    %cst_49 = arith.constant dense<0.000000e+00> : vector<8x128xf32>
    %160 = tpu.matmul %159, %6, %cst_49 {dimension_numbers = #tpu.dot_dimension_numbers<[1], [0], [0], [1], [0, 0, 1, 1], [], []>} : vector<8x32xbf16>, vector<32x128xbf16>, vector<8x128xf32> -> vector<8x128xf32>
    %161 = arith.addf %160, %16 : vector<8x128xf32>
    %c1 = arith.constant 1 : index
    %c0_50 = arith.constant 0 : index
    %c0_51 = arith.constant 0 : index
    %162 = vector.load %arg14[%c1, %c0_50, %c0_51] : memref<8x8x128xf32, #tpu.memory_space<vmem>>, vector<1x8x128xf32>
    %163 = vector.shape_cast %162 : vector<1x8x128xf32> to vector<8x128xf32>
    %164 = vector.shape_cast %161 : vector<8x128xf32> to vector<1x8x128xf32>
    tpu.vector_store %arg14[%c1, %c0_50, %c0_51], %164 {strides = array<i32>} : memref<8x8x128xf32, #tpu.memory_space<vmem>>, vector<1x8x128xf32>,
    %165 = vector.extract_strided_slice %27 {offsets = [2, 0, 0], sizes = [1, 8, 128], strides = [1, 1, 1]} : vector<8x8x128xf32> to vector<1x8x128xf32>
    %166 = vector.shape_cast %165 : vector<1x8x128xf32> to vector<8x128xf32>
    %167 = arith.truncf %116 : vector<8x32xf32> to vector<8x32xbf16>
    %cst_52 = arith.constant dense<0.000000e+00> : vector<8x128xf32>
    %168 = tpu.matmul %167, %0, %cst_52 {dimension_numbers = #tpu.dot_dimension_numbers<[1], [0], [0], [1], [0, 0, 1, 1], [], []>} : vector<8x32xbf16>, vector<32x128xbf16>, vector<8x128xf32> -> vector<8x128xf32>
    %169 = arith.addf %166, %168 : vector<8x128xf32>
    %170 = arith.negf %169 : vector<8x128xf32>
    %171 = math.exp %170 : vector<8x128xf32>
    %cst_53 = arith.constant 1.000000e+00 : f32
    %172 = vector.broadcast %cst_53 : f32 to vector<8x128xf32>
    %173 = arith.addf %172, %171 : vector<8x128xf32>
    %174 = arith.divf %172, %173 : vector<8x128xf32>
    %175 = math.tanh %169 : vector<8x128xf32>
    %176 = vector.extract_strided_slice %174 {offsets = [0, 0], sizes = [8, 32], strides = [1, 1]} : vector<8x128xf32> to vector<8x32xf32>
    %177 = vector.extract_strided_slice %174 {offsets = [0, 32], sizes = [8, 32], strides = [1, 1]} : vector<8x128xf32> to vector<8x32xf32>
    %178 = vector.extract_strided_slice %175 {offsets = [0, 64], sizes = [8, 32], strides = [1, 1]} : vector<8x128xf32> to vector<8x32xf32>
    %179 = vector.extract_strided_slice %174 {offsets = [0, 96], sizes = [8, 32], strides = [1, 1]} : vector<8x128xf32> to vector<8x32xf32>
    %180 = arith.mulf %177, %114 : vector<8x32xf32>
    %181 = arith.mulf %176, %178 : vector<8x32xf32>
    %182 = arith.addf %180, %181 : vector<8x32xf32>
    %183 = math.tanh %182 : vector<8x32xf32>
    %184 = arith.mulf %179, %183 : vector<8x32xf32>
    %185 = arith.truncf %184 : vector<8x32xf32> to vector<8x32xbf16>
    %cst_54 = arith.constant dense<0.000000e+00> : vector<8x128xf32>
    %186 = tpu.matmul %185, %2, %cst_54 {dimension_numbers = #tpu.dot_dimension_numbers<[1], [0], [0], [1], [0, 0, 1, 1], [], []>} : vector<8x32xbf16>, vector<32x128xbf16>, vector<8x128xf32> -> vector<8x128xf32>
    %187 = arith.truncf %137 : vector<8x32xf32> to vector<8x32xbf16>
    %cst_55 = arith.constant dense<0.000000e+00> : vector<8x128xf32>
    %188 = tpu.matmul %187, %3, %cst_55 {dimension_numbers = #tpu.dot_dimension_numbers<[1], [0], [0], [1], [0, 0, 1, 1], [], []>} : vector<8x32xbf16>, vector<32x128xbf16>, vector<8x128xf32> -> vector<8x128xf32>
    %189 = arith.addf %186, %188 : vector<8x128xf32>
    %190 = arith.addf %189, %10 : vector<8x128xf32>
    %191 = arith.negf %190 : vector<8x128xf32>
    %192 = math.exp %191 : vector<8x128xf32>
    %cst_56 = arith.constant 1.000000e+00 : f32
    %193 = vector.broadcast %cst_56 : f32 to vector<8x128xf32>
    %194 = arith.addf %193, %192 : vector<8x128xf32>
    %195 = arith.divf %193, %194 : vector<8x128xf32>
    %196 = math.tanh %190 : vector<8x128xf32>
    %197 = vector.extract_strided_slice %195 {offsets = [0, 0], sizes = [8, 32], strides = [1, 1]} : vector<8x128xf32> to vector<8x32xf32>
    %198 = vector.extract_strided_slice %195 {offsets = [0, 32], sizes = [8, 32], strides = [1, 1]} : vector<8x128xf32> to vector<8x32xf32>
    %199 = vector.extract_strided_slice %196 {offsets = [0, 64], sizes = [8, 32], strides = [1, 1]} : vector<8x128xf32> to vector<8x32xf32>
    %200 = vector.extract_strided_slice %195 {offsets = [0, 96], sizes = [8, 32], strides = [1, 1]} : vector<8x128xf32> to vector<8x32xf32>
    %201 = arith.mulf %198, %135 : vector<8x32xf32>
    %202 = arith.mulf %197, %199 : vector<8x32xf32>
    %203 = arith.addf %201, %202 : vector<8x32xf32>
    %204 = math.tanh %203 : vector<8x32xf32>
    %205 = arith.mulf %200, %204 : vector<8x32xf32>
    %206 = arith.truncf %205 : vector<8x32xf32> to vector<8x32xbf16>
    %cst_57 = arith.constant dense<0.000000e+00> : vector<8x128xf32>
    %207 = tpu.matmul %206, %4, %cst_57 {dimension_numbers = #tpu.dot_dimension_numbers<[1], [0], [0], [1], [0, 0, 1, 1], [], []>} : vector<8x32xbf16>, vector<32x128xbf16>, vector<8x128xf32> -> vector<8x128xf32>
    %208 = arith.truncf %158 : vector<8x32xf32> to vector<8x32xbf16>
    %cst_58 = arith.constant dense<0.000000e+00> : vector<8x128xf32>
    %209 = tpu.matmul %208, %5, %cst_58 {dimension_numbers = #tpu.dot_dimension_numbers<[1], [0], [0], [1], [0, 0, 1, 1], [], []>} : vector<8x32xbf16>, vector<32x128xbf16>, vector<8x128xf32> -> vector<8x128xf32>
    %210 = arith.addf %207, %209 : vector<8x128xf32>
    %211 = arith.addf %210, %13 : vector<8x128xf32>
    %212 = arith.negf %211 : vector<8x128xf32>
    %213 = math.exp %212 : vector<8x128xf32>
    %cst_59 = arith.constant 1.000000e+00 : f32
    %214 = vector.broadcast %cst_59 : f32 to vector<8x128xf32>
    %215 = arith.addf %214, %213 : vector<8x128xf32>
    %216 = arith.divf %214, %215 : vector<8x128xf32>
    %217 = math.tanh %211 : vector<8x128xf32>
    %218 = vector.extract_strided_slice %216 {offsets = [0, 0], sizes = [8, 32], strides = [1, 1]} : vector<8x128xf32> to vector<8x32xf32>
    %219 = vector.extract_strided_slice %216 {offsets = [0, 32], sizes = [8, 32], strides = [1, 1]} : vector<8x128xf32> to vector<8x32xf32>
    %220 = vector.extract_strided_slice %217 {offsets = [0, 64], sizes = [8, 32], strides = [1, 1]} : vector<8x128xf32> to vector<8x32xf32>
    %221 = vector.extract_strided_slice %216 {offsets = [0, 96], sizes = [8, 32], strides = [1, 1]} : vector<8x128xf32> to vector<8x32xf32>
    %222 = arith.mulf %219, %156 : vector<8x32xf32>
    %223 = arith.mulf %218, %220 : vector<8x32xf32>
    %224 = arith.addf %222, %223 : vector<8x32xf32>
    %225 = math.tanh %224 : vector<8x32xf32>
    %226 = arith.mulf %221, %225 : vector<8x32xf32>
    %227 = arith.truncf %226 : vector<8x32xf32> to vector<8x32xbf16>
    %cst_60 = arith.constant dense<0.000000e+00> : vector<8x128xf32>
    %228 = tpu.matmul %227, %6, %cst_60 {dimension_numbers = #tpu.dot_dimension_numbers<[1], [0], [0], [1], [0, 0, 1, 1], [], []>} : vector<8x32xbf16>, vector<32x128xbf16>, vector<8x128xf32> -> vector<8x128xf32>
    %229 = arith.addf %228, %16 : vector<8x128xf32>
    %c2 = arith.constant 2 : index
    %c0_61 = arith.constant 0 : index
    %c0_62 = arith.constant 0 : index
    %230 = vector.load %arg14[%c2, %c0_61, %c0_62] : memref<8x8x128xf32, #tpu.memory_space<vmem>>, vector<1x8x128xf32>
    %231 = vector.shape_cast %230 : vector<1x8x128xf32> to vector<8x128xf32>
    %232 = vector.shape_cast %229 : vector<8x128xf32> to vector<1x8x128xf32>
    tpu.vector_store %arg14[%c2, %c0_61, %c0_62], %232 {strides = array<i32>} : memref<8x8x128xf32, #tpu.memory_space<vmem>>, vector<1x8x128xf32>,
    %233 = vector.extract_strided_slice %27 {offsets = [3, 0, 0], sizes = [1, 8, 128], strides = [1, 1, 1]} : vector<8x8x128xf32> to vector<1x8x128xf32>
    %234 = vector.shape_cast %233 : vector<1x8x128xf32> to vector<8x128xf32>
    %235 = arith.truncf %184 : vector<8x32xf32> to vector<8x32xbf16>
    %cst_63 = arith.constant dense<0.000000e+00> : vector<8x128xf32>
    %236 = tpu.matmul %235, %0, %cst_63 {dimension_numbers = #tpu.dot_dimension_numbers<[1], [0], [0], [1], [0, 0, 1, 1], [], []>} : vector<8x32xbf16>, vector<32x128xbf16>, vector<8x128xf32> -> vector<8x128xf32>
    %237 = arith.addf %234, %236 : vector<8x128xf32>
    %238 = arith.negf %237 : vector<8x128xf32>
    %239 = math.exp %238 : vector<8x128xf32>
    %cst_64 = arith.constant 1.000000e+00 : f32
    %240 = vector.broadcast %cst_64 : f32 to vector<8x128xf32>
    %241 = arith.addf %240, %239 : vector<8x128xf32>
    %242 = arith.divf %240, %241 : vector<8x128xf32>
    %243 = math.tanh %237 : vector<8x128xf32>
    %244 = vector.extract_strided_slice %242 {offsets = [0, 0], sizes = [8, 32], strides = [1, 1]} : vector<8x128xf32> to vector<8x32xf32>
    %245 = vector.extract_strided_slice %242 {offsets = [0, 32], sizes = [8, 32], strides = [1, 1]} : vector<8x128xf32> to vector<8x32xf32>
    %246 = vector.extract_strided_slice %243 {offsets = [0, 64], sizes = [8, 32], strides = [1, 1]} : vector<8x128xf32> to vector<8x32xf32>
    %247 = vector.extract_strided_slice %242 {offsets = [0, 96], sizes = [8, 32], strides = [1, 1]} : vector<8x128xf32> to vector<8x32xf32>
    %248 = arith.mulf %245, %182 : vector<8x32xf32>
    %249 = arith.mulf %244, %246 : vector<8x32xf32>
    %250 = arith.addf %248, %249 : vector<8x32xf32>
    %251 = math.tanh %250 : vector<8x32xf32>
    %252 = arith.mulf %247, %251 : vector<8x32xf32>
    %253 = arith.truncf %252 : vector<8x32xf32> to vector<8x32xbf16>
    %cst_65 = arith.constant dense<0.000000e+00> : vector<8x128xf32>
    %254 = tpu.matmul %253, %2, %cst_65 {dimension_numbers = #tpu.dot_dimension_numbers<[1], [0], [0], [1], [0, 0, 1, 1], [], []>} : vector<8x32xbf16>, vector<32x128xbf16>, vector<8x128xf32> -> vector<8x128xf32>
    %255 = arith.truncf %205 : vector<8x32xf32> to vector<8x32xbf16>
    %cst_66 = arith.constant dense<0.000000e+00> : vector<8x128xf32>
    %256 = tpu.matmul %255, %3, %cst_66 {dimension_numbers = #tpu.dot_dimension_numbers<[1], [0], [0], [1], [0, 0, 1, 1], [], []>} : vector<8x32xbf16>, vector<32x128xbf16>, vector<8x128xf32> -> vector<8x128xf32>
    %257 = arith.addf %254, %256 : vector<8x128xf32>
    %258 = arith.addf %257, %10 : vector<8x128xf32>
    %259 = arith.negf %258 : vector<8x128xf32>
    %260 = math.exp %259 : vector<8x128xf32>
    %cst_67 = arith.constant 1.000000e+00 : f32
    %261 = vector.broadcast %cst_67 : f32 to vector<8x128xf32>
    %262 = arith.addf %261, %260 : vector<8x128xf32>
    %263 = arith.divf %261, %262 : vector<8x128xf32>
    %264 = math.tanh %258 : vector<8x128xf32>
    %265 = vector.extract_strided_slice %263 {offsets = [0, 0], sizes = [8, 32], strides = [1, 1]} : vector<8x128xf32> to vector<8x32xf32>
    %266 = vector.extract_strided_slice %263 {offsets = [0, 32], sizes = [8, 32], strides = [1, 1]} : vector<8x128xf32> to vector<8x32xf32>
    %267 = vector.extract_strided_slice %264 {offsets = [0, 64], sizes = [8, 32], strides = [1, 1]} : vector<8x128xf32> to vector<8x32xf32>
    %268 = vector.extract_strided_slice %263 {offsets = [0, 96], sizes = [8, 32], strides = [1, 1]} : vector<8x128xf32> to vector<8x32xf32>
    %269 = arith.mulf %266, %203 : vector<8x32xf32>
    %270 = arith.mulf %265, %267 : vector<8x32xf32>
    %271 = arith.addf %269, %270 : vector<8x32xf32>
    %272 = math.tanh %271 : vector<8x32xf32>
    %273 = arith.mulf %268, %272 : vector<8x32xf32>
    %274 = arith.truncf %273 : vector<8x32xf32> to vector<8x32xbf16>
    %cst_68 = arith.constant dense<0.000000e+00> : vector<8x128xf32>
    %275 = tpu.matmul %274, %4, %cst_68 {dimension_numbers = #tpu.dot_dimension_numbers<[1], [0], [0], [1], [0, 0, 1, 1], [], []>} : vector<8x32xbf16>, vector<32x128xbf16>, vector<8x128xf32> -> vector<8x128xf32>
    %276 = arith.truncf %226 : vector<8x32xf32> to vector<8x32xbf16>
    %cst_69 = arith.constant dense<0.000000e+00> : vector<8x128xf32>
    %277 = tpu.matmul %276, %5, %cst_69 {dimension_numbers = #tpu.dot_dimension_numbers<[1], [0], [0], [1], [0, 0, 1, 1], [], []>} : vector<8x32xbf16>, vector<32x128xbf16>, vector<8x128xf32> -> vector<8x128xf32>
    %278 = arith.addf %275, %277 : vector<8x128xf32>
    %279 = arith.addf %278, %13 : vector<8x128xf32>
    %280 = arith.negf %279 : vector<8x128xf32>
    %281 = math.exp %280 : vector<8x128xf32>
    %cst_70 = arith.constant 1.000000e+00 : f32
    %282 = vector.broadcast %cst_70 : f32 to vector<8x128xf32>
    %283 = arith.addf %282, %281 : vector<8x128xf32>
    %284 = arith.divf %282, %283 : vector<8x128xf32>
    %285 = math.tanh %279 : vector<8x128xf32>
    %286 = vector.extract_strided_slice %284 {offsets = [0, 0], sizes = [8, 32], strides = [1, 1]} : vector<8x128xf32> to vector<8x32xf32>
    %287 = vector.extract_strided_slice %284 {offsets = [0, 32], sizes = [8, 32], strides = [1, 1]} : vector<8x128xf32> to vector<8x32xf32>
    %288 = vector.extract_strided_slice %285 {offsets = [0, 64], sizes = [8, 32], strides = [1, 1]} : vector<8x128xf32> to vector<8x32xf32>
    %289 = vector.extract_strided_slice %284 {offsets = [0, 96], sizes = [8, 32], strides = [1, 1]} : vector<8x128xf32> to vector<8x32xf32>
    %290 = arith.mulf %287, %224 : vector<8x32xf32>
    %291 = arith.mulf %286, %288 : vector<8x32xf32>
    %292 = arith.addf %290, %291 : vector<8x32xf32>
    %293 = math.tanh %292 : vector<8x32xf32>
    %294 = arith.mulf %289, %293 : vector<8x32xf32>
    %295 = arith.truncf %294 : vector<8x32xf32> to vector<8x32xbf16>
    %cst_71 = arith.constant dense<0.000000e+00> : vector<8x128xf32>
    %296 = tpu.matmul %295, %6, %cst_71 {dimension_numbers = #tpu.dot_dimension_numbers<[1], [0], [0], [1], [0, 0, 1, 1], [], []>} : vector<8x32xbf16>, vector<32x128xbf16>, vector<8x128xf32> -> vector<8x128xf32>
    %297 = arith.addf %296, %16 : vector<8x128xf32>
    %c3 = arith.constant 3 : index
    %c0_72 = arith.constant 0 : index
    %c0_73 = arith.constant 0 : index
    %298 = vector.load %arg14[%c3, %c0_72, %c0_73] : memref<8x8x128xf32, #tpu.memory_space<vmem>>, vector<1x8x128xf32>
    %299 = vector.shape_cast %298 : vector<1x8x128xf32> to vector<8x128xf32>
    %300 = vector.shape_cast %297 : vector<8x128xf32> to vector<1x8x128xf32>
    tpu.vector_store %arg14[%c3, %c0_72, %c0_73], %300 {strides = array<i32>} : memref<8x8x128xf32, #tpu.memory_space<vmem>>, vector<1x8x128xf32>,
    %301 = vector.extract_strided_slice %27 {offsets = [4, 0, 0], sizes = [1, 8, 128], strides = [1, 1, 1]} : vector<8x8x128xf32> to vector<1x8x128xf32>
    %302 = vector.shape_cast %301 : vector<1x8x128xf32> to vector<8x128xf32>
    %303 = arith.truncf %252 : vector<8x32xf32> to vector<8x32xbf16>
    %cst_74 = arith.constant dense<0.000000e+00> : vector<8x128xf32>
    %304 = tpu.matmul %303, %0, %cst_74 {dimension_numbers = #tpu.dot_dimension_numbers<[1], [0], [0], [1], [0, 0, 1, 1], [], []>} : vector<8x32xbf16>, vector<32x128xbf16>, vector<8x128xf32> -> vector<8x128xf32>
    %305 = arith.addf %302, %304 : vector<8x128xf32>
    %306 = arith.negf %305 : vector<8x128xf32>
    %307 = math.exp %306 : vector<8x128xf32>
    %cst_75 = arith.constant 1.000000e+00 : f32
    %308 = vector.broadcast %cst_75 : f32 to vector<8x128xf32>
    %309 = arith.addf %308, %307 : vector<8x128xf32>
    %310 = arith.divf %308, %309 : vector<8x128xf32>
    %311 = math.tanh %305 : vector<8x128xf32>
    %312 = vector.extract_strided_slice %310 {offsets = [0, 0], sizes = [8, 32], strides = [1, 1]} : vector<8x128xf32> to vector<8x32xf32>
    %313 = vector.extract_strided_slice %310 {offsets = [0, 32], sizes = [8, 32], strides = [1, 1]} : vector<8x128xf32> to vector<8x32xf32>
    %314 = vector.extract_strided_slice %311 {offsets = [0, 64], sizes = [8, 32], strides = [1, 1]} : vector<8x128xf32> to vector<8x32xf32>
    %315 = vector.extract_strided_slice %310 {offsets = [0, 96], sizes = [8, 32], strides = [1, 1]} : vector<8x128xf32> to vector<8x32xf32>
    %316 = arith.mulf %313, %250 : vector<8x32xf32>
    %317 = arith.mulf %312, %314 : vector<8x32xf32>
    %318 = arith.addf %316, %317 : vector<8x32xf32>
    %319 = math.tanh %318 : vector<8x32xf32>
    %320 = arith.mulf %315, %319 : vector<8x32xf32>
    %321 = arith.truncf %320 : vector<8x32xf32> to vector<8x32xbf16>
    %cst_76 = arith.constant dense<0.000000e+00> : vector<8x128xf32>
    %322 = tpu.matmul %321, %2, %cst_76 {dimension_numbers = #tpu.dot_dimension_numbers<[1], [0], [0], [1], [0, 0, 1, 1], [], []>} : vector<8x32xbf16>, vector<32x128xbf16>, vector<8x128xf32> -> vector<8x128xf32>
    %323 = arith.truncf %273 : vector<8x32xf32> to vector<8x32xbf16>
    %cst_77 = arith.constant dense<0.000000e+00> : vector<8x128xf32>
    %324 = tpu.matmul %323, %3, %cst_77 {dimension_numbers = #tpu.dot_dimension_numbers<[1], [0], [0], [1], [0, 0, 1, 1], [], []>} : vector<8x32xbf16>, vector<32x128xbf16>, vector<8x128xf32> -> vector<8x128xf32>
    %325 = arith.addf %322, %324 : vector<8x128xf32>
    %326 = arith.addf %325, %10 : vector<8x128xf32>
    %327 = arith.negf %326 : vector<8x128xf32>
    %328 = math.exp %327 : vector<8x128xf32>
    %cst_78 = arith.constant 1.000000e+00 : f32
    %329 = vector.broadcast %cst_78 : f32 to vector<8x128xf32>
    %330 = arith.addf %329, %328 : vector<8x128xf32>
    %331 = arith.divf %329, %330 : vector<8x128xf32>
    %332 = math.tanh %326 : vector<8x128xf32>
    %333 = vector.extract_strided_slice %331 {offsets = [0, 0], sizes = [8, 32], strides = [1, 1]} : vector<8x128xf32> to vector<8x32xf32>
    %334 = vector.extract_strided_slice %331 {offsets = [0, 32], sizes = [8, 32], strides = [1, 1]} : vector<8x128xf32> to vector<8x32xf32>
    %335 = vector.extract_strided_slice %332 {offsets = [0, 64], sizes = [8, 32], strides = [1, 1]} : vector<8x128xf32> to vector<8x32xf32>
    %336 = vector.extract_strided_slice %331 {offsets = [0, 96], sizes = [8, 32], strides = [1, 1]} : vector<8x128xf32> to vector<8x32xf32>
    %337 = arith.mulf %334, %271 : vector<8x32xf32>
    %338 = arith.mulf %333, %335 : vector<8x32xf32>
    %339 = arith.addf %337, %338 : vector<8x32xf32>
    %340 = math.tanh %339 : vector<8x32xf32>
    %341 = arith.mulf %336, %340 : vector<8x32xf32>
    %342 = arith.truncf %341 : vector<8x32xf32> to vector<8x32xbf16>
    %cst_79 = arith.constant dense<0.000000e+00> : vector<8x128xf32>
    %343 = tpu.matmul %342, %4, %cst_79 {dimension_numbers = #tpu.dot_dimension_numbers<[1], [0], [0], [1], [0, 0, 1, 1], [], []>} : vector<8x32xbf16>, vector<32x128xbf16>, vector<8x128xf32> -> vector<8x128xf32>
    %344 = arith.truncf %294 : vector<8x32xf32> to vector<8x32xbf16>
    %cst_80 = arith.constant dense<0.000000e+00> : vector<8x128xf32>
    %345 = tpu.matmul %344, %5, %cst_80 {dimension_numbers = #tpu.dot_dimension_numbers<[1], [0], [0], [1], [0, 0, 1, 1], [], []>} : vector<8x32xbf16>, vector<32x128xbf16>, vector<8x128xf32> -> vector<8x128xf32>
    %346 = arith.addf %343, %345 : vector<8x128xf32>
    %347 = arith.addf %346, %13 : vector<8x128xf32>
    %348 = arith.negf %347 : vector<8x128xf32>
    %349 = math.exp %348 : vector<8x128xf32>
    %cst_81 = arith.constant 1.000000e+00 : f32
    %350 = vector.broadcast %cst_81 : f32 to vector<8x128xf32>
    %351 = arith.addf %350, %349 : vector<8x128xf32>
    %352 = arith.divf %350, %351 : vector<8x128xf32>
    %353 = math.tanh %347 : vector<8x128xf32>
    %354 = vector.extract_strided_slice %352 {offsets = [0, 0], sizes = [8, 32], strides = [1, 1]} : vector<8x128xf32> to vector<8x32xf32>
    %355 = vector.extract_strided_slice %352 {offsets = [0, 32], sizes = [8, 32], strides = [1, 1]} : vector<8x128xf32> to vector<8x32xf32>
    %356 = vector.extract_strided_slice %353 {offsets = [0, 64], sizes = [8, 32], strides = [1, 1]} : vector<8x128xf32> to vector<8x32xf32>
    %357 = vector.extract_strided_slice %352 {offsets = [0, 96], sizes = [8, 32], strides = [1, 1]} : vector<8x128xf32> to vector<8x32xf32>
    %358 = arith.mulf %355, %292 : vector<8x32xf32>
    %359 = arith.mulf %354, %356 : vector<8x32xf32>
    %360 = arith.addf %358, %359 : vector<8x32xf32>
    %361 = math.tanh %360 : vector<8x32xf32>
    %362 = arith.mulf %357, %361 : vector<8x32xf32>
    %363 = arith.truncf %362 : vector<8x32xf32> to vector<8x32xbf16>
    %cst_82 = arith.constant dense<0.000000e+00> : vector<8x128xf32>
    %364 = tpu.matmul %363, %6, %cst_82 {dimension_numbers = #tpu.dot_dimension_numbers<[1], [0], [0], [1], [0, 0, 1, 1], [], []>} : vector<8x32xbf16>, vector<32x128xbf16>, vector<8x128xf32> -> vector<8x128xf32>
    %365 = arith.addf %364, %16 : vector<8x128xf32>
    %c4 = arith.constant 4 : index
    %c0_83 = arith.constant 0 : index
    %c0_84 = arith.constant 0 : index
    %366 = vector.load %arg14[%c4, %c0_83, %c0_84] : memref<8x8x128xf32, #tpu.memory_space<vmem>>, vector<1x8x128xf32>
    %367 = vector.shape_cast %366 : vector<1x8x128xf32> to vector<8x128xf32>
    %368 = vector.shape_cast %365 : vector<8x128xf32> to vector<1x8x128xf32>
    tpu.vector_store %arg14[%c4, %c0_83, %c0_84], %368 {strides = array<i32>} : memref<8x8x128xf32, #tpu.memory_space<vmem>>, vector<1x8x128xf32>,
    %369 = arith.truncf %362 : vector<8x32xf32> to vector<8x32xbf16>
    %cst_85 = arith.constant dense<0.000000e+00> : vector<8x128xf32>
    %370 = tpu.matmul %369, %1, %cst_85 {dimension_numbers = #tpu.dot_dimension_numbers<[1], [0], [0], [1], [0, 0, 1, 1], [], []>} : vector<8x32xbf16>, vector<32x128xbf16>, vector<8x128xf32> -> vector<8x128xf32>
    %371 = arith.truncf %320 : vector<8x32xf32> to vector<8x32xbf16>
    %cst_86 = arith.constant dense<0.000000e+00> : vector<8x128xf32>
    %372 = tpu.matmul %371, %0, %cst_86 {dimension_numbers = #tpu.dot_dimension_numbers<[1], [0], [0], [1], [0, 0, 1, 1], [], []>} : vector<8x32xbf16>, vector<32x128xbf16>, vector<8x128xf32> -> vector<8x128xf32>
    %373 = arith.addf %370, %372 : vector<8x128xf32>
    %374 = arith.addf %373, %19 : vector<8x128xf32>
    %375 = arith.negf %374 : vector<8x128xf32>
    %376 = math.exp %375 : vector<8x128xf32>
    %cst_87 = arith.constant 1.000000e+00 : f32
    %377 = vector.broadcast %cst_87 : f32 to vector<8x128xf32>
    %378 = arith.addf %377, %376 : vector<8x128xf32>
    %379 = arith.divf %377, %378 : vector<8x128xf32>
    %380 = math.tanh %374 : vector<8x128xf32>
    %381 = vector.extract_strided_slice %379 {offsets = [0, 0], sizes = [8, 32], strides = [1, 1]} : vector<8x128xf32> to vector<8x32xf32>
    %382 = vector.extract_strided_slice %379 {offsets = [0, 32], sizes = [8, 32], strides = [1, 1]} : vector<8x128xf32> to vector<8x32xf32>
    %383 = vector.extract_strided_slice %380 {offsets = [0, 64], sizes = [8, 32], strides = [1, 1]} : vector<8x128xf32> to vector<8x32xf32>
    %384 = vector.extract_strided_slice %379 {offsets = [0, 96], sizes = [8, 32], strides = [1, 1]} : vector<8x128xf32> to vector<8x32xf32>
    %385 = arith.mulf %382, %318 : vector<8x32xf32>
    %386 = arith.mulf %381, %383 : vector<8x32xf32>
    %387 = arith.addf %385, %386 : vector<8x32xf32>
    %388 = math.tanh %387 : vector<8x32xf32>
    %389 = arith.mulf %384, %388 : vector<8x32xf32>
    %390 = arith.truncf %389 : vector<8x32xf32> to vector<8x32xbf16>
    %cst_88 = arith.constant dense<0.000000e+00> : vector<8x128xf32>
    %391 = tpu.matmul %390, %2, %cst_88 {dimension_numbers = #tpu.dot_dimension_numbers<[1], [0], [0], [1], [0, 0, 1, 1], [], []>} : vector<8x32xbf16>, vector<32x128xbf16>, vector<8x128xf32> -> vector<8x128xf32>
    %392 = arith.truncf %341 : vector<8x32xf32> to vector<8x32xbf16>
    %cst_89 = arith.constant dense<0.000000e+00> : vector<8x128xf32>
    %393 = tpu.matmul %392, %3, %cst_89 {dimension_numbers = #tpu.dot_dimension_numbers<[1], [0], [0], [1], [0, 0, 1, 1], [], []>} : vector<8x32xbf16>, vector<32x128xbf16>, vector<8x128xf32> -> vector<8x128xf32>
    %394 = arith.addf %391, %393 : vector<8x128xf32>
    %395 = arith.addf %394, %10 : vector<8x128xf32>
    %396 = arith.negf %395 : vector<8x128xf32>
    %397 = math.exp %396 : vector<8x128xf32>
    %cst_90 = arith.constant 1.000000e+00 : f32
    %398 = vector.broadcast %cst_90 : f32 to vector<8x128xf32>
    %399 = arith.addf %398, %397 : vector<8x128xf32>
    %400 = arith.divf %398, %399 : vector<8x128xf32>
    %401 = math.tanh %395 : vector<8x128xf32>
    %402 = vector.extract_strided_slice %400 {offsets = [0, 0], sizes = [8, 32], strides = [1, 1]} : vector<8x128xf32> to vector<8x32xf32>
    %403 = vector.extract_strided_slice %400 {offsets = [0, 32], sizes = [8, 32], strides = [1, 1]} : vector<8x128xf32> to vector<8x32xf32>
    %404 = vector.extract_strided_slice %401 {offsets = [0, 64], sizes = [8, 32], strides = [1, 1]} : vector<8x128xf32> to vector<8x32xf32>
    %405 = vector.extract_strided_slice %400 {offsets = [0, 96], sizes = [8, 32], strides = [1, 1]} : vector<8x128xf32> to vector<8x32xf32>
    %406 = arith.mulf %403, %339 : vector<8x32xf32>
    %407 = arith.mulf %402, %404 : vector<8x32xf32>
    %408 = arith.addf %406, %407 : vector<8x32xf32>
    %409 = math.tanh %408 : vector<8x32xf32>
    %410 = arith.mulf %405, %409 : vector<8x32xf32>
    %411 = arith.truncf %410 : vector<8x32xf32> to vector<8x32xbf16>
    %cst_91 = arith.constant dense<0.000000e+00> : vector<8x128xf32>
    %412 = tpu.matmul %411, %4, %cst_91 {dimension_numbers = #tpu.dot_dimension_numbers<[1], [0], [0], [1], [0, 0, 1, 1], [], []>} : vector<8x32xbf16>, vector<32x128xbf16>, vector<8x128xf32> -> vector<8x128xf32>
    %413 = arith.truncf %362 : vector<8x32xf32> to vector<8x32xbf16>
    %cst_92 = arith.constant dense<0.000000e+00> : vector<8x128xf32>
    %414 = tpu.matmul %413, %5, %cst_92 {dimension_numbers = #tpu.dot_dimension_numbers<[1], [0], [0], [1], [0, 0, 1, 1], [], []>} : vector<8x32xbf16>, vector<32x128xbf16>, vector<8x128xf32> -> vector<8x128xf32>
    %415 = arith.addf %412, %414 : vector<8x128xf32>
    %416 = arith.addf %415, %13 : vector<8x128xf32>
    %417 = arith.negf %416 : vector<8x128xf32>
    %418 = math.exp %417 : vector<8x128xf32>
    %cst_93 = arith.constant 1.000000e+00 : f32
    %419 = vector.broadcast %cst_93 : f32 to vector<8x128xf32>
    %420 = arith.addf %419, %418 : vector<8x128xf32>
    %421 = arith.divf %419, %420 : vector<8x128xf32>
    %422 = math.tanh %416 : vector<8x128xf32>
    %423 = vector.extract_strided_slice %421 {offsets = [0, 0], sizes = [8, 32], strides = [1, 1]} : vector<8x128xf32> to vector<8x32xf32>
    %424 = vector.extract_strided_slice %421 {offsets = [0, 32], sizes = [8, 32], strides = [1, 1]} : vector<8x128xf32> to vector<8x32xf32>
    %425 = vector.extract_strided_slice %422 {offsets = [0, 64], sizes = [8, 32], strides = [1, 1]} : vector<8x128xf32> to vector<8x32xf32>
    %426 = vector.extract_strided_slice %421 {offsets = [0, 96], sizes = [8, 32], strides = [1, 1]} : vector<8x128xf32> to vector<8x32xf32>
    %427 = arith.mulf %424, %360 : vector<8x32xf32>
    %428 = arith.mulf %423, %425 : vector<8x32xf32>
    %429 = arith.addf %427, %428 : vector<8x32xf32>
    %430 = math.tanh %429 : vector<8x32xf32>
    %431 = arith.mulf %426, %430 : vector<8x32xf32>
    %432 = arith.truncf %431 : vector<8x32xf32> to vector<8x32xbf16>
    %cst_94 = arith.constant dense<0.000000e+00> : vector<8x128xf32>
    %433 = tpu.matmul %432, %6, %cst_94 {dimension_numbers = #tpu.dot_dimension_numbers<[1], [0], [0], [1], [0, 0, 1, 1], [], []>} : vector<8x32xbf16>, vector<32x128xbf16>, vector<8x128xf32> -> vector<8x128xf32>
    %434 = arith.addf %433, %16 : vector<8x128xf32>
    %c5 = arith.constant 5 : index
    %c0_95 = arith.constant 0 : index
    %c0_96 = arith.constant 0 : index
    %435 = vector.load %arg14[%c5, %c0_95, %c0_96] : memref<8x8x128xf32, #tpu.memory_space<vmem>>, vector<1x8x128xf32>
    %436 = vector.shape_cast %435 : vector<1x8x128xf32> to vector<8x128xf32>
    %437 = vector.shape_cast %434 : vector<8x128xf32> to vector<1x8x128xf32>
    tpu.vector_store %arg14[%c5, %c0_95, %c0_96], %437 {strides = array<i32>} : memref<8x8x128xf32, #tpu.memory_space<vmem>>, vector<1x8x128xf32>,
    %438 = arith.truncf %431 : vector<8x32xf32> to vector<8x32xbf16>
    %cst_97 = arith.constant dense<0.000000e+00> : vector<8x128xf32>
    %439 = tpu.matmul %438, %1, %cst_97 {dimension_numbers = #tpu.dot_dimension_numbers<[1], [0], [0], [1], [0, 0, 1, 1], [], []>} : vector<8x32xbf16>, vector<32x128xbf16>, vector<8x128xf32> -> vector<8x128xf32>
    %440 = arith.truncf %389 : vector<8x32xf32> to vector<8x32xbf16>
    %cst_98 = arith.constant dense<0.000000e+00> : vector<8x128xf32>
    %441 = tpu.matmul %440, %0, %cst_98 {dimension_numbers = #tpu.dot_dimension_numbers<[1], [0], [0], [1], [0, 0, 1, 1], [], []>} : vector<8x32xbf16>, vector<32x128xbf16>, vector<8x128xf32> -> vector<8x128xf32>
    %442 = arith.addf %439, %441 : vector<8x128xf32>
    %443 = arith.addf %442, %19 : vector<8x128xf32>
    %444 = arith.negf %443 : vector<8x128xf32>
    %445 = math.exp %444 : vector<8x128xf32>
    %cst_99 = arith.constant 1.000000e+00 : f32
    %446 = vector.broadcast %cst_99 : f32 to vector<8x128xf32>
    %447 = arith.addf %446, %445 : vector<8x128xf32>
    %448 = arith.divf %446, %447 : vector<8x128xf32>
    %449 = math.tanh %443 : vector<8x128xf32>
    %450 = vector.extract_strided_slice %448 {offsets = [0, 0], sizes = [8, 32], strides = [1, 1]} : vector<8x128xf32> to vector<8x32xf32>
    %451 = vector.extract_strided_slice %448 {offsets = [0, 32], sizes = [8, 32], strides = [1, 1]} : vector<8x128xf32> to vector<8x32xf32>
    %452 = vector.extract_strided_slice %449 {offsets = [0, 64], sizes = [8, 32], strides = [1, 1]} : vector<8x128xf32> to vector<8x32xf32>
    %453 = vector.extract_strided_slice %448 {offsets = [0, 96], sizes = [8, 32], strides = [1, 1]} : vector<8x128xf32> to vector<8x32xf32>
    %454 = arith.mulf %451, %387 : vector<8x32xf32>
    %455 = arith.mulf %450, %452 : vector<8x32xf32>
    %456 = arith.addf %454, %455 : vector<8x32xf32>
    %457 = math.tanh %456 : vector<8x32xf32>
    %458 = arith.mulf %453, %457 : vector<8x32xf32>
    %459 = arith.truncf %458 : vector<8x32xf32> to vector<8x32xbf16>
    %cst_100 = arith.constant dense<0.000000e+00> : vector<8x128xf32>
    %460 = tpu.matmul %459, %2, %cst_100 {dimension_numbers = #tpu.dot_dimension_numbers<[1], [0], [0], [1], [0, 0, 1, 1], [], []>} : vector<8x32xbf16>, vector<32x128xbf16>, vector<8x128xf32> -> vector<8x128xf32>
    %461 = arith.truncf %410 : vector<8x32xf32> to vector<8x32xbf16>
    %cst_101 = arith.constant dense<0.000000e+00> : vector<8x128xf32>
    %462 = tpu.matmul %461, %3, %cst_101 {dimension_numbers = #tpu.dot_dimension_numbers<[1], [0], [0], [1], [0, 0, 1, 1], [], []>} : vector<8x32xbf16>, vector<32x128xbf16>, vector<8x128xf32> -> vector<8x128xf32>
    %463 = arith.addf %460, %462 : vector<8x128xf32>
    %464 = arith.addf %463, %10 : vector<8x128xf32>
    %465 = arith.negf %464 : vector<8x128xf32>
    %466 = math.exp %465 : vector<8x128xf32>
    %cst_102 = arith.constant 1.000000e+00 : f32
    %467 = vector.broadcast %cst_102 : f32 to vector<8x128xf32>
    %468 = arith.addf %467, %466 : vector<8x128xf32>
    %469 = arith.divf %467, %468 : vector<8x128xf32>
    %470 = math.tanh %464 : vector<8x128xf32>
    %471 = vector.extract_strided_slice %469 {offsets = [0, 0], sizes = [8, 32], strides = [1, 1]} : vector<8x128xf32> to vector<8x32xf32>
    %472 = vector.extract_strided_slice %469 {offsets = [0, 32], sizes = [8, 32], strides = [1, 1]} : vector<8x128xf32> to vector<8x32xf32>
    %473 = vector.extract_strided_slice %470 {offsets = [0, 64], sizes = [8, 32], strides = [1, 1]} : vector<8x128xf32> to vector<8x32xf32>
    %474 = vector.extract_strided_slice %469 {offsets = [0, 96], sizes = [8, 32], strides = [1, 1]} : vector<8x128xf32> to vector<8x32xf32>
    %475 = arith.mulf %472, %408 : vector<8x32xf32>
    %476 = arith.mulf %471, %473 : vector<8x32xf32>
    %477 = arith.addf %475, %476 : vector<8x32xf32>
    %478 = math.tanh %477 : vector<8x32xf32>
    %479 = arith.mulf %474, %478 : vector<8x32xf32>
    %480 = arith.truncf %479 : vector<8x32xf32> to vector<8x32xbf16>
    %cst_103 = arith.constant dense<0.000000e+00> : vector<8x128xf32>
    %481 = tpu.matmul %480, %4, %cst_103 {dimension_numbers = #tpu.dot_dimension_numbers<[1], [0], [0], [1], [0, 0, 1, 1], [], []>} : vector<8x32xbf16>, vector<32x128xbf16>, vector<8x128xf32> -> vector<8x128xf32>
    %482 = arith.truncf %431 : vector<8x32xf32> to vector<8x32xbf16>
    %cst_104 = arith.constant dense<0.000000e+00> : vector<8x128xf32>
    %483 = tpu.matmul %482, %5, %cst_104 {dimension_numbers = #tpu.dot_dimension_numbers<[1], [0], [0], [1], [0, 0, 1, 1], [], []>} : vector<8x32xbf16>, vector<32x128xbf16>, vector<8x128xf32> -> vector<8x128xf32>
    %484 = arith.addf %481, %483 : vector<8x128xf32>
    %485 = arith.addf %484, %13 : vector<8x128xf32>
    %486 = arith.negf %485 : vector<8x128xf32>
    %487 = math.exp %486 : vector<8x128xf32>
    %cst_105 = arith.constant 1.000000e+00 : f32
    %488 = vector.broadcast %cst_105 : f32 to vector<8x128xf32>
    %489 = arith.addf %488, %487 : vector<8x128xf32>
    %490 = arith.divf %488, %489 : vector<8x128xf32>
    %491 = math.tanh %485 : vector<8x128xf32>
    %492 = vector.extract_strided_slice %490 {offsets = [0, 0], sizes = [8, 32], strides = [1, 1]} : vector<8x128xf32> to vector<8x32xf32>
    %493 = vector.extract_strided_slice %490 {offsets = [0, 32], sizes = [8, 32], strides = [1, 1]} : vector<8x128xf32> to vector<8x32xf32>
    %494 = vector.extract_strided_slice %491 {offsets = [0, 64], sizes = [8, 32], strides = [1, 1]} : vector<8x128xf32> to vector<8x32xf32>
    %495 = vector.extract_strided_slice %490 {offsets = [0, 96], sizes = [8, 32], strides = [1, 1]} : vector<8x128xf32> to vector<8x32xf32>
    %496 = arith.mulf %493, %429 : vector<8x32xf32>
    %497 = arith.mulf %492, %494 : vector<8x32xf32>
    %498 = arith.addf %496, %497 : vector<8x32xf32>
    %499 = math.tanh %498 : vector<8x32xf32>
    %500 = arith.mulf %495, %499 : vector<8x32xf32>
    %501 = arith.truncf %500 : vector<8x32xf32> to vector<8x32xbf16>
    %cst_106 = arith.constant dense<0.000000e+00> : vector<8x128xf32>
    %502 = tpu.matmul %501, %6, %cst_106 {dimension_numbers = #tpu.dot_dimension_numbers<[1], [0], [0], [1], [0, 0, 1, 1], [], []>} : vector<8x32xbf16>, vector<32x128xbf16>, vector<8x128xf32> -> vector<8x128xf32>
    %503 = arith.addf %502, %16 : vector<8x128xf32>
    %c6 = arith.constant 6 : index
    %c0_107 = arith.constant 0 : index
    %c0_108 = arith.constant 0 : index
    %504 = vector.load %arg14[%c6, %c0_107, %c0_108] : memref<8x8x128xf32, #tpu.memory_space<vmem>>, vector<1x8x128xf32>
    %505 = vector.shape_cast %504 : vector<1x8x128xf32> to vector<8x128xf32>
    %506 = vector.shape_cast %503 : vector<8x128xf32> to vector<1x8x128xf32>
    tpu.vector_store %arg14[%c6, %c0_107, %c0_108], %506 {strides = array<i32>} : memref<8x8x128xf32, #tpu.memory_space<vmem>>, vector<1x8x128xf32>,
    %507 = arith.truncf %500 : vector<8x32xf32> to vector<8x32xbf16>
    %cst_109 = arith.constant dense<0.000000e+00> : vector<8x128xf32>
    %508 = tpu.matmul %507, %1, %cst_109 {dimension_numbers = #tpu.dot_dimension_numbers<[1], [0], [0], [1], [0, 0, 1, 1], [], []>} : vector<8x32xbf16>, vector<32x128xbf16>, vector<8x128xf32> -> vector<8x128xf32>
    %509 = arith.truncf %458 : vector<8x32xf32> to vector<8x32xbf16>
    %cst_110 = arith.constant dense<0.000000e+00> : vector<8x128xf32>
    %510 = tpu.matmul %509, %0, %cst_110 {dimension_numbers = #tpu.dot_dimension_numbers<[1], [0], [0], [1], [0, 0, 1, 1], [], []>} : vector<8x32xbf16>, vector<32x128xbf16>, vector<8x128xf32> -> vector<8x128xf32>
    %511 = arith.addf %508, %510 : vector<8x128xf32>
    %512 = arith.addf %511, %19 : vector<8x128xf32>
    %513 = arith.negf %512 : vector<8x128xf32>
    %514 = math.exp %513 : vector<8x128xf32>
    %cst_111 = arith.constant 1.000000e+00 : f32
    %515 = vector.broadcast %cst_111 : f32 to vector<8x128xf32>
    %516 = arith.addf %515, %514 : vector<8x128xf32>
    %517 = arith.divf %515, %516 : vector<8x128xf32>
    %518 = math.tanh %512 : vector<8x128xf32>
    %519 = vector.extract_strided_slice %517 {offsets = [0, 0], sizes = [8, 32], strides = [1, 1]} : vector<8x128xf32> to vector<8x32xf32>
    %520 = vector.extract_strided_slice %517 {offsets = [0, 32], sizes = [8, 32], strides = [1, 1]} : vector<8x128xf32> to vector<8x32xf32>
    %521 = vector.extract_strided_slice %518 {offsets = [0, 64], sizes = [8, 32], strides = [1, 1]} : vector<8x128xf32> to vector<8x32xf32>
    %522 = vector.extract_strided_slice %517 {offsets = [0, 96], sizes = [8, 32], strides = [1, 1]} : vector<8x128xf32> to vector<8x32xf32>
    %523 = arith.mulf %520, %456 : vector<8x32xf32>
    %524 = arith.mulf %519, %521 : vector<8x32xf32>
    %525 = arith.addf %523, %524 : vector<8x32xf32>
    %526 = math.tanh %525 : vector<8x32xf32>
    %527 = arith.mulf %522, %526 : vector<8x32xf32>
    %528 = arith.truncf %527 : vector<8x32xf32> to vector<8x32xbf16>
    %cst_112 = arith.constant dense<0.000000e+00> : vector<8x128xf32>
    %529 = tpu.matmul %528, %2, %cst_112 {dimension_numbers = #tpu.dot_dimension_numbers<[1], [0], [0], [1], [0, 0, 1, 1], [], []>} : vector<8x32xbf16>, vector<32x128xbf16>, vector<8x128xf32> -> vector<8x128xf32>
    %530 = arith.truncf %479 : vector<8x32xf32> to vector<8x32xbf16>
    %cst_113 = arith.constant dense<0.000000e+00> : vector<8x128xf32>
    %531 = tpu.matmul %530, %3, %cst_113 {dimension_numbers = #tpu.dot_dimension_numbers<[1], [0], [0], [1], [0, 0, 1, 1], [], []>} : vector<8x32xbf16>, vector<32x128xbf16>, vector<8x128xf32> -> vector<8x128xf32>
    %532 = arith.addf %529, %531 : vector<8x128xf32>
    %533 = arith.addf %532, %10 : vector<8x128xf32>
    %534 = arith.negf %533 : vector<8x128xf32>
    %535 = math.exp %534 : vector<8x128xf32>
    %cst_114 = arith.constant 1.000000e+00 : f32
    %536 = vector.broadcast %cst_114 : f32 to vector<8x128xf32>
    %537 = arith.addf %536, %535 : vector<8x128xf32>
    %538 = arith.divf %536, %537 : vector<8x128xf32>
    %539 = math.tanh %533 : vector<8x128xf32>
    %540 = vector.extract_strided_slice %538 {offsets = [0, 0], sizes = [8, 32], strides = [1, 1]} : vector<8x128xf32> to vector<8x32xf32>
    %541 = vector.extract_strided_slice %538 {offsets = [0, 32], sizes = [8, 32], strides = [1, 1]} : vector<8x128xf32> to vector<8x32xf32>
    %542 = vector.extract_strided_slice %539 {offsets = [0, 64], sizes = [8, 32], strides = [1, 1]} : vector<8x128xf32> to vector<8x32xf32>
    %543 = vector.extract_strided_slice %538 {offsets = [0, 96], sizes = [8, 32], strides = [1, 1]} : vector<8x128xf32> to vector<8x32xf32>
    %544 = arith.mulf %541, %477 : vector<8x32xf32>
    %545 = arith.mulf %540, %542 : vector<8x32xf32>
    %546 = arith.addf %544, %545 : vector<8x32xf32>
    %547 = math.tanh %546 : vector<8x32xf32>
    %548 = arith.mulf %543, %547 : vector<8x32xf32>
    %549 = arith.truncf %548 : vector<8x32xf32> to vector<8x32xbf16>
    %cst_115 = arith.constant dense<0.000000e+00> : vector<8x128xf32>
    %550 = tpu.matmul %549, %4, %cst_115 {dimension_numbers = #tpu.dot_dimension_numbers<[1], [0], [0], [1], [0, 0, 1, 1], [], []>} : vector<8x32xbf16>, vector<32x128xbf16>, vector<8x128xf32> -> vector<8x128xf32>
    %551 = arith.truncf %500 : vector<8x32xf32> to vector<8x32xbf16>
    %cst_116 = arith.constant dense<0.000000e+00> : vector<8x128xf32>
    %552 = tpu.matmul %551, %5, %cst_116 {dimension_numbers = #tpu.dot_dimension_numbers<[1], [0], [0], [1], [0, 0, 1, 1], [], []>} : vector<8x32xbf16>, vector<32x128xbf16>, vector<8x128xf32> -> vector<8x128xf32>
    %553 = arith.addf %550, %552 : vector<8x128xf32>
    %554 = arith.addf %553, %13 : vector<8x128xf32>
    %555 = arith.negf %554 : vector<8x128xf32>
    %556 = math.exp %555 : vector<8x128xf32>
    %cst_117 = arith.constant 1.000000e+00 : f32
    %557 = vector.broadcast %cst_117 : f32 to vector<8x128xf32>
    %558 = arith.addf %557, %556 : vector<8x128xf32>
    %559 = arith.divf %557, %558 : vector<8x128xf32>
    %560 = math.tanh %554 : vector<8x128xf32>
    %561 = vector.extract_strided_slice %559 {offsets = [0, 0], sizes = [8, 32], strides = [1, 1]} : vector<8x128xf32> to vector<8x32xf32>
    %562 = vector.extract_strided_slice %559 {offsets = [0, 32], sizes = [8, 32], strides = [1, 1]} : vector<8x128xf32> to vector<8x32xf32>
    %563 = vector.extract_strided_slice %560 {offsets = [0, 64], sizes = [8, 32], strides = [1, 1]} : vector<8x128xf32> to vector<8x32xf32>
    %564 = vector.extract_strided_slice %559 {offsets = [0, 96], sizes = [8, 32], strides = [1, 1]} : vector<8x128xf32> to vector<8x32xf32>
    %565 = arith.mulf %562, %498 : vector<8x32xf32>
    %566 = arith.mulf %561, %563 : vector<8x32xf32>
    %567 = arith.addf %565, %566 : vector<8x32xf32>
    %568 = math.tanh %567 : vector<8x32xf32>
    %569 = arith.mulf %564, %568 : vector<8x32xf32>
    %570 = arith.truncf %569 : vector<8x32xf32> to vector<8x32xbf16>
    %cst_118 = arith.constant dense<0.000000e+00> : vector<8x128xf32>
    %571 = tpu.matmul %570, %6, %cst_118 {dimension_numbers = #tpu.dot_dimension_numbers<[1], [0], [0], [1], [0, 0, 1, 1], [], []>} : vector<8x32xbf16>, vector<32x128xbf16>, vector<8x128xf32> -> vector<8x128xf32>
    %572 = arith.addf %571, %16 : vector<8x128xf32>
    %c7 = arith.constant 7 : index
    %c0_119 = arith.constant 0 : index
    %c0_120 = arith.constant 0 : index
    %573 = vector.load %arg14[%c7, %c0_119, %c0_120] : memref<8x8x128xf32, #tpu.memory_space<vmem>>, vector<1x8x128xf32>
    %574 = vector.shape_cast %573 : vector<1x8x128xf32> to vector<8x128xf32>
    %575 = vector.shape_cast %572 : vector<8x128xf32> to vector<1x8x128xf32>
    tpu.vector_store %arg14[%c7, %c0_119, %c0_120], %575 {strides = array<i32>} : memref<8x8x128xf32, #tpu.memory_space<vmem>>, vector<1x8x128xf32>,
    return
  }
}

</mosaic_0001>

<bundles_post_ra>
// kernel: tpu_custom_call.1
= control target key start
LH: loop header
LB: loop body
LE: loop exit
PB: predicated region body
PF: predicated region fallthrough
CT: control target
= control target key end

     0   :  { %19 = vsyncpa [#allocation3], 0  ;;  %s5426_s0 = inlined_call_operand.hbm [shape: f32[8,8,128], index: 0, kind: input, shape index: {}]   ;;  %s5427_s1 = inlined_call_operand.hbm [shape: bf16[128,128], index: 1, kind: input, shape index: {}]   ;;  %s5428_s2 = inlined_call_operand.hbm [shape: bf16[32,128], index: 2, kind: input, shape index: {}]   ;;  %s5429_s3 = inlined_call_operand.hbm [shape: bf16[32,128], index: 3, kind: input, shape index: {}]   ;;  %s5430_s4 = inlined_call_operand.vmem [shape: f32[1,128], index: 4, kind: input, shape index: {}]   ;;  %s5431_s5 = inlined_call_operand.vmem [shape: f32[1,128], index: 5, kind: input, shape index: {}]   ;;  %s5432_s6 = inlined_call_operand.vmem [shape: bf16[32,128], index: 6, kind: input, shape index: {}]   ;;  %s5433_s7 = inlined_call_operand.hbm [shape: bf16[32,128], index: 7, kind: input, shape index: {}]   ;;  %s5434_s8 = inlined_call_operand.hbm [shape: f32[1,128], index: 8, kind: input, shape index: {}]   ;;  %s5435_s9 = inlined_call_operand.vmem [shape: bf16[32,128], index: 9, kind: input, shape index: {}]   ;;  %s5436_s10 = inlined_call_operand.hbm [shape: bf16[32,128], index: 10, kind: input, shape index: {}]   ;;  %s5437_s11 = inlined_call_operand.vmem [shape: f32[1,128], index: 11, kind: input, shape index: {}]   ;;  %s5438_s12 = inlined_call_operand.hbm [shape: bf16[32,128], index: 12, kind: input, shape index: {}]   ;;  %s5439_s13 = inlined_call_operand.vmem [shape: f32[1,128], index: 13, kind: input, shape index: {}]   ;;  %s5440_s14 = inlined_call_operand.hbm [shape: f32[8,8,128], index: 14, kind: output, shape index: {}]  }
   0x1   :  { %20 = vsyncpa [#allocation6], 0 }
   0x2   :  { %21 = vsyncpa [#allocation9], 0 }
   0x3   :  { %22 = vsyncpa [#allocation12], 0 }
   0x4   :  { %23 = vsyncpa [#allocation15], 0 }
   0x5   :  { %24 = vsyncpa [#allocation4], 0  ;;  %s4442_s29 = smov [#allocation5]   ;;  %s4232_s17 = scalar_lea.hbm %s5427_s1, 1024 }
   0x6   :  { %s42_s30 = sshll.u32 %s4442_s29, 4  ;;  %p4233_p0 = scmp.ne.s32.totalorder %s5427_s1, %s4232_s17  ;;  %s43_s30 = int_to_ptr.vmem [resolvable:$true] %s42_s30 }
   0x7   :  { %p4236_p1 = scmp.lt.u32.totalorder %s4232_s17, %s5427_s1 }
   0x9   :  { %p4238_p2 = pnand %p4236_p1, %p4233_p0 }
   0xb   :  { %4241 = shalt.err (!%p4238_p2)
}
   0xc   :  { %s4242_s22 = scalar_lea.vmem %s43_s30, 1024  ;;  %p4247_p4 = scmp.lt.s32.totalorder %s43_s30, %s43_s30 }
   0xd   :  { %p4243_p3 = scmp.ne.s32.totalorder %s43_s30, %s4242_s22  ;;  %p4248_p5 = scmp.lt.s32.totalorder %s4242_s22, %s4242_s22 }
   0xf   :  { %p4249_p6 = por %p4248_p5, %p4247_p4 }
  0x11   :  { %p4250_p7 = pnand %p4249_p6, %p4243_p3 }
  0x13   :  { %4253 = shalt.err (!%p4250_p7)
}
  0x14   :  { %s4443_s23 = smov 64   ;;  %s4444_s24 = smov 4  }
  0x15   :  { %48 = dma.hbm_to_vmem [thread:$0]  %s5427_s1, 1024, %s43_s30, [#allocation6], %s4443_s23, %s4443_s23, %s4444_s24  }
  0x16   :  { %s4445_s27 = smov [#allocation8]   ;;  %s4446_s29 = smov [#allocation11]  }
  0x17   :  { %s66_s28 = sshll.u32 %s4445_s27, 4  ;;  %s97_s15 = sshll.u32 %s4446_s29, 4  ;;  %s67_s28 = int_to_ptr.vmem [resolvable:$true] %s66_s28  ;;  %s98_s15 = int_to_ptr.vmem [resolvable:$true] %s97_s15 }
  0x18   :  { %s4254_s18 = scalar_lea.hbm %s5429_s3, 256 }
  0x19   :  { %p4255_p8 = scmp.ne.s32.totalorder %s5429_s3, %s4254_s18  ;;  %p4258_p9 = scmp.lt.u32.totalorder %s4254_s18, %s5429_s3 }
  0x1b   :  { %p4260_p10 = pnand %p4258_p9, %p4255_p8 }
  0x1d   :  { %4263 = shalt.err (!%p4260_p10)
}
  0x1e   :  { %s4264_s1 = scalar_lea.vmem %s67_s28, 256  ;;  %p4269_p12 = scmp.lt.s32.totalorder %s67_s28, %s67_s28 }
  0x1f   :  { %p4265_p11 = scmp.ne.s32.totalorder %s67_s28, %s4264_s1  ;;  %p4270_p13 = scmp.lt.s32.totalorder %s4264_s1, %s4264_s1 }
  0x21   :  { %p4271_p0 = por %p4270_p13, %p4269_p12 }
  0x23   :  { %p4272_p1 = pnand %p4271_p0, %p4265_p11 }
  0x25   :  { %4275 = shalt.err (!%p4272_p1)
}
  0x26   :  { %72 = dma.hbm_to_vmem [thread:$0]  %s5429_s3, 256, %s67_s28, [#allocation9], %s4443_s23, %s4443_s23, %s4444_s24  }
  0x27   :  { %s4276_s29 = scalar_lea.hbm %s5434_s8, 16 }
  0x28   :  { %p4277_p2 = scmp.ne.s32.totalorder %s5434_s8, %s4276_s29  ;;  %p4280_p3 = scmp.lt.u32.totalorder %s4276_s29, %s5434_s8 }
  0x2a   :  { %p4282_p4 = pnand %p4280_p3, %p4277_p2 }
  0x2c   :  { %4285 = shalt.err (!%p4282_p4)
}
  0x2d   :  { %s4286_s20 = scalar_lea.vmem %s98_s15, 16  ;;  %s4290_s21 = scalar_lea.vmem %s98_s15, 32 }
  0x2e   :  { %p4287_p5 = scmp.ne.s32.totalorder %s98_s15, %s4286_s20  ;;  %p4291_p6 = scmp.lt.s32.totalorder %s98_s15, %s98_s15 }
  0x2f   :  { %p4292_p7 = scmp.lt.s32.totalorder %s4290_s21, %s4286_s20 }
  0x31   :  { %p4293_p8 = por %p4292_p7, %p4291_p6 }
  0x33   :  { %p4294_p9 = pnand %p4293_p8, %p4287_p5 }
  0x35   :  { %4297 = shalt.err (!%p4294_p9)
}
  0x36   :  { %100 = dma.hbm_to_vmem [thread:$0]  %s5434_s8, 16, %s98_s15, [#allocation12]  }
  0x37   :  { %s4447_s22 = smov [#allocation2]   ;;  %s4298_s26 = scalar_lea.hbm %s5426_s0, 1024 }
  0x38   :  { %s30_s1 = sshll.u32 %s4447_s22, 4  ;;  %p4299_p10 = scmp.ne.s32.totalorder %s5426_s0, %s4298_s26  ;;  %s31_s1 = int_to_ptr.vmem [resolvable:$true] %s30_s1 }
  0x39   :  { %p4302_p11 = scmp.lt.u32.totalorder %s4298_s26, %s5426_s0 }
  0x3b   :  { %p4304_p12 = pnand %p4302_p11, %p4299_p10 }
  0x3d   :  { %4307 = shalt.err (!%p4304_p12)
}
  0x3e   :  { %s4308_s18 = scalar_lea.vmem %s31_s1, 1024  ;;  %p4313_p0 = scmp.lt.s32.totalorder %s31_s1, %s31_s1 }
  0x3f   :  { %p4309_p13 = scmp.ne.s32.totalorder %s31_s1, %s4308_s18  ;;  %p4314_p1 = scmp.lt.s32.totalorder %s4308_s18, %s4308_s18 }
  0x41   :  { %p4315_p2 = por %p4314_p1, %p4313_p0 }
  0x43   :  { %p4316_p3 = pnand %p4315_p2, %p4309_p13 }
  0x45   :  { %4319 = shalt.err (!%p4316_p3)
}
  0x46   :  { %s4448_s8 = smov 128   ;;  %s4449_s15 = smov 8  }
  0x47   :  { %36 = dma.hbm_to_vmem [thread:$0]  %s5426_s0, 1024, %s31_s1, [#allocation3], %s4448_s8, %s4448_s8, %s4449_s15  }
  0x48   :  { %s4450_s21 = smov [#allocation7]   ;;  %s4451_s28 = smov [#allocation10]  }
  0x49   :  { %s54_s3 = sshll.u32 %s4450_s21, 4  ;;  %s84_s22 = sshll.u32 %s4451_s28, 4  ;;  %s55_s3 = int_to_ptr.vmem [resolvable:$true] %s54_s3  ;;  %s4591_s22 = int_to_ptr.vmem [resolvable:$true] %s84_s22 }
  0x4a   :  { %s4320_s26 = scalar_lea.hbm %s5428_s2, 256 }
  0x4b   :  { %p4321_p4 = scmp.ne.s32.totalorder %s5428_s2, %s4320_s26  ;;  %p4324_p5 = scmp.lt.u32.totalorder %s4320_s26, %s5428_s2 }
  0x4d   :  { %p4326_p6 = pnand %p4324_p5, %p4321_p4 }
  0x4f   :  { %4329 = shalt.err (!%p4326_p6)
}
  0x50   :  { %s4330_s0 = scalar_lea.vmem %s55_s3, 256  ;;  %p4335_p8 = scmp.lt.s32.totalorder %s55_s3, %s55_s3 }
  0x51   :  { %p4331_p7 = scmp.ne.s32.totalorder %s55_s3, %s4330_s0  ;;  %p4336_p9 = scmp.lt.s32.totalorder %s4330_s0, %s4330_s0 }
  0x53   :  { %p4337_p10 = por %p4336_p9, %p4335_p8 }
  0x55   :  { %p4338_p11 = pnand %p4337_p10, %p4331_p7 }
  0x57   :  { %4341 = shalt.err (!%p4338_p11)
}
  0x58   :  { %60 = dma.hbm_to_vmem [thread:$0]  %s5428_s2, 256, %s55_s3, [#allocation6], %s4443_s23, %s4443_s23, %s4444_s24  }
  0x59   :  { %s4342_s21 = scalar_lea.hbm %s5433_s7, 256 }
  0x5a   :  { %p4343_p12 = scmp.ne.s32.totalorder %s5433_s7, %s4342_s21  ;;  %p4346_p13 = scmp.lt.u32.totalorder %s4342_s21, %s5433_s7 }
  0x5c   :  { %p4348_p0 = pnand %p4346_p13, %p4343_p12 }
  0x5e   :  { %4351 = shalt.err (!%p4348_p0)
}
  0x5f   :  { %s4352_s27 = scalar_lea.vmem %s4591_s22, 256  ;;  %p4357_p2 = scmp.lt.s32.totalorder %s4591_s22, %s4591_s22 }
  0x60   :  { %p4353_p1 = scmp.ne.s32.totalorder %s4591_s22, %s4352_s27  ;;  %p4358_p3 = scmp.lt.s32.totalorder %s4352_s27, %s4352_s27 }
  0x62   :  { %p4359_p4 = por %p4358_p3, %p4357_p2 }
  0x64   :  { %p4360_p5 = pnand %p4359_p4, %p4353_p1 }
  0x66   :  { %4363 = shalt.err (!%p4360_p5)
}
  0x67   :  { %90 = dma.hbm_to_vmem [thread:$0]  %s5433_s7, 256, %s4591_s22, [#allocation9], %s4443_s23, %s4443_s23, %s4444_s24  }
  0x68   :  { %s4452_s29 = smov [#allocation13]   ;;  %s4453_s17 = smov [#allocation14]  }
  0x69   :  { %s108_s16 = sshll.u32 %s4452_s29, 4  ;;  %s122_s0 = sshll.u32 %s4453_s17, 4  ;;  %s109_s16 = int_to_ptr.vmem [resolvable:$true] %s108_s16  ;;  %s4628_s0 = int_to_ptr.vmem [resolvable:$true] %s122_s0 }
  0x6a   :  { %s4364_s19 = scalar_lea.hbm %s5436_s10, 256 }
  0x6b   :  { %p4365_p6 = scmp.ne.s32.totalorder %s5436_s10, %s4364_s19  ;;  %p4368_p7 = scmp.lt.u32.totalorder %s4364_s19, %s5436_s10 }
  0x6d   :  { %p4370_p8 = pnand %p4368_p7, %p4365_p6 }
  0x6f   :  { %4373 = shalt.err (!%p4370_p8)
}
  0x70   :  { %s4374_s7 = scalar_lea.vmem %s109_s16, 256  ;;  %p4379_p10 = scmp.lt.s32.totalorder %s109_s16, %s109_s16 }
  0x71   :  { %p4375_p9 = scmp.ne.s32.totalorder %s109_s16, %s4374_s7  ;;  %p4380_p11 = scmp.lt.s32.totalorder %s4374_s7, %s4374_s7 }
  0x73   :  { %p4381_p12 = por %p4380_p11, %p4379_p10 }
  0x75   :  { %p4382_p13 = pnand %p4381_p12, %p4375_p9 }
  0x77   :  { %4385 = shalt.err (!%p4382_p13)
}
  0x78   :  { %114 = dma.hbm_to_vmem [thread:$0]  %s5436_s10, 256, %s109_s16, [#allocation12], %s4443_s23, %s4443_s23, %s4444_s24  }
  0x79   :  { %s4386_s2 = scalar_lea.hbm %s5438_s12, 256 }
  0x7a   :  { %p4387_p0 = scmp.ne.s32.totalorder %s5438_s12, %s4386_s2  ;;  %p4390_p1 = scmp.lt.u32.totalorder %s4386_s2, %s5438_s12 }
  0x7c   :  { %p4392_p2 = pnand %p4390_p1, %p4387_p0 }
  0x7e   :  { %4395 = shalt.err (!%p4392_p2)
}
  0x7f   :  { %s4396_s18 = scalar_lea.vmem %s4628_s0, 256  ;;  %p4401_p4 = scmp.lt.s32.totalorder %s4628_s0, %s4628_s0 }
  0x80   :  { %p4397_p3 = scmp.ne.s32.totalorder %s4628_s0, %s4396_s18  ;;  %p4402_p5 = scmp.lt.s32.totalorder %s4396_s18, %s4396_s18 }
  0x82   :  { %p4403_p6 = por %p4402_p5, %p4401_p4 }
  0x84   :  { %p4404_p7 = pnand %p4403_p6, %p4397_p3 }
  0x86   :  { %4407 = shalt.err (!%p4404_p7)
}
  0x87   :  { %128 = dma.hbm_to_vmem [thread:$0]  %s5438_s12, 256, %s4628_s0, [#allocation15], %s4443_s23, %s4443_s23, %s4444_s24  }
  0x88   :  { %4430 = dma.done.wait [#allocation3], 1024  }
  0x89   :  { %4431 = vsyncadd [#allocation3], 4294966272 }
  0x8a   :  { %4432 = dma.done.wait [#allocation6], 1280  }
  0x8b   :  { %4433 = vsyncadd [#allocation6], 4294966016 }
  0x8c   :  { %4434 = dma.done.wait [#allocation9], 512  }
  0x8d   :  { %4435 = vsyncadd [#allocation9], 4294966784 }
  0x8e   :  { %4436 = dma.done.wait [#allocation12], 272  }
  0x8f   :  { %4437 = vsyncadd [#allocation12], 4294967024 }
  0x90   :  { %4438 = dma.done.wait [#allocation15], 256  }
  0x91   :  { %4439 = vsyncadd [#allocation15], 4294967040  ;;  %v4454_v0 = vmov 0.0   ;;  %vm4455_vm0 = vmmov 0   ;;  %v4002_v1 = vld [vmem:[#allocation5] sm:$0xff]   ;;  %v4003_v2 = vld [vmem:[#allocation5 + $0x8] sm:$0xff]  }
  0x92   :  { %3577 = vmatprep.subr.bf16.mxu1 %v4454_v0  ;;  %3581 = vmatprep.mubr.msk.bf16.mxu1 %vm4455_vm0, %v4454_v0  ;;  %v4004_v3 = vld [vmem:[#allocation5 + $0x10] sm:$0xff]   ;;  %v4668_v4 = vld [vmem:[#allocation7] sm:$0xff]   ;;  %v4005_v5 = vld [vmem:[#allocation5 + $0x18] sm:$0xff]   ;;  %v4456_v12 = vmov 0   ;;  %s4457_s0 = smov 32   ;;  %vm369_vm1 = vcmask 261120  }
  0x93   :  { %3553 = vmatprep.subr.bf16.mxu0 %v4002_v1  ;;  %3578 = vmatpush3.bf16.msra.mxu1 %v4668_v4  ;;  %v4671_v6 = vld [vmem:[#allocation7 + $0x8] sm:$0xff]   ;;  %v213_v7 = vld [vmem:[#allocation2] sm:$0xff]  ;;  %v4008_v13 = vld [vmem:[#allocation5 + $0x30] sm:$0xff]  }
  0x94   :  { %3554 = vmatpush3.bf16.msra.mxu0 %v4002_v1  ;;  %3579 = vmatprep.subr.bf16.mxu1 %v4454_v0  ;;  %v214_v8 = vld [vmem:[#allocation2 + $0x8] sm:$0xff]  ;;  %v4006_v9 = vld [vmem:[#allocation5 + $0x20] sm:$0xff]   ;;  %v4010_v14 = vld [vmem:[#allocation5 + $0x38] sm:$0xff]  }
  0x95   :  { %3555 = vmatprep.subr.bf16.mxu0 %v4003_v2  ;;  %v221_v10 = vpack.c.bf16 %v214_v8, %v213_v7  ;;  %v4007_v11 = vld [vmem:[#allocation5 + $0x28] sm:$0xff]   ;;  %v215_v15 = vld [vmem:[#allocation2 + $0x10] sm:$0xff]  ;;  %v216_v16 = vld [vmem:[#allocation2 + $0x18] sm:$0xff] }
  0x96   :  { %v222_v17 = vpack.c.bf16 %v216_v16, %v215_v15  ;;  %v4683_v22 = vld [vmem:[%s5430_s4] ss:$0 sm:$0xff]  ;;  %v4700_v40 = vld [vmem:[#allocation10 + $0x8] sm:$0xff]   ;;  %v4727_v52 = vld [vmem:[#allocation11] ss:$0 sm:$0xff] }
  0x97   :  { %3580 = vmatpush3.bf16.msra.mxu1 %v4671_v6  ;;  %3569 = vmatprep.mubr.bf16.mxu0 %v221_v10  ;;  %v4697_v39 = vld [vmem:[#allocation10] sm:$0xff]   ;;  %v4716_v43 = vld [vmem:[%s5432_s6 + $0x8] sm:$0xff]   ;;  %v4735_v8 = vld [vmem:[#allocation13] sm:$0xff]  }
  0x98   :  { %3556 = vmatpush3.bf16.msra.mxu0 %v4003_v2  ;;  %3585 = vmatprep.subr.bf16.mxu1 %v4454_v0  ;;  %v4707_v41 = vld [vmem:[%s5432_s6] sm:$0xff]  }
  0x99   :  { %3557 = vmatprep.subr.bf16.mxu0 %v4004_v3  ;;  %v4745_v10 = vld [vmem:[%s5435_s9] sm:$0xff]  }
  0x9a   :  { %3582 = vmatmul.mubr.bf16.vlgmr.msra.gmra.mrb[0].mxu1 %v4456_v12 }
  0x9b   :  { %3589 = vmatprep.mubr.msk.bf16.mxu1 %vm4455_vm0, %v4454_v0  ;;  %3586 = vmatpush3.bf16.msra.mxu1 %v4697_v39 }
  0x9c   :  { %3558 = vmatpush3.bf16.msra.mxu0 %v4004_v3  ;;  %3587 = vmatprep.subr.bf16.mxu1 %v4454_v0 }
  0x9d   :  { %3559 = vmatprep.subr.bf16.mxu0 %v4005_v5 }
  0x9f   :  { %3588 = vmatpush3.bf16.msra.mxu1 %v4700_v40 }
  0xa0   :  { %3560 = vmatpush3.bf16.msra.mxu0 %v4005_v5  ;;  %3593 = vmatprep.subr.bf16.mxu1 %v4454_v0 }
  0xa1   :  { %3561 = vmatprep.subr.bf16.mxu0 %v4006_v9 }
  0xa2   :  { %3590 = vmatmul.mubr.bf16.vlgmr.msra.gmra.mrb[4].mxu1 %v4456_v12 }
  0xa3   :  { %3594 = vmatpush3.bf16.msra.mxu1 %v4707_v41  ;;  %3597 = vmatprep.mubr.msk.bf16.mxu1 %vm4455_vm0, %v4454_v0 }
  0xa4   :  { %3562 = vmatpush3.bf16.msra.mxu0 %v4006_v9  ;;  %3595 = vmatprep.subr.bf16.mxu1 %v4454_v0  ;;  %v4738_v9 = vld [vmem:[#allocation13 + $0x8] sm:$0xff]  }
  0xa5   :  { %3563 = vmatprep.subr.bf16.mxu0 %v4007_v11 }
  0xa7   :  { %3596 = vmatpush3.bf16.msra.mxu1 %v4716_v43 }
  0xa8   :  { %3564 = vmatpush3.bf16.msra.mxu0 %v4007_v11  ;;  %3601 = vmatprep.subr.bf16.mxu1 %v4454_v0 }
  0xa9   :  { %3565 = vmatprep.subr.bf16.mxu0 %v4008_v13 }
  0xac   :  { %3566 = vmatpush3.bf16.msra.mxu0 %v4008_v13  ;;  %v4754_v13 = vld [vmem:[%s5435_s9 + $0x8] sm:$0xff]  }
  0xad   :  { %3567 = vmatprep.subr.bf16.mxu0 %v4010_v14 }
  0xb0   :  { %3568 = vmatpush3.bf16.msra.mxu0 %v4010_v14 }
  0xb1   :  { %3617 = vmatprep.subr.bf16.mxu0 %v4454_v0 }
  0xb3   :  { %3570 = vmatmul.mubr.bf16.vlgmr.msra.gmra.mrb[0].mxu0 %v222_v17 }
 0x16d   :  { %v407_v18 = vpop.f32.mrb[0].mxu1 }
 0x16e   :  { %v3583_v19 = vpop.f32.mrb[1].mxu1 }
 0x16f   :  { %v410_v20 = vpop.f32.mrb[2].mxu1 }
 0x170   :  { %v3584_v21 = vpop.f32.mrb[3].mxu1 }
 0x171   :  { %v4782_v21 = vld [vmem:[%s5437_s11] ss:$0 sm:$0xff] }
 0x175   :  { %v485_v47 = vpop.f32.mrb[4].mxu1 }
 0x176   :  { %v3591_v48 = vpop.f32.mrb[5].mxu1 }
 0x177   :  { %v488_v49 = vpop.f32.mrb[6].mxu1 }
 0x178   :  { %v3592_v50 = vpop.f32.mrb[7].mxu1 }
 0x186   :  { %v4685_v23 = vpop.f32.mrb[0].mxu0 }
 0x187   :  { %v329_v24 = vpop.f32.mrb[1].mxu0 }
 0x188   :  { %v330_v25 = vadd.f32 %v4683_v22, %v329_v24  ;;  %v4688_v26 = vpop.f32.mrb[2].mxu0 }
 0x189   :  { %v4690_v27 = vpop.f32.mrb[3].mxu0 }
 0x18a   :  { %v413_v28 = vadd.f32 %v407_v18, %v330_v25 }
 0x18c   :  { %4024 = vtanh.f32 %v413_v28  ;;  %v3304_v30 = vmul.f32 -1.442695, %v413_v28 }
 0x18e   :  { %4026 = vpow2.f32 %v3304_v30 }
 0x196   :  { %v4025_v29 = vpop.eup %4024 }
 0x197   :  { %423 = vrot.lane.b32.xlu0 %v4025_v29, %s4443_s23 }
 0x198   :  { %v4027_v31 = vpop.eup %4026 }
 0x199   :  { %v417_v32 = vadd.f32 1.0, %v4027_v31 }
 0x19b   :  { %4028 = vrcp.f32 %v417_v32  ;;  %v333_v32 = vadd.f32 %v4683_v22, %v4690_v27 }
 0x1a5   :  { %v4029_v33 = vpop.eup %4028 }
 0x1a6   :  { %v421_v36 = vmul.f32 0.0, %v4029_v33 }
 0x209   :  { %v424_v34 = vpop.permute.xlu0 %423 }
 0x20a   :  { %v426_v35 = vmul.f32 %v4029_v33, %v424_v34 }
 0x20c   :  { %428 = vrot.lane.b32.xlu0 %v426_v35, %s4457_s0 }
 0x27e   :  { %v429_v37 = vpop.permute.xlu0 %428 }
 0x27f   :  { %v4694_v38 = vadd.f32 %v429_v37, %v421_v36 }
 0x281   :  { %4030 = vtanh.f32 %v4694_v38 }
 0x28b   :  { %v4031_v42 = vpop.eup %4030 }
 0x28c   :  { %434 = vrot.lane.b32.xlu1 %v4031_v42, %s4443_s23 }
 0x2fe   :  { %v435_v44 = vpop.permute.xlu1 %434 }
 0x2ff   :  { %v437_v45 = vmul.f32 %v4029_v33, %v435_v44 }
 0x301   :  { %v438_v46 = vpack.c.bf16 %v437_v45, %v437_v45 }
 0x303   :  { %492 = vrot.lane.b32.xlu1 %v438_v46, %s4457_s0 }
 0x375   :  { %v493_v51 = vpop.permute.xlu1 %492 }
 0x376   :  { %3598 = vmatmul.mubr.msk.bf16.vlgmr.msra.gmra.mrb[8].mxu1 %vm369_vm1, %v493_v51 }
 0x377   :  { %3605 = vmatprep.mubr.msk.bf16.mxu1 %vm4455_vm0, %v4454_v0  ;;  %3602 = vmatpush3.bf16.msra.mxu1 %v4735_v8 }
 0x378   :  { %3603 = vmatprep.subr.bf16.mxu1 %v4454_v0 }
 0x37b   :  { %3604 = vmatpush3.bf16.msra.mxu1 %v4738_v9 }
 0x37c   :  { %3609 = vmatprep.subr.bf16.mxu1 %v4454_v0 }
 0x37e   :  { %3606 = vmatmul.mubr.bf16.vlgmr.msra.gmra.mrb[12].mxu1 %v4456_v12 }
 0x37f   :  { %3610 = vmatpush3.bf16.msra.mxu1 %v4745_v10  ;;  %3613 = vmatprep.mubr.msk.bf16.mxu1 %vm4455_vm0, %v4454_v0 }
 0x380   :  { %3611 = vmatprep.subr.bf16.mxu1 %v4454_v0 }
 0x383   :  { %3612 = vmatpush3.bf16.msra.mxu1 %v4754_v13 }
 0x384   :  { %3625 = vmatprep.subr.bf16.mxu1 %v4454_v0 }
 0x449   :  { %v543_v53 = vpop.f32.mrb[8].mxu1 }
 0x44a   :  { %v544_v54 = vadd.f32 %v543_v53, %v485_v47  ;;  %v3599_v55 = vpop.f32.mrb[9].mxu1 }
 0x44b   :  { %v546_v56 = vpop.f32.mrb[10].mxu1 }
 0x44c   :  { %v549_v57 = vadd.f32 %v4727_v52, %v544_v54  ;;  %v3600_v58 = vpop.f32.mrb[11].mxu1 }
 0x44e   :  { %4032 = vtanh.f32 %v549_v57  ;;  %v3310_v60 = vmul.f32 -1.442695, %v549_v57 }
 0x450   :  { %4034 = vpow2.f32 %v3310_v60 }
 0x451   :  { %v621_v12 = vpop.f32.mrb[12].mxu1 }
 0x452   :  { %v3607_v17 = vpop.f32.mrb[13].mxu1 }
 0x453   :  { %v624_v18 = vpop.f32.mrb[14].mxu1 }
 0x454   :  { %v3608_v19 = vpop.f32.mrb[15].mxu1 }
 0x458   :  { %v4033_v59 = vpop.eup %4032 }
 0x459   :  { %559 = vrot.lane.b32.xlu0 %v4033_v59, %s4443_s23 }
 0x45a   :  { %v4035_v61 = vpop.eup %4034 }
 0x45b   :  { %v553_v62 = vadd.f32 1.0, %v4035_v61 }
 0x45d   :  { %4036 = vrcp.f32 %v553_v62 }
 0x467   :  { %v4037_v63 = vpop.eup %4036 }
 0x468   :  { %v557_v3 = vmul.f32 0.0, %v4037_v63 }
 0x4cb   :  { %v560_v1 = vpop.permute.xlu0 %559 }
 0x4cc   :  { %v562_v2 = vmul.f32 %v4037_v63, %v560_v1  ;;  %v217_v1 = vld [vmem:[#allocation2 + $0x20] sm:$0xff] }
 0x4ce   :  { %564 = vrot.lane.b32.xlu1 %v562_v2, %s4457_s0  ;;  %v218_v2 = vld [vmem:[#allocation2 + $0x28] sm:$0xff] }
 0x540   :  { %v565_v5 = vpop.permute.xlu1 %564 }
 0x541   :  { %v4732_v7 = vadd.f32 %v565_v5, %v557_v3  ;;  %v223_v3 = vpack.c.bf16 %v218_v2, %v217_v1  ;;  %v219_v5 = vld [vmem:[#allocation2 + $0x30] sm:$0xff] }
 0x543   :  { %4038 = vtanh.f32 %v4732_v7  ;;  %3573 = vmatprep.mubr.bf16.mxu0 %v223_v3 }
 0x54d   :  { %v4039_v11 = vpop.eup %4038 }
 0x54e   :  { %570 = vrot.lane.b32.xlu0 %v4039_v11, %s4443_s23  ;;  %v220_v11 = vld [vmem:[#allocation2 + $0x38] sm:$0xff] }
 0x5c0   :  { %v571_v14 = vpop.permute.xlu0 %570 }
 0x5c1   :  { %v573_v15 = vmul.f32 %v4037_v63, %v571_v14  ;;  %v4798_v63 = vld [vmem:[#allocation14] sm:$0xff]  }
 0x5c2   :  { %3618 = vmatpush3.bf16.msra.mxu0 %v4798_v63 }
 0x5c3   :  { %v574_v16 = vpack.c.bf16 %v573_v15, %v573_v15  ;;  %v224_v15 = vpack.c.bf16 %v220_v11, %v219_v5  ;;  %3619 = vmatprep.subr.bf16.mxu0 %v4454_v0 }
 0x5c5   :  { %628 = vrot.lane.b32.xlu1 %v574_v16, %s4457_s0  ;;  %v4801_v16 = vld [vmem:[#allocation14 + $0x8] sm:$0xff]   ;;  %3574 = vmatmul.mubr.bf16.gmra.mrb[4].mxu0 %v224_v15 }
 0x5c6   :  { %3621 = vmatprep.mubr.msk.bf16.mxu0 %vm4455_vm0, %v4454_v0  ;;  %3620 = vmatpush3.bf16.msra.mxu0 %v4801_v16 }
 0x5c7   :  { %3633 = vmatprep.subr.bf16.mxu0 %v4454_v0 }
 0x637   :  { %v4762_v20 = vpop.permute.xlu1 %628 }
 0x638   :  { %3614 = vmatmul.mubr.msk.bf16.vlgmr.msra.gmra.mrb[16].mxu1 %vm369_vm1, %v4762_v20 }
 0x639   :  { %3626 = vmatpush3.bf16.msra.mxu1 %v4668_v4  ;;  %3629 = vmatprep.mubr.msk.bf16.mxu1 %vm4455_vm0, %v4454_v0 }
 0x63a   :  { %3627 = vmatprep.subr.bf16.mxu1 %v4454_v0 }
 0x63d   :  { %3628 = vmatpush3.bf16.msra.mxu1 %v4671_v6 }
 0x63e   :  { %3641 = vmatprep.subr.bf16.mxu1 %v4454_v0 }
 0x640   :  { %3630 = vmatmul.mubr.msk.bf16.vlgmr.msra.gmra.mrb[20].mxu1 %vm369_vm1, %v493_v51 }
 0x641   :  { %3642 = vmatpush3.bf16.msra.mxu1 %v4707_v41  ;;  %3645 = vmatprep.mubr.msk.bf16.mxu1 %vm4455_vm0, %v4454_v0 }
 0x642   :  { %3643 = vmatprep.subr.bf16.mxu1 %v4454_v0 }
 0x645   :  { %3644 = vmatpush3.bf16.msra.mxu1 %v4716_v43 }
 0x646   :  { %3657 = vmatprep.subr.bf16.mxu1 %v4454_v0 }
 0x70b   :  { %v679_v24 = vpop.f32.mrb[16].mxu1 }
 0x70c   :  { %v680_v25 = vadd.f32 %v679_v24, %v621_v12  ;;  %v3615_v28 = vpop.f32.mrb[17].mxu1 }
 0x70d   :  { %v682_v29 = vpop.f32.mrb[18].mxu1  ;;  %v3575_v28 = vpop.f32.mrb[4].mxu0 }
 0x70e   :  { %v685_v30 = vadd.f32 %v4782_v21, %v680_v25  ;;  %v3616_v31 = vpop.f32.mrb[19].mxu1  ;;  %v4812_v29 = vpop.f32.mrb[5].mxu0 }
 0x710   :  { %4040 = vtanh.f32 %v685_v30  ;;  %v3316_v45 = vmul.f32 -1.442695, %v685_v30  ;;  %v3576_v30 = vpop.f32.mrb[6].mxu0 }
 0x711   :  { %v348_v31 = vpop.f32.mrb[7].mxu0 }
 0x713   :  { %v804_v33 = vpop.f32.mrb[20].mxu1 }
 0x714   :  { %v810_v34 = vadd.f32 %v804_v33, %v333_v32  ;;  %v3631_v35 = vpop.f32.mrb[21].mxu1 }
 0x715   :  { %v807_v36 = vpop.f32.mrb[22].mxu1 }
 0x716   :  { %4042 = vtanh.f32 %v810_v34  ;;  %v3632_v37 = vpop.f32.mrb[23].mxu1  ;;  %v3321_v46 = vmul.f32 -1.442695, %v810_v34 }
 0x717   :  { %4044 = vpow2.f32 %v3316_v45 }
 0x718   :  { %4046 = vpow2.f32 %v3321_v46 }
 0x71a   :  { %v4041_v42 = vpop.eup %4040 }
 0x71b   :  { %695 = vrot.lane.b32.xlu0 %v4041_v42, %s4443_s23 }
 0x720   :  { %v4043_v44 = vpop.eup %4042 }
 0x721   :  { %820 = vrot.lane.b32.xlu1 %v4043_v44, %s4443_s23  ;;  %v4045_v47 = vpop.eup %4044 }
 0x722   :  { %v689_v48 = vadd.f32 1.0, %v4045_v47  ;;  %v4047_v49 = vpop.eup %4046 }
 0x723   :  { %v814_v27 = vadd.f32 1.0, %v4047_v49 }
 0x724   :  { %4048 = vrcp.f32 %v689_v48 }
 0x725   :  { %4050 = vrcp.f32 %v814_v27 }
 0x72e   :  { %v4049_v50 = vpop.eup %4048 }
 0x72f   :  { %v4051_v54 = vpop.eup %4050  ;;  %v693_v57 = vmul.f32 0.0, %v4049_v50 }
 0x730   :  { %v818_v60 = vmul.f32 %v4051_v54, %v4694_v38 }
 0x78d   :  { %v696_v51 = vpop.permute.xlu0 %695 }
 0x78e   :  { %v698_v53 = vmul.f32 %v4049_v50, %v696_v51 }
 0x790   :  { %700 = vrot.lane.b32.xlu0 %v698_v53, %s4457_s0 }
 0x793   :  { %v821_v55 = vpop.permute.xlu1 %820 }
 0x794   :  { %v823_v56 = vmul.f32 %v4051_v54, %v821_v55 }
 0x796   :  { %825 = vrot.lane.b32.xlu1 %v823_v56, %s4457_s0 }
 0x802   :  { %v701_v58 = vpop.permute.xlu0 %700 }
 0x803   :  { %v4791_v59 = vadd.f32 %v701_v58, %v693_v57 }
 0x805   :  { %4052 = vtanh.f32 %v4791_v59 }
 0x808   :  { %v826_v61 = vpop.permute.xlu1 %825 }
 0x809   :  { %v4795_v62 = vadd.f32 %v826_v61, %v818_v60 }
 0x80b   :  { %4054 = vtanh.f32 %v4795_v62 }
 0x80f   :  { %v4053_v14 = vpop.eup %4052 }
 0x810   :  { %706 = vrot.lane.b32.xlu0 %v4053_v14, %s4443_s23 }
 0x815   :  { %v4055_v38 = vpop.eup %4054 }
 0x816   :  { %831 = vrot.lane.b32.xlu1 %v4055_v38, %s4443_s23 }
 0x882   :  { %v707_v12 = vpop.permute.xlu0 %706 }
 0x883   :  { %v709_v17 = vmul.f32 %v4049_v50, %v707_v12 }
 0x885   :  { %v710_v18 = vpack.c.bf16 %v709_v17, %v709_v17 }
 0x887   :  { %712 = vrot.lane.b32.xlu0 %v710_v18, %s4457_s0 }
 0x888   :  { %v832_v19 = vpop.permute.xlu1 %831 }
 0x889   :  { %v834_v24 = vmul.f32 %v4051_v54, %v832_v19 }
 0x88b   :  { %v835_v25 = vpack.c.bf16 %v834_v24, %v834_v24 }
 0x88d   :  { %877 = vrot.lane.b32.xlu1 %v835_v25, %s4457_s0 }
 0x8f9   :  { %v713_v32 = vpop.permute.xlu0 %712 }
 0x8fa   :  { %3622 = vmatmul.mubr.msk.bf16.vlgmr.msra.gmra.mrb[8].mxu0 %vm369_vm1, %v713_v32 }
 0x8fb   :  { %3634 = vmatpush3.bf16.msra.mxu0 %v4697_v39  ;;  %3637 = vmatprep.mubr.msk.bf16.mxu0 %vm4455_vm0, %v4454_v0 }
 0x8fc   :  { %3635 = vmatprep.subr.bf16.mxu0 %v4454_v0 }
 0x8ff   :  { %3636 = vmatpush3.bf16.msra.mxu0 %v4700_v40  ;;  %v4820_v33 = vpop.permute.xlu1 %877 }
 0x900   :  { %3646 = vmatmul.mubr.msk.bf16.vlgmr.msra.gmra.mrb[24].mxu1 %vm369_vm1, %v4820_v33  ;;  %3649 = vmatprep.subr.bf16.mxu0 %v4454_v0 }
 0x901   :  { %3658 = vmatpush3.bf16.msra.mxu1 %v4745_v10  ;;  %3661 = vmatprep.mubr.msk.bf16.mxu1 %vm4455_vm0, %v4454_v0 }
 0x902   :  { %3638 = vmatmul.mubr.msk.bf16.vlgmr.msra.gmra.mrb[12].mxu0 %vm369_vm1, %v4762_v20  ;;  %3659 = vmatprep.subr.bf16.mxu1 %v4454_v0  ;;  %v4849_v20 = vld [vmem:[%s5439_s13] ss:$0 sm:$0xff] }
 0x903   :  { %3650 = vmatpush3.bf16.msra.mxu0 %v4735_v8  ;;  %3653 = vmatprep.mubr.msk.bf16.mxu0 %vm4455_vm0, %v4454_v0 }
 0x904   :  { %3651 = vmatprep.subr.bf16.mxu0 %v4454_v0 }
 0x905   :  { %3660 = vmatpush3.bf16.msra.mxu1 %v4754_v13 }
 0x906   :  { %3673 = vmatprep.subr.bf16.mxu1 %v4454_v0 }
 0x907   :  { %3652 = vmatpush3.bf16.msra.mxu0 %v4738_v9 }
 0x908   :  { %3665 = vmatprep.subr.bf16.mxu0 %v4454_v0 }
 0x90a   :  { %3654 = vmatmul.mubr.msk.bf16.vlgmr.msra.gmra.mrb[16].mxu0 %vm369_vm1, %v713_v32  ;;  %v338_v32 = vadd.f32 %v4685_v23, %v4683_v22 }
 0x90b   :  { %3666 = vmatpush3.bf16.msra.mxu0 %v4798_v63  ;;  %3669 = vmatprep.mubr.msk.bf16.mxu0 %vm4455_vm0, %v4454_v0 }
 0x90c   :  { %3667 = vmatprep.subr.bf16.mxu0 %v4454_v0 }
 0x90f   :  { %3668 = vmatpush3.bf16.msra.mxu0 %v4801_v16 }
 0x910   :  { %3681 = vmatprep.subr.bf16.mxu0 %v4454_v0 }
 0x9cd   :  { %v763_v34 = vpop.f32.mrb[8].mxu0 }
 0x9ce   :  { %v764_v35 = vadd.f32 %v4849_v20, %v763_v34  ;;  %v3623_v36 = vpop.f32.mrb[9].mxu0 }
 0x9cf   :  { %v766_v37 = vpop.f32.mrb[10].mxu0 }
 0x9d0   :  { %769 = vst [vmem:[#allocation16] sm:$0xff] %v764_v35  ;;  %v3624_v42 = vpop.f32.mrb[11].mxu0 }
 0x9d3   :  { %v916_v44 = vpop.f32.mrb[24].mxu1 }
 0x9d4   :  { %v3647_v45 = vpop.f32.mrb[25].mxu1 }
 0x9d5   :  { %v870_v46 = vpop.f32.mrb[12].mxu0  ;;  %v919_v47 = vpop.f32.mrb[26].mxu1 }
 0x9d6   :  { %v917_v48 = vadd.f32 %v916_v44, %v870_v46  ;;  %v3639_v49 = vpop.f32.mrb[13].mxu0  ;;  %v3648_v27 = vpop.f32.mrb[27].mxu1 }
 0x9d7   :  { %v873_v50 = vpop.f32.mrb[14].mxu0 }
 0x9d8   :  { %v922_v51 = vadd.f32 %v4727_v52, %v917_v48  ;;  %v3640_v53 = vpop.f32.mrb[15].mxu0 }
 0x9da   :  { %4056 = vtanh.f32 %v922_v51  ;;  %v3324_v60 = vmul.f32 -1.442695, %v922_v51 }
 0x9dc   :  { %4058 = vpow2.f32 %v3324_v60 }
 0x9dd   :  { %v982_v54 = vpop.f32.mrb[16].mxu0 }
 0x9de   :  { %v3655_v55 = vpop.f32.mrb[17].mxu0 }
 0x9df   :  { %v985_v56 = vpop.f32.mrb[18].mxu0 }
 0x9e0   :  { %v3656_v57 = vpop.f32.mrb[19].mxu0 }
 0x9e4   :  { %v4057_v58 = vpop.eup %4056 }
 0x9e5   :  { %932 = vrot.lane.b32.xlu0 %v4057_v58, %s4443_s23 }
 0x9e6   :  { %v4059_v61 = vpop.eup %4058 }
 0x9e7   :  { %v926_v1 = vadd.f32 1.0, %v4059_v61 }
 0x9e9   :  { %4060 = vrcp.f32 %v926_v1 }
 0x9f3   :  { %v4061_v2 = vpop.eup %4060 }
 0x9f4   :  { %v930_v11 = vmul.f32 %v4061_v2, %v4732_v7 }
 0xa57   :  { %v933_v3 = vpop.permute.xlu0 %932 }
 0xa58   :  { %v935_v5 = vmul.f32 %v4061_v2, %v933_v3 }
 0xa5a   :  { %937 = vrot.lane.b32.xlu1 %v935_v5, %s4457_s0 }
 0xacc   :  { %v938_v14 = vpop.permute.xlu1 %937 }
 0xacd   :  { %v4856_v15 = vadd.f32 %v938_v14, %v930_v11 }
 0xacf   :  { %4062 = vtanh.f32 %v4856_v15 }
 0xad9   :  { %v4063_v38 = vpop.eup %4062 }
 0xada   :  { %943 = vrot.lane.b32.xlu0 %v4063_v38, %s4443_s23 }
 0xb4c   :  { %v944_v12 = vpop.permute.xlu0 %943 }
 0xb4d   :  { %v946_v17 = vmul.f32 %v4061_v2, %v944_v12 }
 0xb4f   :  { %v947_v18 = vpack.c.bf16 %v946_v17, %v946_v17 }
 0xb51   :  { %989 = vrot.lane.b32.xlu1 %v947_v18, %s4457_s0 }
 0xbc3   :  { %v4861_v19 = vpop.permute.xlu1 %989 }
 0xbc4   :  { %3662 = vmatmul.mubr.msk.bf16.vlgmr.msra.gmra.mrb[28].mxu1 %vm369_vm1, %v4861_v19 }
 0xbc5   :  { %3674 = vmatpush3.bf16.msra.mxu1 %v4668_v4  ;;  %3677 = vmatprep.mubr.msk.bf16.mxu1 %vm4455_vm0, %v4454_v0 }
 0xbc6   :  { %3675 = vmatprep.subr.bf16.mxu1 %v4454_v0 }
 0xbc9   :  { %3676 = vmatpush3.bf16.msra.mxu1 %v4671_v6 }
 0xbca   :  { %3689 = vmatprep.subr.bf16.mxu1 %v4454_v0 }
 0xbcc   :  { %3678 = vmatmul.mubr.msk.bf16.vlgmr.msra.gmra.mrb[32].mxu1 %vm369_vm1, %v4820_v33 }
 0xbcd   :  { %3690 = vmatpush3.bf16.msra.mxu1 %v4707_v41  ;;  %3693 = vmatprep.mubr.msk.bf16.mxu1 %vm4455_vm0, %v4454_v0 }
 0xbce   :  { %3691 = vmatprep.subr.bf16.mxu1 %v4454_v0 }
 0xbd1   :  { %3692 = vmatpush3.bf16.msra.mxu1 %v4716_v43 }
 0xbd2   :  { %3705 = vmatprep.subr.bf16.mxu1 %v4454_v0 }
 0xc97   :  { %v1028_v7 = vpop.f32.mrb[28].mxu1 }
 0xc98   :  { %v1029_v24 = vadd.f32 %v1028_v7, %v982_v54  ;;  %v3663_v25 = vpop.f32.mrb[29].mxu1 }
 0xc99   :  { %v1031_v28 = vpop.f32.mrb[30].mxu1 }
 0xc9a   :  { %v1034_v30 = vadd.f32 %v4782_v21, %v1029_v24  ;;  %v3664_v31 = vpop.f32.mrb[31].mxu1 }
 0xc9c   :  { %4064 = vtanh.f32 %v1034_v30  ;;  %v3327_v45 = vmul.f32 -1.442695, %v1034_v30 }
 0xc9f   :  { %v1142_v33 = vpop.f32.mrb[32].mxu1 }
 0xca0   :  { %v1148_v34 = vadd.f32 %v1142_v33, %v338_v32  ;;  %v3679_v35 = vpop.f32.mrb[33].mxu1 }
 0xca1   :  { %v1145_v36 = vpop.f32.mrb[34].mxu1 }
 0xca2   :  { %4066 = vtanh.f32 %v1148_v34  ;;  %v3680_v37 = vpop.f32.mrb[35].mxu1  ;;  %v3330_v46 = vmul.f32 -1.442695, %v1148_v34 }
 0xca3   :  { %4068 = vpow2.f32 %v3327_v45 }
 0xca4   :  { %4070 = vpow2.f32 %v3330_v46 }
 0xca6   :  { %v4065_v42 = vpop.eup %4064 }
 0xca7   :  { %1044 = vrot.lane.b32.xlu0 %v4065_v42, %s4443_s23 }
 0xcac   :  { %v4067_v44 = vpop.eup %4066 }
 0xcad   :  { %1158 = vrot.lane.b32.xlu1 %v4067_v44, %s4443_s23  ;;  %v4069_v47 = vpop.eup %4068 }
 0xcae   :  { %v1038_v48 = vadd.f32 1.0, %v4069_v47  ;;  %v4071_v49 = vpop.eup %4070 }
 0xcaf   :  { %v1152_v23 = vadd.f32 1.0, %v4071_v49 }
 0xcb0   :  { %4072 = vrcp.f32 %v1038_v48 }
 0xcb1   :  { %4074 = vrcp.f32 %v1152_v23 }
 0xcba   :  { %v4073_v27 = vpop.eup %4072 }
 0xcbb   :  { %v4075_v53 = vpop.eup %4074  ;;  %v1042_v56 = vmul.f32 %v4073_v27, %v4791_v59 }
 0xcbc   :  { %v1156_v60 = vmul.f32 %v4075_v53, %v4795_v62 }
 0xd19   :  { %v1045_v50 = vpop.permute.xlu0 %1044 }
 0xd1a   :  { %v1047_v51 = vmul.f32 %v4073_v27, %v1045_v50 }
 0xd1c   :  { %1049 = vrot.lane.b32.xlu0 %v1047_v51, %s4457_s0 }
 0xd1f   :  { %v1159_v54 = vpop.permute.xlu1 %1158 }
 0xd20   :  { %v1161_v55 = vmul.f32 %v4075_v53, %v1159_v54 }
 0xd22   :  { %1163 = vrot.lane.b32.xlu1 %v1161_v55, %s4457_s0 }
 0xd8e   :  { %v1050_v57 = vpop.permute.xlu0 %1049 }
 0xd8f   :  { %v4887_v58 = vadd.f32 %v1050_v57, %v1042_v56 }
 0xd91   :  { %4076 = vtanh.f32 %v4887_v58 }
 0xd94   :  { %v1164_v61 = vpop.permute.xlu1 %1163 }
 0xd95   :  { %v4891_v1 = vadd.f32 %v1164_v61, %v1156_v60 }
 0xd97   :  { %4078 = vtanh.f32 %v4891_v1 }
 0xd9b   :  { %v4077_v2 = vpop.eup %4076 }
 0xd9c   :  { %1055 = vrot.lane.b32.xlu0 %v4077_v2, %s4443_s23 }
 0xda1   :  { %v4079_v3 = vpop.eup %4078 }
 0xda2   :  { %1169 = vrot.lane.b32.xlu1 %v4079_v3, %s4443_s23 }
 0xe0e   :  { %v1056_v5 = vpop.permute.xlu0 %1055 }
 0xe0f   :  { %v1058_v59 = vmul.f32 %v4073_v27, %v1056_v5 }
 0xe11   :  { %v1059_v11 = vpack.c.bf16 %v1058_v59, %v1058_v59 }
 0xe13   :  { %1061 = vrot.lane.b32.xlu0 %v1059_v11, %s4457_s0 }
 0xe14   :  { %v1170_v14 = vpop.permute.xlu1 %1169 }
 0xe15   :  { %v1172_v38 = vmul.f32 %v4075_v53, %v1170_v14  ;;  %v341_v14 = vadd.f32 %v4688_v26, %v4683_v22 }
 0xe17   :  { %v1173_v12 = vpack.c.bf16 %v1172_v38, %v1172_v38 }
 0xe19   :  { %1215 = vrot.lane.b32.xlu1 %v1173_v12, %s4457_s0 }
 0xe85   :  { %v1062_v62 = vpop.permute.xlu0 %1061 }
 0xe86   :  { %3670 = vmatmul.mubr.msk.bf16.vlgmr.msra.gmra.mrb[20].mxu0 %vm369_vm1, %v1062_v62 }
 0xe87   :  { %3682 = vmatpush3.bf16.msra.mxu0 %v4697_v39  ;;  %3685 = vmatprep.mubr.msk.bf16.mxu0 %vm4455_vm0, %v4454_v0 }
 0xe88   :  { %3683 = vmatprep.subr.bf16.mxu0 %v4454_v0 }
 0xe8b   :  { %3684 = vmatpush3.bf16.msra.mxu0 %v4700_v40  ;;  %v4904_v17 = vpop.permute.xlu1 %1215 }
 0xe8c   :  { %3694 = vmatmul.mubr.msk.bf16.vlgmr.msra.gmra.mrb[36].mxu1 %vm369_vm1, %v4904_v17  ;;  %3697 = vmatprep.subr.bf16.mxu0 %v4454_v0 }
 0xe8d   :  { %3706 = vmatpush3.bf16.msra.mxu1 %v4745_v10  ;;  %3709 = vmatprep.mubr.msk.bf16.mxu1 %vm4455_vm0, %v4454_v0 }
 0xe8e   :  { %3686 = vmatmul.mubr.msk.bf16.vlgmr.msra.gmra.mrb[24].mxu0 %vm369_vm1, %v4861_v19  ;;  %3707 = vmatprep.subr.bf16.mxu1 %v4454_v0 }
 0xe8f   :  { %3698 = vmatpush3.bf16.msra.mxu0 %v4735_v8  ;;  %3701 = vmatprep.mubr.msk.bf16.mxu0 %vm4455_vm0, %v4454_v0 }
 0xe90   :  { %3699 = vmatprep.subr.bf16.mxu0 %v4454_v0 }
 0xe91   :  { %3708 = vmatpush3.bf16.msra.mxu1 %v4754_v13 }
 0xe92   :  { %3721 = vmatprep.subr.bf16.mxu1 %v4454_v0 }
 0xe93   :  { %3700 = vmatpush3.bf16.msra.mxu0 %v4738_v9 }
 0xe94   :  { %3713 = vmatprep.subr.bf16.mxu0 %v4454_v0 }
 0xe96   :  { %3702 = vmatmul.mubr.msk.bf16.vlgmr.msra.gmra.mrb[28].mxu0 %vm369_vm1, %v1062_v62 }
 0xe97   :  { %3714 = vmatpush3.bf16.msra.mxu0 %v4798_v63  ;;  %3717 = vmatprep.mubr.msk.bf16.mxu0 %vm4455_vm0, %v4454_v0 }
 0xe98   :  { %3715 = vmatprep.subr.bf16.mxu0 %v4454_v0 }
 0xe9b   :  { %3716 = vmatpush3.bf16.msra.mxu0 %v4801_v16 }
 0xe9c   :  { %3729 = vmatprep.subr.bf16.mxu0 %v4454_v0 }
 0xf59   :  { %v1100_v18 = vpop.f32.mrb[20].mxu0 }
 0xf5a   :  { %v1101_v19 = vadd.f32 %v4849_v20, %v1100_v18  ;;  %v3671_v7 = vpop.f32.mrb[21].mxu0 }
 0xf5b   :  { %v1103_v24 = vpop.f32.mrb[22].mxu0 }
 0xf5c   :  { %1107 = vst [vmem:[#allocation16 + $0x8] sm:$0xff] %v1101_v19  ;;  %v3672_v25 = vpop.f32.mrb[23].mxu0 }
 0xf5f   :  { %v1254_v28 = vpop.f32.mrb[36].mxu1 }
 0xf60   :  { %v3695_v30 = vpop.f32.mrb[37].mxu1 }
 0xf61   :  { %v1208_v31 = vpop.f32.mrb[24].mxu0  ;;  %v1257_v32 = vpop.f32.mrb[38].mxu1 }
 0xf62   :  { %v1255_v33 = vadd.f32 %v1254_v28, %v1208_v31  ;;  %v3687_v34 = vpop.f32.mrb[25].mxu0  ;;  %v3696_v35 = vpop.f32.mrb[39].mxu1 }
 0xf63   :  { %v1211_v36 = vpop.f32.mrb[26].mxu0 }
 0xf64   :  { %v1260_v37 = vadd.f32 %v4727_v52, %v1255_v33  ;;  %v3688_v42 = vpop.f32.mrb[27].mxu0 }
 0xf66   :  { %4080 = vtanh.f32 %v1260_v37  ;;  %v3333_v49 = vmul.f32 -1.442695, %v1260_v37 }
 0xf68   :  { %4082 = vpow2.f32 %v3333_v49 }
 0xf69   :  { %v1320_v44 = vpop.f32.mrb[28].mxu0 }
 0xf6a   :  { %v3703_v45 = vpop.f32.mrb[29].mxu0 }
 0xf6b   :  { %v1323_v46 = vpop.f32.mrb[30].mxu0 }
 0xf6c   :  { %v3704_v47 = vpop.f32.mrb[31].mxu0 }
 0xf70   :  { %v4081_v48 = vpop.eup %4080 }
 0xf71   :  { %1270 = vrot.lane.b32.xlu0 %v4081_v48, %s4443_s23 }
 0xf72   :  { %v4083_v23 = vpop.eup %4082 }
 0xf73   :  { %v1264_v27 = vadd.f32 1.0, %v4083_v23 }
 0xf75   :  { %4084 = vrcp.f32 %v1264_v27 }
 0xf7f   :  { %v4085_v50 = vpop.eup %4084 }
 0xf80   :  { %v1268_v54 = vmul.f32 %v4085_v50, %v4856_v15 }
 0xfe3   :  { %v1271_v51 = vpop.permute.xlu0 %1270 }
 0xfe4   :  { %v1273_v53 = vmul.f32 %v4085_v50, %v1271_v51 }
 0xfe6   :  { %1275 = vrot.lane.b32.xlu1 %v1273_v53, %s4457_s0 }
0x1058   :  { %v1276_v55 = vpop.permute.xlu1 %1275 }
0x1059   :  { %v4935_v56 = vadd.f32 %v1276_v55, %v1268_v54 }
0x105b   :  { %4086 = vtanh.f32 %v4935_v56 }
0x1065   :  { %v4087_v57 = vpop.eup %4086 }
0x1066   :  { %1281 = vrot.lane.b32.xlu0 %v4087_v57, %s4443_s23 }
0x10d8   :  { %v1282_v60 = vpop.permute.xlu0 %1281 }
0x10d9   :  { %v1284_v61 = vmul.f32 %v4085_v50, %v1282_v60 }
0x10db   :  { %v1285_v2 = vpack.c.bf16 %v1284_v61, %v1284_v61 }
0x10dd   :  { %1327 = vrot.lane.b32.xlu1 %v1285_v2, %s4457_s0 }
0x114f   :  { %v4940_v3 = vpop.permute.xlu1 %1327 }
0x1150   :  { %3710 = vmatmul.mubr.msk.bf16.vlgmr.msra.gmra.mrb[40].mxu1 %vm369_vm1, %v4940_v3 }
0x1151   :  { %3722 = vmatpush3.bf16.msra.mxu1 %v4668_v4  ;;  %3725 = vmatprep.mubr.msk.bf16.mxu1 %vm4455_vm0, %v4454_v0 }
0x1152   :  { %3723 = vmatprep.subr.bf16.mxu1 %v4454_v0 }
0x1155   :  { %3724 = vmatpush3.bf16.msra.mxu1 %v4671_v6 }
0x1156   :  { %3737 = vmatprep.subr.bf16.mxu1 %v4454_v0 }
0x1158   :  { %3726 = vmatmul.mubr.msk.bf16.vlgmr.msra.gmra.mrb[44].mxu1 %vm369_vm1, %v4904_v17 }
0x1159   :  { %3738 = vmatpush3.bf16.msra.mxu1 %v4707_v41  ;;  %3741 = vmatprep.mubr.msk.bf16.mxu1 %vm4455_vm0, %v4454_v0 }
0x115a   :  { %3739 = vmatprep.subr.bf16.mxu1 %v4454_v0 }
0x115d   :  { %3740 = vmatpush3.bf16.msra.mxu1 %v4716_v43 }
0x115e   :  { %3753 = vmatprep.subr.bf16.mxu1 %v4454_v0 }
0x1223   :  { %v1366_v4 = vpop.f32.mrb[40].mxu1 }
0x1224   :  { %v1367_v15 = vadd.f32 %v1366_v4, %v1320_v44  ;;  %v3711_v5 = vpop.f32.mrb[41].mxu1 }
0x1225   :  { %v1369_v6 = vpop.f32.mrb[42].mxu1 }
0x1226   :  { %v1372_v59 = vadd.f32 %v4782_v21, %v1367_v15  ;;  %v3712_v11 = vpop.f32.mrb[43].mxu1 }
0x1228   :  { %4088 = vtanh.f32 %v1372_v59  ;;  %v3336_v24 = vmul.f32 -1.442695, %v1372_v59 }
0x122b   :  { %v1480_v38 = vpop.f32.mrb[44].mxu1 }
0x122c   :  { %v1486_v12 = vadd.f32 %v1480_v38, %v341_v14  ;;  %v3727_v62 = vpop.f32.mrb[45].mxu1 }
0x122d   :  { %v1483_v17 = vpop.f32.mrb[46].mxu1 }
0x122e   :  { %4090 = vtanh.f32 %v1486_v12  ;;  %v3728_v18 = vpop.f32.mrb[47].mxu1  ;;  %v3339_v25 = vmul.f32 -1.442695, %v1486_v12 }
0x122f   :  { %4092 = vpow2.f32 %v3336_v24 }
0x1230   :  { %4094 = vpow2.f32 %v3339_v25 }
0x1232   :  { %v4089_v19 = vpop.eup %4088 }
0x1233   :  { %1382 = vrot.lane.b32.xlu0 %v4089_v19, %s4443_s23 }
0x1238   :  { %v4091_v7 = vpop.eup %4090 }
0x1239   :  { %1496 = vrot.lane.b32.xlu1 %v4091_v7, %s4443_s23  ;;  %v4093_v28 = vpop.eup %4092 }
0x123a   :  { %v1376_v30 = vadd.f32 1.0, %v4093_v28  ;;  %v4095_v31 = vpop.eup %4094 }
0x123b   :  { %v1490_v22 = vadd.f32 1.0, %v4095_v31 }
0x123c   :  { %4096 = vrcp.f32 %v1376_v30 }
0x123d   :  { %4098 = vrcp.f32 %v1490_v22 }
0x1246   :  { %v4097_v26 = vpop.eup %4096 }
0x1247   :  { %v4099_v34 = vpop.eup %4098  ;;  %v1380_v37 = vmul.f32 %v4097_v26, %v4887_v58 }
0x1248   :  { %v1494_v45 = vmul.f32 %v4099_v34, %v4891_v1 }
0x12a5   :  { %v1383_v32 = vpop.permute.xlu0 %1382 }
0x12a6   :  { %v1385_v33 = vmul.f32 %v4097_v26, %v1383_v32  ;;  %v5023_v32 = vld [vmem:[#allocation7] sm:$0xff]  }
0x12a8   :  { %1387 = vrot.lane.b32.xlu0 %v1385_v33, %s4457_s0 }
0x12ab   :  { %v1497_v35 = vpop.permute.xlu1 %1496 }
0x12ac   :  { %v1499_v36 = vmul.f32 %v4099_v34, %v1497_v35 }
0x12ae   :  { %1501 = vrot.lane.b32.xlu1 %v1499_v36, %s4457_s0 }
0x131a   :  { %v1388_v42 = vpop.permute.xlu0 %1387 }
0x131b   :  { %v4966_v44 = vadd.f32 %v1388_v42, %v1380_v37 }
0x131d   :  { %4100 = vtanh.f32 %v4966_v44 }
0x1320   :  { %v1502_v46 = vpop.permute.xlu1 %1501 }
0x1321   :  { %v4970_v47 = vadd.f32 %v1502_v46, %v1494_v45 }
0x1323   :  { %4102 = vtanh.f32 %v4970_v47 }
0x1327   :  { %v4101_v48 = vpop.eup %4100 }
0x1328   :  { %1393 = vrot.lane.b32.xlu0 %v4101_v48, %s4443_s23 }
0x132d   :  { %v4103_v49 = vpop.eup %4102 }
0x132e   :  { %1507 = vrot.lane.b32.xlu1 %v4103_v49, %s4443_s23 }
0x139a   :  { %v1394_v23 = vpop.permute.xlu0 %1393 }
0x139b   :  { %v1396_v58 = vmul.f32 %v4097_v26, %v1394_v23 }
0x139d   :  { %v1397_v27 = vpack.c.bf16 %v1396_v58, %v1396_v58 }
0x139f   :  { %1399 = vrot.lane.b32.xlu0 %v1397_v27, %s4457_s0 }
0x13a0   :  { %v1508_v50 = vpop.permute.xlu1 %1507 }
0x13a1   :  { %v1510_v51 = vmul.f32 %v4099_v34, %v1508_v50 }
0x13a3   :  { %v1511_v53 = vpack.c.bf16 %v1510_v51, %v1510_v51 }
0x13a5   :  { %1553 = vrot.lane.b32.xlu1 %v1511_v53, %s4457_s0 }
0x1411   :  { %v1400_v1 = vpop.permute.xlu0 %1399 }
0x1412   :  { %3718 = vmatmul.mubr.msk.bf16.vlgmr.msra.gmra.mrb[32].mxu0 %vm369_vm1, %v1400_v1 }
0x1413   :  { %3730 = vmatpush3.bf16.msra.mxu0 %v4697_v39  ;;  %3733 = vmatprep.mubr.msk.bf16.mxu0 %vm4455_vm0, %v4454_v0 }
0x1414   :  { %3731 = vmatprep.subr.bf16.mxu0 %v4454_v0 }
0x1417   :  { %3732 = vmatpush3.bf16.msra.mxu0 %v4700_v40  ;;  %v4983_v54 = vpop.permute.xlu1 %1553 }
0x1418   :  { %3742 = vmatmul.mubr.msk.bf16.vlgmr.msra.gmra.mrb[48].mxu1 %vm369_vm1, %v4983_v54  ;;  %3745 = vmatprep.subr.bf16.mxu0 %v4454_v0 }
0x1419   :  { %3754 = vmatpush3.bf16.msra.mxu1 %v4745_v10  ;;  %3757 = vmatprep.mubr.msk.bf16.mxu1 %vm4455_vm0, %v4454_v0 }
0x141a   :  { %3734 = vmatmul.mubr.msk.bf16.vlgmr.msra.gmra.mrb[36].mxu0 %vm369_vm1, %v4940_v3  ;;  %3755 = vmatprep.subr.bf16.mxu1 %v4454_v0 }
0x141b   :  { %3746 = vmatpush3.bf16.msra.mxu0 %v4735_v8  ;;  %3749 = vmatprep.mubr.msk.bf16.mxu0 %vm4455_vm0, %v4454_v0 }
0x141c   :  { %3747 = vmatprep.subr.bf16.mxu0 %v4454_v0 }
0x141d   :  { %3756 = vmatpush3.bf16.msra.mxu1 %v4754_v13 }
0x141e   :  { %3769 = vmatprep.subr.bf16.mxu1 %v4454_v0 }
0x141f   :  { %3748 = vmatpush3.bf16.msra.mxu0 %v4738_v9 }
0x1420   :  { %3761 = vmatprep.subr.bf16.mxu0 %v4454_v0 }
0x1422   :  { %3750 = vmatmul.mubr.msk.bf16.vlgmr.msra.gmra.mrb[40].mxu0 %vm369_vm1, %v1400_v1 }
0x1423   :  { %3762 = vmatpush3.bf16.msra.mxu0 %v4798_v63  ;;  %3765 = vmatprep.mubr.msk.bf16.mxu0 %vm4455_vm0, %v4454_v0 }
0x1424   :  { %3763 = vmatprep.subr.bf16.mxu0 %v4454_v0 }
0x1427   :  { %3764 = vmatpush3.bf16.msra.mxu0 %v4801_v16 }
0x1428   :  { %3777 = vmatprep.subr.bf16.mxu0 %v4454_v0 }
0x14e5   :  { %v1438_v39 = vpop.f32.mrb[32].mxu0 }
0x14e6   :  { %v1439_v40 = vadd.f32 %v4849_v20, %v1438_v39  ;;  %v3719_v8 = vpop.f32.mrb[33].mxu0 }
0x14e7   :  { %v1441_v9 = vpop.f32.mrb[34].mxu0 }
0x14e8   :  { %1445 = vst [vmem:[#allocation16 + $0x10] sm:$0xff] %v1439_v40  ;;  %v3720_v10 = vpop.f32.mrb[35].mxu0 }
0x14eb   :  { %v1592_v13 = vpop.f32.mrb[48].mxu1 }
0x14ec   :  { %v3743_v55 = vpop.f32.mrb[49].mxu1 }
0x14ed   :  { %v1546_v57 = vpop.f32.mrb[36].mxu0  ;;  %v1595_v60 = vpop.f32.mrb[50].mxu1 }
0x14ee   :  { %v1593_v61 = vadd.f32 %v1592_v13, %v1546_v57  ;;  %v3735_v2 = vpop.f32.mrb[37].mxu0  ;;  %v3744_v3 = vpop.f32.mrb[51].mxu1 }
0x14ef   :  { %v1549_v4 = vpop.f32.mrb[38].mxu0 }
0x14f0   :  { %v1598_v15 = vadd.f32 %v4727_v52, %v1593_v61  ;;  %v3736_v5 = vpop.f32.mrb[39].mxu0 }
0x14f2   :  { %4104 = vtanh.f32 %v1598_v15  ;;  %v3342_v12 = vmul.f32 -1.442695, %v1598_v15 }
0x14f4   :  { %4106 = vpow2.f32 %v3342_v12 }
0x14f5   :  { %v1658_v6 = vpop.f32.mrb[40].mxu0 }
0x14f6   :  { %v3751_v59 = vpop.f32.mrb[41].mxu0 }
0x14f7   :  { %v1661_v11 = vpop.f32.mrb[42].mxu0 }
0x14f8   :  { %v3752_v14 = vpop.f32.mrb[43].mxu0 }
0x14f9   :  { %v5063_v14 = vld [vmem:[#allocation10] sm:$0xff]  }
0x14fc   :  { %v4105_v38 = vpop.eup %4104 }
0x14fd   :  { %1608 = vrot.lane.b32.xlu0 %v4105_v38, %s4443_s23  ;;  %v5069_v38 = vld [vmem:[#allocation10 + $0x8] sm:$0xff]  }
0x14fe   :  { %v4107_v62 = vpop.eup %4106 }
0x14ff   :  { %v1602_v17 = vadd.f32 1.0, %v4107_v62  ;;  %v5080_v62 = vld [vmem:[%s5435_s9] sm:$0xff]  }
0x1501   :  { %4108 = vrcp.f32 %v1602_v17  ;;  %v5088_v17 = vld [vmem:[#allocation13] sm:$0xff]  }
0x150b   :  { %v4109_v18 = vpop.eup %4108 }
0x150c   :  { %v1606_v52 = vmul.f32 %v4109_v18, %v4935_v56  ;;  %v5029_v56 = vld [vmem:[#allocation7 + $0x8] sm:$0xff]  }
0x156f   :  { %v1609_v19 = vpop.permute.xlu0 %1608 }
0x1570   :  { %v1611_v7 = vmul.f32 %v4109_v18, %v1609_v19  ;;  %v5101_v19 = vld [vmem:[#allocation13 + $0x8] sm:$0xff]  }
0x1572   :  { %1613 = vrot.lane.b32.xlu1 %v1611_v7, %s4457_s0 }
0x15e4   :  { %v1614_v24 = vpop.permute.xlu1 %1613 }
0x15e5   :  { %v5014_v25 = vadd.f32 %v1614_v24, %v1606_v52 }
0x15e7   :  { %4110 = vtanh.f32 %v5014_v25 }
0x15f1   :  { %v4111_v28 = vpop.eup %4110 }
0x15f2   :  { %1619 = vrot.lane.b32.xlu0 %v4111_v28, %s4443_s23 }
0x1664   :  { %v1620_v30 = vpop.permute.xlu0 %1619 }
0x1665   :  { %v1622_v31 = vmul.f32 %v4109_v18, %v1620_v30  ;;  %v5097_v18 = vld [vmem:[%s5435_s9 + $0x8] sm:$0xff]  }
0x1667   :  { %v1623_v22 = vpack.c.bf16 %v1622_v31, %v1622_v31 }
0x1669   :  { %1665 = vrot.lane.b32.xlu1 %v1623_v22, %s4457_s0 }
0x16db   :  { %v5019_v26 = vpop.permute.xlu1 %1665 }
0x16dc   :  { %3758 = vmatmul.mubr.msk.bf16.vlgmr.msra.gmra.mrb[52].mxu1 %vm369_vm1, %v5019_v26 }
0x16dd   :  { %3770 = vmatpush3.bf16.msra.mxu1 %v5023_v32  ;;  %3773 = vmatprep.mubr.msk.bf16.mxu1 %vm4455_vm0, %v4454_v0 }
0x16de   :  { %3771 = vmatprep.subr.bf16.mxu1 %v4454_v0 }
0x16e1   :  { %3772 = vmatpush3.bf16.msra.mxu1 %v5029_v56 }
0x16e2   :  { %3785 = vmatprep.subr.bf16.mxu1 %v4454_v0 }
0x16e4   :  { %3774 = vmatmul.mubr.msk.bf16.vlgmr.msra.gmra.mrb[56].mxu1 %vm369_vm1, %v4983_v54 }
0x16e5   :  { %3786 = vmatpush3.bf16.msra.mxu1 %v4707_v41  ;;  %3789 = vmatprep.mubr.msk.bf16.mxu1 %vm4455_vm0, %v4454_v0  ;;  %v4218_v41 = vld [vmem:[%s5430_s4] ss:$0 sm:$0xff] }
0x16e6   :  { %3787 = vmatprep.subr.bf16.mxu1 %v4454_v0  ;;  %v346_v45 = vadd.f32 %v4218_v41, %v4812_v29 }
0x16e9   :  { %3788 = vmatpush3.bf16.msra.mxu1 %v4716_v43 }
0x16ea   :  { %3801 = vmatprep.subr.bf16.mxu1 %v4454_v0 }
0x17af   :  { %v1704_v33 = vpop.f32.mrb[52].mxu1 }
0x17b0   :  { %v1705_v34 = vadd.f32 %v1704_v33, %v1658_v6  ;;  %v3759_v35 = vpop.f32.mrb[53].mxu1 }
0x17b1   :  { %v1707_v36 = vpop.f32.mrb[54].mxu1 }
0x17b2   :  { %v1710_v37 = vadd.f32 %v4782_v21, %v1705_v34  ;;  %v3760_v42 = vpop.f32.mrb[55].mxu1 }
0x17b4   :  { %4112 = vtanh.f32 %v1710_v37  ;;  %v3345_v21 = vmul.f32 -1.442695, %v1710_v37  ;;  %v5113_v37 = vld [vmem:[#allocation11] ss:$0 sm:$0xff] }
0x17b7   :  { %v1818_v46 = vpop.f32.mrb[56].mxu1 }
0x17b8   :  { %v1824_v48 = vadd.f32 %v1818_v46, %v346_v45  ;;  %v3775_v49 = vpop.f32.mrb[57].mxu1 }
0x17b9   :  { %v1821_v43 = vpop.f32.mrb[58].mxu1 }
0x17ba   :  { %4114 = vtanh.f32 %v1824_v48  ;;  %v3776_v23 = vpop.f32.mrb[59].mxu1  ;;  %v3348_v50 = vmul.f32 -1.442695, %v1824_v48 }
0x17bb   :  { %4116 = vpow2.f32 %v3345_v21 }
0x17bc   :  { %4118 = vpow2.f32 %v3348_v50 }
0x17be   :  { %v4113_v58 = vpop.eup %4112 }
0x17bf   :  { %1720 = vrot.lane.b32.xlu0 %v4113_v58, %s4443_s23 }
0x17c4   :  { %v4115_v27 = vpop.eup %4114 }
0x17c5   :  { %1834 = vrot.lane.b32.xlu1 %v4115_v27, %s4443_s23  ;;  %v4117_v51 = vpop.eup %4116 }
0x17c6   :  { %v1714_v53 = vadd.f32 1.0, %v4117_v51  ;;  %v4119_v1 = vpop.eup %4118 }
0x17c7   :  { %v1828_v29 = vadd.f32 1.0, %v4119_v1 }
0x17c8   :  { %4120 = vrcp.f32 %v1714_v53 }
0x17c9   :  { %4122 = vrcp.f32 %v1828_v29 }
0x17d2   :  { %v4121_v54 = vpop.eup %4120 }
0x17d3   :  { %v4123_v8 = vpop.eup %4122  ;;  %v1718_v13 = vmul.f32 %v4121_v54, %v4966_v44 }
0x17d4   :  { %v1832_v60 = vmul.f32 %v4123_v8, %v4970_v47 }
0x1831   :  { %v1721_v39 = vpop.permute.xlu0 %1720 }
0x1832   :  { %v1723_v40 = vmul.f32 %v4121_v54, %v1721_v39 }
0x1834   :  { %1725 = vrot.lane.b32.xlu0 %v1723_v40, %s4457_s0 }
0x1837   :  { %v1835_v9 = vpop.permute.xlu1 %1834 }
0x1838   :  { %v1837_v10 = vmul.f32 %v4123_v8, %v1835_v9 }
0x183a   :  { %1839 = vrot.lane.b32.xlu1 %v1837_v10, %s4457_s0 }
0x18a6   :  { %v1726_v55 = vpop.permute.xlu0 %1725 }
0x18a7   :  { %v5051_v57 = vadd.f32 %v1726_v55, %v1718_v13  ;;  %v5149_v13 = vld [vmem:[%s5437_s11] ss:$0 sm:$0xff] }
0x18a9   :  { %4124 = vtanh.f32 %v5051_v57 }
0x18ac   :  { %v1840_v61 = vpop.permute.xlu1 %1839 }
0x18ad   :  { %v5055_v2 = vadd.f32 %v1840_v61, %v1832_v60 }
0x18af   :  { %4126 = vtanh.f32 %v5055_v2 }
0x18b3   :  { %v4125_v3 = vpop.eup %4124 }
0x18b4   :  { %1731 = vrot.lane.b32.xlu0 %v4125_v3, %s4443_s23 }
0x18b9   :  { %v4127_v4 = vpop.eup %4126 }
0x18ba   :  { %1845 = vrot.lane.b32.xlu1 %v4127_v4, %s4443_s23 }
0x1926   :  { %v1732_v15 = vpop.permute.xlu0 %1731 }
0x1927   :  { %v1734_v44 = vmul.f32 %v4121_v54, %v1732_v15 }
0x1929   :  { %v1735_v5 = vpack.c.bf16 %v1734_v44, %v1734_v44 }
0x192b   :  { %1737 = vrot.lane.b32.xlu0 %v1735_v5, %s4457_s0 }
0x192c   :  { %v1846_v6 = vpop.permute.xlu1 %1845 }
0x192d   :  { %v1848_v59 = vmul.f32 %v4123_v8, %v1846_v6 }
0x192f   :  { %v1849_v11 = vpack.c.bf16 %v1848_v59, %v1848_v59 }
0x1931   :  { %1891 = vrot.lane.b32.xlu1 %v1849_v11, %s4457_s0 }
0x199d   :  { %v1738_v47 = vpop.permute.xlu0 %1737 }
0x199e   :  { %3766 = vmatmul.mubr.msk.bf16.vlgmr.msra.gmra.mrb[44].mxu0 %vm369_vm1, %v1738_v47 }
0x199f   :  { %3778 = vmatpush3.bf16.msra.mxu0 %v5063_v14  ;;  %3781 = vmatprep.mubr.msk.bf16.mxu0 %vm4455_vm0, %v4454_v0 }
0x19a0   :  { %3779 = vmatprep.subr.bf16.mxu0 %v4454_v0 }
0x19a3   :  { %3780 = vmatpush3.bf16.msra.mxu0 %v5069_v38  ;;  %v5072_v12 = vpop.permute.xlu1 %1891 }
0x19a4   :  { %3790 = vmatmul.mubr.msk.bf16.vlgmr.msra.gmra.mrb[60].mxu1 %vm369_vm1, %v5072_v12  ;;  %3793 = vmatprep.subr.bf16.mxu0 %v4454_v0 }
0x19a5   :  { %3802 = vmatpush3.bf16.msra.mxu1 %v5080_v62  ;;  %3805 = vmatprep.mubr.msk.bf16.mxu1 %vm4455_vm0, %v4454_v0 }
0x19a6   :  { %3782 = vmatmul.mubr.msk.bf16.vlgmr.msra.gmra.mrb[48].mxu0 %vm369_vm1, %v5019_v26  ;;  %3803 = vmatprep.subr.bf16.mxu1 %v4454_v0 }
0x19a7   :  { %3794 = vmatpush3.bf16.msra.mxu0 %v5088_v17  ;;  %3797 = vmatprep.mubr.msk.bf16.mxu0 %vm4455_vm0, %v4454_v0 }
0x19a8   :  { %3795 = vmatprep.subr.bf16.mxu0 %v4454_v0 }
0x19a9   :  { %3804 = vmatpush3.bf16.msra.mxu1 %v5097_v18 }
0x19aa   :  { %3817 = vmatprep.subr.bf16.mxu1 %v4454_v0 }
0x19ab   :  { %3796 = vmatpush3.bf16.msra.mxu0 %v5101_v19 }
0x19ac   :  { %3809 = vmatprep.subr.bf16.mxu0 %v4454_v0 }
0x19ae   :  { %3798 = vmatmul.mubr.msk.bf16.vlgmr.msra.gmra.mrb[52].mxu0 %vm369_vm1, %v1738_v47 }
0x19af   :  { %3810 = vmatpush3.bf16.msra.mxu0 %v4798_v63  ;;  %3813 = vmatprep.mubr.msk.bf16.mxu0 %vm4455_vm0, %v4454_v0 }
0x19b0   :  { %3811 = vmatprep.subr.bf16.mxu0 %v4454_v0 }
0x19b3   :  { %3812 = vmatpush3.bf16.msra.mxu0 %v4801_v16 }
0x19b4   :  { %3825 = vmatprep.subr.bf16.mxu0 %v4454_v0 }
0x1a71   :  { %v1776_v7 = vpop.f32.mrb[44].mxu0 }
0x1a72   :  { %v1777_v52 = vadd.f32 %v4849_v20, %v1776_v7  ;;  %v3767_v24 = vpop.f32.mrb[45].mxu0 }
0x1a73   :  { %v1779_v28 = vpop.f32.mrb[46].mxu0 }
0x1a74   :  { %1783 = vst [vmem:[#allocation16 + $0x18] sm:$0xff] %v1777_v52  ;;  %v3768_v30 = vpop.f32.mrb[47].mxu0 }
0x1a77   :  { %v1930_v31 = vpop.f32.mrb[60].mxu1 }
0x1a78   :  { %v3791_v22 = vpop.f32.mrb[61].mxu1 }
0x1a79   :  { %v1884_v26 = vpop.f32.mrb[48].mxu0  ;;  %v1933_v63 = vpop.f32.mrb[62].mxu1 }
0x1a7a   :  { %v1931_v33 = vadd.f32 %v1930_v31, %v1884_v26  ;;  %v3783_v34 = vpop.f32.mrb[49].mxu0  ;;  %v3792_v35 = vpop.f32.mrb[63].mxu1 }
0x1a7b   :  { %v1887_v36 = vpop.f32.mrb[50].mxu0  ;;  %v5164_v35 = vld [vmem:[#allocation8] sm:$0xff]  }
0x1a7c   :  { %v1936_v16 = vadd.f32 %v5113_v37, %v1931_v33  ;;  %v3784_v42 = vpop.f32.mrb[51].mxu0 }
0x1a7d   :  { %v5182_v42 = vld [vmem:[#allocation14 + $0x8] sm:$0xff]  }
0x1a7e   :  { %4128 = vtanh.f32 %v1936_v16  ;;  %v3351_v49 = vmul.f32 -1.442695, %v1936_v16  ;;  %v5174_v16 = vld [vmem:[#allocation14] sm:$0xff]  }
0x1a80   :  { %4130 = vpow2.f32 %v3351_v49 }
0x1a81   :  { %v1996_v41 = vpop.f32.mrb[52].mxu0 }
0x1a82   :  { %v3799_v20 = vpop.f32.mrb[53].mxu0 }
0x1a83   :  { %v1999_v45 = vpop.f32.mrb[54].mxu0  ;;  %v5199_v20 = vld [vmem:[%s5432_s6 + $0x8] sm:$0xff]  }
0x1a84   :  { %v3800_v46 = vpop.f32.mrb[55].mxu0 }
0x1a88   :  { %v4129_v48 = vpop.eup %4128 }
0x1a89   :  { %1946 = vrot.lane.b32.xlu0 %v4129_v48, %s4443_s23  ;;  %v5208_v48 = vld [vmem:[%s5439_s13] ss:$0 sm:$0xff] }
0x1a8a   :  { %v4131_v43 = vpop.eup %4130 }
0x1a8b   :  { %v1940_v23 = vadd.f32 1.0, %v4131_v43 }
0x1a8d   :  { %4132 = vrcp.f32 %v1940_v23 }
0x1a97   :  { %v4133_v58 = vpop.eup %4132 }
0x1a98   :  { %v1944_v50 = vmul.f32 %v4133_v58, %v5014_v25 }
0x1afb   :  { %v1947_v27 = vpop.permute.xlu0 %1946 }
0x1afc   :  { %v1949_v21 = vmul.f32 %v4133_v58, %v1947_v27 }
0x1afe   :  { %1951 = vrot.lane.b32.xlu1 %v1949_v21, %s4457_s0 }
0x1b70   :  { %v1952_v51 = vpop.permute.xlu1 %1951 }
0x1b71   :  { %v5119_v53 = vadd.f32 %v1952_v51, %v1944_v50  ;;  %v5214_v51 = vld [vmem:[%s5431_s5] ss:$0 sm:$0xff]  ;;  %s4458_s5 = smov [#allocation16]  }
0x1b72   :  { %s3273_s13 = sshll.u32 %s4458_s5, 4  ;;  %s3274_s13 = int_to_ptr.vmem [resolvable:$true] %s3273_s13 }
0x1b73   :  { %4134 = vtanh.f32 %v5119_v53  ;;  %s4408_s30 = scalar_lea.vmem %s3274_s13, 1024  ;;  %p4413_p9 = scmp.lt.s32.totalorder %s3274_s13, %s3274_s13 }
0x1b74   :  { %p4409_p8 = scmp.ne.s32.totalorder %s3274_s13, %s4408_s30  ;;  %p4414_p10 = scmp.lt.s32.totalorder %s4408_s30, %s4408_s30 }
0x1b76   :  { %p4415_p11 = por %p4414_p10, %p4413_p9 }
0x1b78   :  { %p4416_p12 = pnand %p4415_p11, %p4409_p8 }
0x1b7d   :  { %v4135_v1 = vpop.eup %4134 }
0x1b7e   :  { %1957 = vrot.lane.b32.xlu0 %v4135_v1, %s4443_s23 }
0x1bf0   :  { %v1958_v29 = vpop.permute.xlu0 %1957 }
0x1bf1   :  { %v1960_v54 = vmul.f32 %v4133_v58, %v1958_v29 }
0x1bf3   :  { %v1961_v39 = vpack.c.bf16 %v1960_v54, %v1960_v54 }
0x1bf5   :  { %2003 = vrot.lane.b32.xlu1 %v1961_v39, %s4457_s0 }
0x1c67   :  { %v2004_v40 = vpop.permute.xlu1 %2003 }
0x1c68   :  { %3806 = vmatmul.mubr.msk.bf16.vlgmr.msra.gmra.mrb[64].mxu1 %vm369_vm1, %v2004_v40 }
0x1c69   :  { %3818 = vmatpush3.bf16.msra.mxu1 %v5023_v32  ;;  %3821 = vmatprep.mubr.msk.bf16.mxu1 %vm4455_vm0, %v4454_v0 }
0x1c6a   :  { %3819 = vmatprep.subr.bf16.mxu1 %v4454_v0 }
0x1c6d   :  { %3820 = vmatpush3.bf16.msra.mxu1 %v5029_v56 }
0x1c6e   :  { %3833 = vmatprep.subr.bf16.mxu1 %v4454_v0 }
0x1c70   :  { %3822 = vmatmul.mubr.msk.bf16.vlgmr.msra.gmra.mrb[68].mxu1 %vm369_vm1, %v5072_v12 }
0x1c71   :  { %3834 = vmatpush3.bf16.msra.mxu1 %v5063_v14  ;;  %3837 = vmatprep.mubr.msk.bf16.mxu1 %vm4455_vm0, %v4454_v0 }
0x1c72   :  { %3835 = vmatprep.subr.bf16.mxu1 %v4454_v0 }
0x1c75   :  { %3836 = vmatpush3.bf16.msra.mxu1 %v5069_v38 }
0x1c76   :  { %3849 = vmatprep.subr.bf16.mxu1 %v4454_v0 }
0x1c78   :  { %3838 = vmatmul.mubr.msk.bf16.vlgmr.msra.gmra.mrb[72].mxu1 %vm369_vm1, %v2004_v40 }
0x1c79   :  { %3850 = vmatpush3.bf16.msra.mxu1 %v5088_v17  ;;  %3853 = vmatprep.mubr.msk.bf16.mxu1 %vm4455_vm0, %v4454_v0 }
0x1c7a   :  { %3851 = vmatprep.subr.bf16.mxu1 %v4454_v0 }
0x1c7d   :  { %3852 = vmatpush3.bf16.msra.mxu1 %v5101_v19 }
0x1c7e   :  { %3865 = vmatprep.subr.bf16.mxu1 %v4454_v0 }
0x1d3b   :  { %v2042_v25 = vpop.f32.mrb[64].mxu1 }
0x1d3c   :  { %v2043_v8 = vadd.f32 %v2042_v25, %v1996_v41  ;;  %v3807_v9 = vpop.f32.mrb[65].mxu1  ;;  %v5190_v41 = vld [vmem:[%s5432_s6] sm:$0xff]  }
0x1d3d   :  { %v2045_v10 = vpop.f32.mrb[66].mxu1 }
0x1d3e   :  { %v2048_v55 = vadd.f32 %v5149_v13, %v2043_v8  ;;  %v3808_v60 = vpop.f32.mrb[67].mxu1 }
0x1d40   :  { %4136 = vtanh.f32 %v2048_v55  ;;  %v3354_v47 = vmul.f32 -1.442695, %v2048_v55 }
0x1d42   :  { %4138 = vpow2.f32 %v3354_v47 }
0x1d43   :  { %v5152_v61 = vpop.f32.mrb[68].mxu1 }
0x1d44   :  { %v3823_v3 = vpop.f32.mrb[69].mxu1 }
0x1d45   :  { %v2159_v4 = vpop.f32.mrb[70].mxu1 }
0x1d46   :  { %v3824_v15 = vpop.f32.mrb[71].mxu1 }
0x1d4a   :  { %v4137_v44 = vpop.eup %4136 }
0x1d4b   :  { %2058 = vrot.lane.b32.xlu0 %v4137_v44, %s4443_s23  ;;  %v5155_v5 = vpop.f32.mrb[72].mxu1 }
0x1d4c   :  { %v3839_v6 = vpop.f32.mrb[73].mxu1  ;;  %v4139_v12 = vpop.eup %4138 }
0x1d4d   :  { %v2277_v59 = vpop.f32.mrb[74].mxu1  ;;  %v2052_v7 = vadd.f32 1.0, %v4139_v12 }
0x1d4e   :  { %v3840_v11 = vpop.f32.mrb[75].mxu1 }
0x1d4f   :  { %4140 = vrcp.f32 %v2052_v7 }
0x1d59   :  { %v4141_v52 = vpop.eup %4140 }
0x1d5a   :  { %v2056_v30 = vmul.f32 %v4141_v52, %v5051_v57  ;;  %v5169_v57 = vld [vmem:[#allocation8 + $0x8] sm:$0xff]  }
0x1dbd   :  { %v2059_v24 = vpop.permute.xlu0 %2058 }
0x1dbe   :  { %v2061_v28 = vmul.f32 %v4141_v52, %v2059_v24 }
0x1dc0   :  { %2063 = vrot.lane.b32.xlu1 %v2061_v28, %s4457_s0 }
0x1e32   :  { %v2064_v31 = vpop.permute.xlu1 %2063 }
0x1e33   :  { %v5159_v22 = vadd.f32 %v2064_v31, %v2056_v30 }
0x1e35   :  { %4142 = vtanh.f32 %v5159_v22 }
0x1e3f   :  { %v4143_v26 = vpop.eup %4142 }
0x1e40   :  { %2069 = vrot.lane.b32.xlu0 %v4143_v26, %s4443_s23 }
0x1eb2   :  { %v2070_v63 = vpop.permute.xlu0 %2069 }
0x1eb3   :  { %v2072_v33 = vmul.f32 %v4141_v52, %v2070_v63 }
0x1eb5   :  { %v2073_v34 = vpack.c.bf16 %v2072_v33, %v2072_v33 }
0x1eb7   :  { %2075 = vrot.lane.b32.xlu1 %v2073_v34, %s4457_s0 }
0x1f29   :  { %v2076_v36 = vpop.permute.xlu1 %2075 }
0x1f2a   :  { %3814 = vmatmul.mubr.msk.bf16.vlgmr.msra.gmra.mrb[56].mxu0 %vm369_vm1, %v2076_v36  ;;  %3854 = vmatmul.mubr.msk.bf16.vlgmr.msra.gmra.mrb[76].mxu1 %vm369_vm1, %v2076_v36 }
0x1f2b   :  { %3826 = vmatpush3.bf16.msra.mxu0 %v5164_v35  ;;  %3829 = vmatprep.mubr.msk.bf16.mxu0 %vm4455_vm0, %v4454_v0 }
0x1f2c   :  { %3827 = vmatprep.subr.bf16.mxu0 %v4454_v0  ;;  %3866 = vmatpush3.bf16.msra.mxu1 %v5174_v16 }
0x1f2d   :  { %3867 = vmatprep.subr.bf16.mxu1 %v4454_v0  ;;  %3869 = vmatprep.mubr.msk.bf16.mxu1 %vm4455_vm0, %v4454_v0 }
0x1f2f   :  { %3828 = vmatpush3.bf16.msra.mxu0 %v5169_v57 }
0x1f30   :  { %3841 = vmatprep.subr.bf16.mxu0 %v4454_v0  ;;  %3868 = vmatpush3.bf16.msra.mxu1 %v5182_v42 }
0x1f31   :  { %3881 = vmatprep.subr.bf16.mxu1 %v4454_v0 }
0x1f32   :  { %3830 = vmatmul.mubr.msk.bf16.vlgmr.msra.gmra.mrb[60].mxu0 %vm369_vm1, %v2076_v36 }
0x1f33   :  { %3842 = vmatpush3.bf16.msra.mxu0 %v5190_v41  ;;  %3845 = vmatprep.mubr.msk.bf16.mxu0 %vm4455_vm0, %v4454_v0 }
0x1f34   :  { %3843 = vmatprep.subr.bf16.mxu0 %v4454_v0 }
0x1f37   :  { %3844 = vmatpush3.bf16.msra.mxu0 %v5199_v20 }
0x1f38   :  { %3857 = vmatprep.subr.bf16.mxu0 %v4454_v0 }
0x1ffd   :  { %v2114_v45 = vpop.f32.mrb[56].mxu0  ;;  %v5203_v46 = vpop.f32.mrb[76].mxu1 }
0x1ffe   :  { %v2115_v49 = vadd.f32 %v5208_v48, %v2114_v45  ;;  %v3815_v43 = vpop.f32.mrb[57].mxu0  ;;  %v3855_v23 = vpop.f32.mrb[77].mxu1 }
0x1fff   :  { %v2117_v58 = vpop.f32.mrb[58].mxu0  ;;  %v2389_v27 = vpop.f32.mrb[78].mxu1 }
0x2000   :  { %2121 = vst [vmem:[#allocation16 + $0x20] sm:$0xff] %v2115_v49  ;;  %v3816_v21 = vpop.f32.mrb[59].mxu0  ;;  %v3856_v50 = vpop.f32.mrb[79].mxu1 }
0x2005   :  { %v2208_v1 = vpop.f32.mrb[60].mxu0 }
0x2006   :  { %v2209_v29 = vadd.f32 %v2208_v1, %v5152_v61  ;;  %v3831_v54 = vpop.f32.mrb[61].mxu0 }
0x2007   :  { %v2211_v39 = vpop.f32.mrb[62].mxu0 }
0x2008   :  { %v2214_v40 = vadd.f32 %v5214_v51, %v2209_v29  ;;  %v3832_v25 = vpop.f32.mrb[63].mxu0 }
0x200a   :  { %4144 = vtanh.f32 %v2214_v40  ;;  %v3360_v9 = vmul.f32 -1.442695, %v2214_v40 }
0x200c   :  { %4146 = vpow2.f32 %v3360_v9 }
0x2014   :  { %v4145_v8 = vpop.eup %4144 }
0x2015   :  { %2224 = vrot.lane.b32.xlu0 %v4145_v8, %s4443_s23 }
0x2016   :  { %v4147_v10 = vpop.eup %4146 }
0x2017   :  { %v2218_v55 = vadd.f32 1.0, %v4147_v10 }
0x2019   :  { %4148 = vrcp.f32 %v2218_v55 }
0x2023   :  { %v4149_v60 = vpop.eup %4148 }
0x2024   :  { %v2222_v61 = vmul.f32 %v4149_v60, %v5055_v2 }
0x2087   :  { %v2225_v3 = vpop.permute.xlu0 %2224 }
0x2088   :  { %v2227_v4 = vmul.f32 %v4149_v60, %v2225_v3 }
0x208a   :  { %2229 = vrot.lane.b32.xlu1 %v2227_v4, %s4457_s0 }
0x20fc   :  { %v2230_v15 = vpop.permute.xlu1 %2229 }
0x20fd   :  { %v5221_v44 = vadd.f32 %v2230_v15, %v2222_v61 }
0x20ff   :  { %4150 = vtanh.f32 %v5221_v44 }
0x2109   :  { %v4151_v6 = vpop.eup %4150 }
0x210a   :  { %2235 = vrot.lane.b32.xlu0 %v4151_v6, %s4443_s23 }
0x217c   :  { %v2236_v59 = vpop.permute.xlu0 %2235 }
0x217d   :  { %v2238_v11 = vmul.f32 %v4149_v60, %v2236_v59 }
0x217f   :  { %v2239_v47 = vpack.c.bf16 %v2238_v11, %v2238_v11 }
0x2181   :  { %2281 = vrot.lane.b32.xlu1 %v2239_v47, %s4457_s0 }
0x21f3   :  { %v2282_v12 = vpop.permute.xlu1 %2281 }
0x21f4   :  { %3846 = vmatmul.mubr.msk.bf16.vlgmr.msra.gmra.mrb[64].mxu0 %vm369_vm1, %v2282_v12 }
0x21f5   :  { %3858 = vmatpush3.bf16.msra.mxu0 %v5080_v62  ;;  %3861 = vmatprep.mubr.msk.bf16.mxu0 %vm4455_vm0, %v4454_v0 }
0x21f6   :  { %3859 = vmatprep.subr.bf16.mxu0 %v4454_v0 }
0x21f9   :  { %3860 = vmatpush3.bf16.msra.mxu0 %v5097_v18 }
0x21fa   :  { %3873 = vmatprep.subr.bf16.mxu0 %v4454_v0 }
0x22c7   :  { %v2320_v2 = vpop.f32.mrb[64].mxu0 }
0x22c8   :  { %v2321_v7 = vadd.f32 %v2320_v2, %v5155_v5  ;;  %v3847_v52 = vpop.f32.mrb[65].mxu0 }
0x22c9   :  { %v2323_v24 = vpop.f32.mrb[66].mxu0 }
0x22ca   :  { %v2326_v28 = vadd.f32 %v5113_v37, %v2321_v7  ;;  %v3848_v30 = vpop.f32.mrb[67].mxu0 }
0x22cc   :  { %4152 = vtanh.f32 %v2326_v28  ;;  %v3363_v26 = vmul.f32 -1.442695, %v2326_v28 }
0x22ce   :  { %4154 = vpow2.f32 %v3363_v26 }
0x22d6   :  { %v4153_v31 = vpop.eup %4152 }
0x22d7   :  { %2336 = vrot.lane.b32.xlu0 %v4153_v31, %s4443_s23 }
0x22d8   :  { %v4155_v63 = vpop.eup %4154 }
0x22d9   :  { %v2330_v33 = vadd.f32 1.0, %v4155_v63 }
0x22db   :  { %4156 = vrcp.f32 %v2330_v33 }
0x22e5   :  { %v4157_v34 = vpop.eup %4156 }
0x22e6   :  { %v2334_v5 = vmul.f32 %v4157_v34, %v5119_v53 }
0x2349   :  { %v2337_v36 = vpop.permute.xlu0 %2336 }
0x234a   :  { %v2339_v45 = vmul.f32 %v4157_v34, %v2337_v36 }
0x234c   :  { %2341 = vrot.lane.b32.xlu1 %v2339_v45, %s4457_s0 }
0x23be   :  { %v2342_v49 = vpop.permute.xlu1 %2341 }
0x23bf   :  { %v5238_v43 = vadd.f32 %v2342_v49, %v2334_v5 }
0x23c1   :  { %4158 = vtanh.f32 %v5238_v43 }
0x23cb   :  { %v4159_v23 = vpop.eup %4158 }
0x23cc   :  { %2347 = vrot.lane.b32.xlu0 %v4159_v23, %s4443_s23 }
0x243e   :  { %v2348_v58 = vpop.permute.xlu0 %2347 }
0x243f   :  { %v2350_v27 = vmul.f32 %v4157_v34, %v2348_v58 }
0x2441   :  { %v2351_v21 = vpack.c.bf16 %v2350_v27, %v2350_v27 }
0x2443   :  { %2393 = vrot.lane.b32.xlu1 %v2351_v21, %s4457_s0 }
0x24b5   :  { %v2394_v50 = vpop.permute.xlu1 %2393 }
0x24b6   :  { %3862 = vmatmul.mubr.msk.bf16.vlgmr.msra.gmra.mrb[68].mxu0 %vm369_vm1, %v2394_v50 }
0x24b7   :  { %3874 = vmatpush3.bf16.msra.mxu0 %v5023_v32  ;;  %3877 = vmatprep.mubr.msk.bf16.mxu0 %vm4455_vm0, %v4454_v0 }
0x24b8   :  { %3875 = vmatprep.subr.bf16.mxu0 %v4454_v0 }
0x24bb   :  { %3876 = vmatpush3.bf16.msra.mxu0 %v5029_v56 }
0x24bc   :  { %3889 = vmatprep.subr.bf16.mxu0 %v4454_v0 }
0x24be   :  { %3878 = vmatmul.mubr.msk.bf16.vlgmr.msra.gmra.mrb[72].mxu0 %vm369_vm1, %v2282_v12 }
0x24bf   :  { %3890 = vmatpush3.bf16.msra.mxu0 %v5063_v14  ;;  %3893 = vmatprep.mubr.msk.bf16.mxu0 %vm4455_vm0, %v4454_v0 }
0x24c0   :  { %3891 = vmatprep.subr.bf16.mxu0 %v4454_v0 }
0x24c3   :  { %3892 = vmatpush3.bf16.msra.mxu0 %v5069_v38 }
0x24c4   :  { %3905 = vmatprep.subr.bf16.mxu0 %v4454_v0 }
0x24c6   :  { %3894 = vmatmul.mubr.msk.bf16.vlgmr.msra.gmra.mrb[76].mxu0 %vm369_vm1, %v2394_v50 }
0x24c7   :  { %3906 = vmatpush3.bf16.msra.mxu0 %v5088_v17  ;;  %3909 = vmatprep.mubr.msk.bf16.mxu0 %vm4455_vm0, %v4454_v0 }
0x24c8   :  { %3907 = vmatprep.subr.bf16.mxu0 %v4454_v0 }
0x24cb   :  { %3908 = vmatpush3.bf16.msra.mxu0 %v5101_v19 }
0x24cc   :  { %3921 = vmatprep.subr.bf16.mxu0 %v4454_v0 }
0x2589   :  { %v2432_v53 = vpop.f32.mrb[68].mxu0 }
0x258a   :  { %v2433_v1 = vadd.f32 %v2432_v53, %v5203_v46  ;;  %v3863_v29 = vpop.f32.mrb[69].mxu0 }
0x258b   :  { %v2435_v54 = vpop.f32.mrb[70].mxu0 }
0x258c   :  { %v2438_v39 = vadd.f32 %v5149_v13, %v2433_v1  ;;  %v3864_v40 = vpop.f32.mrb[71].mxu0 }
0x258e   :  { %4160 = vtanh.f32 %v2438_v39  ;;  %v3366_v15 = vmul.f32 -1.442695, %v2438_v39 }
0x2590   :  { %4162 = vpow2.f32 %v3366_v15 }
0x2591   :  { %v2546_v25 = vpop.f32.mrb[72].mxu0 }
0x2592   :  { %v3879_v8 = vpop.f32.mrb[73].mxu0 }
0x2593   :  { %v2549_v9 = vpop.f32.mrb[74].mxu0 }
0x2594   :  { %v3880_v10 = vpop.f32.mrb[75].mxu0 }
0x2598   :  { %v4161_v55 = vpop.eup %4160 }
0x2599   :  { %v5266_v60 = vpop.f32.mrb[76].mxu0  ;;  %2448 = vrot.lane.b32.xlu0 %v4161_v55, %s4443_s23 }
0x259a   :  { %v3895_v3 = vpop.f32.mrb[77].mxu0  ;;  %v4163_v46 = vpop.eup %4162 }
0x259b   :  { %v2655_v4 = vpop.f32.mrb[78].mxu0  ;;  %v2442_v6 = vadd.f32 1.0, %v4163_v46 }
0x259c   :  { %v3896_v61 = vpop.f32.mrb[79].mxu0 }
0x259d   :  { %4164 = vrcp.f32 %v2442_v6 }
0x25a7   :  { %v4165_v59 = vpop.eup %4164 }
0x25a8   :  { %v2446_v12 = vmul.f32 %v4165_v59, %v5159_v22 }
0x260b   :  { %v2449_v11 = vpop.permute.xlu0 %2448 }
0x260c   :  { %v2451_v47 = vmul.f32 %v4165_v59, %v2449_v11 }
0x260e   :  { %2453 = vrot.lane.b32.xlu1 %v2451_v47, %s4457_s0 }
0x2680   :  { %v2454_v2 = vpop.permute.xlu1 %2453 }
0x2681   :  { %v5271_v7 = vadd.f32 %v2454_v2, %v2446_v12 }
0x2683   :  { %4166 = vtanh.f32 %v5271_v7 }
0x268d   :  { %v4167_v52 = vpop.eup %4166 }
0x268e   :  { %2459 = vrot.lane.b32.xlu0 %v4167_v52, %s4443_s23 }
0x2700   :  { %v2460_v24 = vpop.permute.xlu0 %2459 }
0x2701   :  { %v2462_v28 = vmul.f32 %v4165_v59, %v2460_v24 }
0x2703   :  { %v2463_v30 = vpack.c.bf16 %v2462_v28, %v2462_v28 }
0x2705   :  { %2465 = vrot.lane.b32.xlu1 %v2463_v30, %s4457_s0 }
0x2777   :  { %v2466_v31 = vpop.permute.xlu1 %2465 }
0x2778   :  { %3870 = vmatmul.mubr.msk.bf16.vlgmr.msra.gmra.mrb[80].mxu1 %vm369_vm1, %v2466_v31  ;;  %3910 = vmatmul.mubr.msk.bf16.vlgmr.msra.gmra.mrb[80].mxu0 %vm369_vm1, %v2466_v31 }
0x2779   :  { %3882 = vmatpush3.bf16.msra.mxu1 %v5164_v35  ;;  %3885 = vmatprep.mubr.msk.bf16.mxu1 %vm4455_vm0, %v4454_v0 }
0x277a   :  { %3883 = vmatprep.subr.bf16.mxu1 %v4454_v0  ;;  %3922 = vmatpush3.bf16.msra.mxu0 %v5174_v16 }
0x277b   :  { %3923 = vmatprep.subr.bf16.mxu0 %v4454_v0  ;;  %3925 = vmatprep.mubr.msk.bf16.mxu0 %vm4455_vm0, %v4454_v0 }
0x277d   :  { %3884 = vmatpush3.bf16.msra.mxu1 %v5169_v57 }
0x277e   :  { %3897 = vmatprep.subr.bf16.mxu1 %v4454_v0  ;;  %3924 = vmatpush3.bf16.msra.mxu0 %v5182_v42 }
0x277f   :  { %3937 = vmatprep.subr.bf16.mxu0 %v4454_v0 }
0x2780   :  { %3886 = vmatmul.mubr.msk.bf16.vlgmr.msra.gmra.mrb[84].mxu1 %vm369_vm1, %v2466_v31 }
0x2781   :  { %3898 = vmatpush3.bf16.msra.mxu1 %v5190_v41  ;;  %3901 = vmatprep.mubr.msk.bf16.mxu1 %vm4455_vm0, %v4454_v0 }
0x2782   :  { %3899 = vmatprep.subr.bf16.mxu1 %v4454_v0 }
0x2785   :  { %3900 = vmatpush3.bf16.msra.mxu1 %v5199_v20 }
0x2786   :  { %3913 = vmatprep.subr.bf16.mxu1 %v4454_v0 }
0x284b   :  { %v2504_v22 = vpop.f32.mrb[80].mxu1  ;;  %v5297_v26 = vpop.f32.mrb[80].mxu0 }
0x284c   :  { %v2505_v63 = vadd.f32 %v5208_v48, %v2504_v22  ;;  %v3871_v33 = vpop.f32.mrb[81].mxu1  ;;  %v3911_v34 = vpop.f32.mrb[81].mxu0 }
0x284d   :  { %v2507_v36 = vpop.f32.mrb[82].mxu1  ;;  %v2767_v45 = vpop.f32.mrb[82].mxu0 }
0x284e   :  { %2511 = vst [vmem:[#allocation16 + $0x28] sm:$0xff] %v2505_v63  ;;  %v3872_v5 = vpop.f32.mrb[83].mxu1  ;;  %v3912_v49 = vpop.f32.mrb[83].mxu0 }
0x2853   :  { %v2586_v23 = vpop.f32.mrb[84].mxu1 }
0x2854   :  { %v2587_v58 = vadd.f32 %v2586_v23, %v2546_v25  ;;  %v3887_v27 = vpop.f32.mrb[85].mxu1 }
0x2855   :  { %v2589_v21 = vpop.f32.mrb[86].mxu1 }
0x2856   :  { %v2592_v50 = vadd.f32 %v5214_v51, %v2587_v58  ;;  %v3888_v53 = vpop.f32.mrb[87].mxu1 }
0x2858   :  { %4168 = vtanh.f32 %v2592_v50  ;;  %v3370_v29 = vmul.f32 -1.442695, %v2592_v50 }
0x285a   :  { %4170 = vpow2.f32 %v3370_v29 }
0x2862   :  { %v4169_v1 = vpop.eup %4168 }
0x2863   :  { %2602 = vrot.lane.b32.xlu0 %v4169_v1, %s4443_s23 }
0x2864   :  { %v4171_v54 = vpop.eup %4170 }
0x2865   :  { %v2596_v39 = vadd.f32 1.0, %v4171_v54 }
0x2867   :  { %4172 = vrcp.f32 %v2596_v39 }
0x2871   :  { %v4173_v40 = vpop.eup %4172 }
0x2872   :  { %v2600_v25 = vmul.f32 %v4173_v40, %v5221_v44 }
0x28d5   :  { %v2603_v8 = vpop.permute.xlu0 %2602 }
0x28d6   :  { %v2605_v9 = vmul.f32 %v4173_v40, %v2603_v8 }
0x28d8   :  { %2607 = vrot.lane.b32.xlu1 %v2605_v9, %s4457_s0 }
0x294a   :  { %v2608_v10 = vpop.permute.xlu1 %2607 }
0x294b   :  { %v5304_v55 = vadd.f32 %v2608_v10, %v2600_v25 }
0x294d   :  { %4174 = vtanh.f32 %v5304_v55 }
0x2957   :  { %v4175_v3 = vpop.eup %4174 }
0x2958   :  { %2613 = vrot.lane.b32.xlu0 %v4175_v3, %s4443_s23 }
0x29ca   :  { %v2614_v4 = vpop.permute.xlu0 %2613 }
0x29cb   :  { %v2616_v61 = vmul.f32 %v4173_v40, %v2614_v4 }
0x29cd   :  { %v2617_v15 = vpack.c.bf16 %v2616_v61, %v2616_v61 }
0x29cf   :  { %2659 = vrot.lane.b32.xlu1 %v2617_v15, %s4457_s0 }
0x2a41   :  { %v2660_v46 = vpop.permute.xlu1 %2659 }
0x2a42   :  { %3902 = vmatmul.mubr.msk.bf16.vlgmr.msra.gmra.mrb[88].mxu1 %vm369_vm1, %v2660_v46 }
0x2a43   :  { %3914 = vmatpush3.bf16.msra.mxu1 %v5080_v62  ;;  %3917 = vmatprep.mubr.msk.bf16.mxu1 %vm4455_vm0, %v4454_v0 }
0x2a44   :  { %3915 = vmatprep.subr.bf16.mxu1 %v4454_v0 }
0x2a47   :  { %3916 = vmatpush3.bf16.msra.mxu1 %v5097_v18 }
0x2a48   :  { %3929 = vmatprep.subr.bf16.mxu1 %v4454_v0 }
0x2b15   :  { %v2698_v44 = vpop.f32.mrb[88].mxu1 }
0x2b16   :  { %v2699_v6 = vadd.f32 %v2698_v44, %v5266_v60  ;;  %v3903_v59 = vpop.f32.mrb[89].mxu1 }
0x2b17   :  { %v2701_v11 = vpop.f32.mrb[90].mxu1 }
0x2b18   :  { %v2704_v47 = vadd.f32 %v5113_v37, %v2699_v6  ;;  %v3904_v12 = vpop.f32.mrb[91].mxu1 }
0x2b1a   :  { %4176 = vtanh.f32 %v2704_v47  ;;  %v3373_v52 = vmul.f32 -1.442695, %v2704_v47 }
0x2b1c   :  { %4178 = vpow2.f32 %v3373_v52 }
0x2b24   :  { %v4177_v2 = vpop.eup %4176 }
0x2b25   :  { %2714 = vrot.lane.b32.xlu0 %v4177_v2, %s4443_s23 }
0x2b26   :  { %v4179_v24 = vpop.eup %4178 }
0x2b27   :  { %v2708_v28 = vadd.f32 1.0, %v4179_v24 }
0x2b29   :  { %4180 = vrcp.f32 %v2708_v28 }
0x2b33   :  { %v4181_v30 = vpop.eup %4180 }
0x2b34   :  { %v2712_v60 = vmul.f32 %v4181_v30, %v5238_v43 }
0x2b97   :  { %v2715_v31 = vpop.permute.xlu0 %2714 }
0x2b98   :  { %v2717_v22 = vmul.f32 %v4181_v30, %v2715_v31 }
0x2b9a   :  { %2719 = vrot.lane.b32.xlu1 %v2717_v22, %s4457_s0 }
0x2c0c   :  { %v2720_v63 = vpop.permute.xlu1 %2719 }
0x2c0d   :  { %v5321_v33 = vadd.f32 %v2720_v63, %v2712_v60 }
0x2c0f   :  { %4182 = vtanh.f32 %v5321_v33 }
0x2c19   :  { %v4183_v34 = vpop.eup %4182 }
0x2c1a   :  { %2725 = vrot.lane.b32.xlu0 %v4183_v34, %s4443_s23 }
0x2c8c   :  { %v2726_v36 = vpop.permute.xlu0 %2725 }
0x2c8d   :  { %v2728_v45 = vmul.f32 %v4181_v30, %v2726_v36 }
0x2c8f   :  { %v2729_v5 = vpack.c.bf16 %v2728_v45, %v2728_v45 }
0x2c91   :  { %2771 = vrot.lane.b32.xlu1 %v2729_v5, %s4457_s0 }
0x2d03   :  { %v2772_v49 = vpop.permute.xlu1 %2771 }
0x2d04   :  { %3918 = vmatmul.mubr.msk.bf16.vlgmr.msra.gmra.mrb[92].mxu1 %vm369_vm1, %v2772_v49 }
0x2d05   :  { %3930 = vmatpush3.bf16.msra.mxu1 %v5023_v32  ;;  %3933 = vmatprep.mubr.msk.bf16.mxu1 %vm4455_vm0, %v4454_v0 }
0x2d06   :  { %3931 = vmatprep.subr.bf16.mxu1 %v4454_v0 }
0x2d09   :  { %3932 = vmatpush3.bf16.msra.mxu1 %v5029_v56 }
0x2d0a   :  { %3945 = vmatprep.subr.bf16.mxu1 %v4454_v0 }
0x2d0c   :  { %3934 = vmatmul.mubr.msk.bf16.vlgmr.msra.gmra.mrb[96].mxu1 %vm369_vm1, %v2660_v46 }
0x2d0d   :  { %3946 = vmatpush3.bf16.msra.mxu1 %v5063_v14  ;;  %3949 = vmatprep.mubr.msk.bf16.mxu1 %vm4455_vm0, %v4454_v0 }
0x2d0e   :  { %3947 = vmatprep.subr.bf16.mxu1 %v4454_v0 }
0x2d11   :  { %3948 = vmatpush3.bf16.msra.mxu1 %v5069_v38 }
0x2d12   :  { %3961 = vmatprep.subr.bf16.mxu1 %v4454_v0 }
0x2d14   :  { %3950 = vmatmul.mubr.msk.bf16.vlgmr.msra.gmra.mrb[100].mxu1 %vm369_vm1, %v2772_v49 }
0x2d15   :  { %3962 = vmatpush3.bf16.msra.mxu1 %v5088_v17  ;;  %3965 = vmatprep.mubr.msk.bf16.mxu1 %vm4455_vm0, %v4454_v0 }
0x2d16   :  { %3963 = vmatprep.subr.bf16.mxu1 %v4454_v0 }
0x2d19   :  { %3964 = vmatpush3.bf16.msra.mxu1 %v5101_v19 }
0x2d1a   :  { %3977 = vmatprep.subr.bf16.mxu1 %v4454_v0 }
0x2dd7   :  { %v2810_v32 = vpop.f32.mrb[92].mxu1 }
0x2dd8   :  { %v2811_v56 = vadd.f32 %v2810_v32, %v5297_v26  ;;  %v3919_v14 = vpop.f32.mrb[93].mxu1 }
0x2dd9   :  { %v2813_v38 = vpop.f32.mrb[94].mxu1 }
0x2dda   :  { %v2816_v43 = vadd.f32 %v5149_v13, %v2811_v56  ;;  %v3920_v23 = vpop.f32.mrb[95].mxu1 }
0x2ddc   :  { %4184 = vtanh.f32 %v2816_v43  ;;  %v3376_v54 = vmul.f32 -1.442695, %v2816_v43 }
0x2dde   :  { %4186 = vpow2.f32 %v3376_v54 }
0x2ddf   :  { %v2924_v58 = vpop.f32.mrb[96].mxu1 }
0x2de0   :  { %v3935_v17 = vpop.f32.mrb[97].mxu1 }
0x2de1   :  { %v2927_v27 = vpop.f32.mrb[98].mxu1 }
0x2de2   :  { %v3936_v21 = vpop.f32.mrb[99].mxu1 }
0x2de6   :  { %v4185_v50 = vpop.eup %4184 }
0x2de7   :  { %2826 = vrot.lane.b32.xlu0 %v4185_v50, %s4443_s23  ;;  %v5350_v53 = vpop.f32.mrb[100].mxu1 }
0x2de8   :  { %v3951_v19 = vpop.f32.mrb[101].mxu1  ;;  %v4187_v26 = vpop.eup %4186 }
0x2de9   :  { %v3033_v1 = vpop.f32.mrb[102].mxu1  ;;  %v2820_v39 = vadd.f32 1.0, %v4187_v26 }
0x2dea   :  { %v3952_v29 = vpop.f32.mrb[103].mxu1 }
0x2deb   :  { %4188 = vrcp.f32 %v2820_v39 }
0x2df5   :  { %v4189_v40 = vpop.eup %4188 }
0x2df6   :  { %v2824_v25 = vmul.f32 %v4189_v40, %v5271_v7 }
0x2e59   :  { %v2827_v8 = vpop.permute.xlu0 %2826 }
0x2e5a   :  { %v2829_v9 = vmul.f32 %v4189_v40, %v2827_v8 }
0x2e5c   :  { %2831 = vrot.lane.b32.xlu1 %v2829_v9, %s4457_s0 }
0x2ece   :  { %v2832_v10 = vpop.permute.xlu1 %2831 }
0x2ecf   :  { %v5354_v3 = vadd.f32 %v2832_v10, %v2824_v25 }
0x2ed1   :  { %4190 = vtanh.f32 %v5354_v3 }
0x2edb   :  { %v4191_v4 = vpop.eup %4190 }
0x2edc   :  { %2837 = vrot.lane.b32.xlu0 %v4191_v4, %s4443_s23 }
0x2f4e   :  { %v2838_v61 = vpop.permute.xlu0 %2837 }
0x2f4f   :  { %v2840_v15 = vmul.f32 %v4189_v40, %v2838_v61 }
0x2f51   :  { %v2841_v46 = vpack.c.bf16 %v2840_v15, %v2840_v15 }
0x2f53   :  { %2843 = vrot.lane.b32.xlu1 %v2841_v46, %s4457_s0 }
0x2fc5   :  { %v2844_v44 = vpop.permute.xlu1 %2843 }
0x2fc6   :  { %3926 = vmatmul.mubr.msk.bf16.vlgmr.msra.gmra.mrb[84].mxu0 %vm369_vm1, %v2844_v44  ;;  %3966 = vmatmul.mubr.msk.bf16.vlgmr.msra.gmra.mrb[104].mxu1 %vm369_vm1, %v2844_v44 }
0x2fc7   :  { %3938 = vmatpush3.bf16.msra.mxu0 %v5164_v35  ;;  %3941 = vmatprep.mubr.msk.bf16.mxu0 %vm4455_vm0, %v4454_v0 }
0x2fc8   :  { %3939 = vmatprep.subr.bf16.mxu0 %v4454_v0  ;;  %3978 = vmatpush3.bf16.msra.mxu1 %v5174_v16 }
0x2fc9   :  { %3979 = vmatprep.subr.bf16.mxu1 %v4454_v0  ;;  %3981 = vmatprep.mubr.msk.bf16.mxu1 %vm4455_vm0, %v4454_v0 }
0x2fcb   :  { %3940 = vmatpush3.bf16.msra.mxu0 %v5169_v57 }
0x2fcc   :  { %3953 = vmatprep.subr.bf16.mxu0 %v4454_v0  ;;  %3980 = vmatpush3.bf16.msra.mxu1 %v5182_v42 }
0x2fce   :  { %3942 = vmatmul.mubr.msk.bf16.vlgmr.msra.gmra.mrb[88].mxu0 %vm369_vm1, %v2844_v44 }
0x2fcf   :  { %3954 = vmatpush3.bf16.msra.mxu0 %v5190_v41  ;;  %3957 = vmatprep.mubr.msk.bf16.mxu0 %vm4455_vm0, %v4454_v0 }
0x2fd0   :  { %3955 = vmatprep.subr.bf16.mxu0 %v4454_v0 }
0x2fd3   :  { %3956 = vmatpush3.bf16.msra.mxu0 %v5199_v20 }
0x2fd4   :  { %3969 = vmatprep.subr.bf16.mxu0 %v4454_v0 }
0x3099   :  { %v2882_v35 = vpop.f32.mrb[84].mxu0  ;;  %v5379_v16 = vpop.f32.mrb[104].mxu1 }
0x309a   :  { %v2883_v57 = vadd.f32 %v5208_v48, %v2882_v35  ;;  %v3927_v7 = vpop.f32.mrb[85].mxu0  ;;  %v3967_v42 = vpop.f32.mrb[105].mxu1 }
0x309b   :  { %v2885_v6 = vpop.f32.mrb[86].mxu0  ;;  %v3145_v59 = vpop.f32.mrb[106].mxu1 }
0x309c   :  { %2889 = vst [vmem:[#allocation16 + $0x30] sm:$0xff] %v2883_v57  ;;  %v3928_v41 = vpop.f32.mrb[87].mxu0  ;;  %v3968_v11 = vpop.f32.mrb[107].mxu1 }
0x30a1   :  { %v2964_v47 = vpop.f32.mrb[88].mxu0 }
0x30a2   :  { %v2965_v12 = vadd.f32 %v2964_v47, %v2924_v58  ;;  %v3943_v2 = vpop.f32.mrb[89].mxu0 }
0x30a3   :  { %v2967_v52 = vpop.f32.mrb[90].mxu0 }
0x30a4   :  { %v2970_v20 = vadd.f32 %v5214_v51, %v2965_v12  ;;  %v3944_v24 = vpop.f32.mrb[91].mxu0 }
0x30a6   :  { %4192 = vtanh.f32 %v2970_v20  ;;  %v3380_v30 = vmul.f32 -1.442695, %v2970_v20 }
0x30a8   :  { %4194 = vpow2.f32 %v3380_v30 }
0x30b0   :  { %v4193_v28 = vpop.eup %4192 }
0x30b1   :  { %2980 = vrot.lane.b32.xlu0 %v4193_v28, %s4443_s23 }
0x30b2   :  { %v4195_v31 = vpop.eup %4194 }
0x30b3   :  { %v2974_v22 = vadd.f32 1.0, %v4195_v31 }
0x30b5   :  { %4196 = vrcp.f32 %v2974_v22 }
0x30bf   :  { %v4197_v60 = vpop.eup %4196 }
0x30c0   :  { %v2978_v36 = vmul.f32 %v4197_v60, %v5304_v55 }
0x3123   :  { %v2981_v63 = vpop.permute.xlu0 %2980 }
0x3124   :  { %v2983_v34 = vmul.f32 %v4197_v60, %v2981_v63 }
0x3126   :  { %2985 = vrot.lane.b32.xlu1 %v2983_v34, %s4457_s0 }
0x3198   :  { %v2986_v45 = vpop.permute.xlu1 %2985 }
0x3199   :  { %v2988_v5 = vadd.f32 %v2986_v45, %v2978_v36 }
0x319b   :  { %4198 = vtanh.f32 %v2988_v5 }
0x31a5   :  { %v4199_v51 = vpop.eup %4198 }
0x31a6   :  { %2991 = vrot.lane.b32.xlu0 %v4199_v51, %s4443_s23 }
0x3218   :  { %v2992_v49 = vpop.permute.xlu0 %2991 }
0x3219   :  { %v2994_v32 = vmul.f32 %v4197_v60, %v2992_v49 }
0x321b   :  { %v2995_v56 = vpack.c.bf16 %v2994_v32, %v2994_v32 }
0x321d   :  { %3037 = vrot.lane.b32.xlu1 %v2995_v56, %s4457_s0 }
0x328f   :  { %v3038_v14 = vpop.permute.xlu1 %3037 }
0x3290   :  { %3958 = vmatmul.mubr.msk.bf16.vlgmr.msra.gmra.mrb[92].mxu0 %vm369_vm1, %v3038_v14 }
0x3291   :  { %3970 = vmatpush3.bf16.msra.mxu0 %v5080_v62  ;;  %3973 = vmatprep.mubr.msk.bf16.mxu0 %vm4455_vm0, %v4454_v0 }
0x3292   :  { %3971 = vmatprep.subr.bf16.mxu0 %v4454_v0 }
0x3295   :  { %3972 = vmatpush3.bf16.msra.mxu0 %v5097_v18 }
0x3363   :  { %v3076_v55 = vpop.f32.mrb[92].mxu0 }
0x3364   :  { %v3077_v38 = vadd.f32 %v3076_v55, %v5350_v53  ;;  %v3959_v43 = vpop.f32.mrb[93].mxu0 }
0x3365   :  { %v3079_v23 = vpop.f32.mrb[94].mxu0 }
0x3366   :  { %v3082_v58 = vadd.f32 %v5113_v37, %v3077_v38  ;;  %v3960_v17 = vpop.f32.mrb[95].mxu0 }
0x3368   :  { %4200 = vtanh.f32 %v3082_v58  ;;  %v3383_v62 = vmul.f32 -1.442695, %v3082_v58 }
0x336a   :  { %4202 = vpow2.f32 %v3383_v62 }
0x3372   :  { %v4201_v27 = vpop.eup %4200 }
0x3373   :  { %3092 = vrot.lane.b32.xlu0 %v4201_v27, %s4443_s23 }
0x3374   :  { %v4203_v21 = vpop.eup %4202 }
0x3375   :  { %v3086_v50 = vadd.f32 1.0, %v4203_v21 }
0x3377   :  { %4204 = vrcp.f32 %v3086_v50 }
0x3381   :  { %v4205_v0 = vpop.eup %4204 }
0x3382   :  { %v3090_v53 = vmul.f32 %v4205_v0, %v5321_v33 }
0x33e5   :  { %v3093_v19 = vpop.permute.xlu0 %3092 }
0x33e6   :  { %v3095_v18 = vmul.f32 %v4205_v0, %v3093_v19 }
0x33e8   :  { %3097 = vrot.lane.b32.xlu1 %v3095_v18, %s4457_s0 }
0x345a   :  { %v3098_v1 = vpop.permute.xlu1 %3097 }
0x345b   :  { %v3100_v29 = vadd.f32 %v3098_v1, %v3090_v53 }
0x345d   :  { %4206 = vtanh.f32 %v3100_v29 }
0x3467   :  { %v4207_v37 = vpop.eup %4206 }
0x3468   :  { %3103 = vrot.lane.b32.xlu0 %v4207_v37, %s4443_s23 }
0x34da   :  { %v3104_v54 = vpop.permute.xlu0 %3103 }
0x34db   :  { %v3106_v26 = vmul.f32 %v4205_v0, %v3104_v54 }
0x34dd   :  { %v3107_v39 = vpack.c.bf16 %v3106_v26, %v3106_v26 }
0x34df   :  { %3149 = vrot.lane.b32.xlu1 %v3107_v39, %s4457_s0 }
0x3551   :  { %v3150_v40 = vpop.permute.xlu1 %3149 }
0x3552   :  { %3974 = vmatmul.mubr.msk.bf16.vlgmr.msra.gmra.mrb[96].mxu0 %vm369_vm1, %v3150_v40 }
0x3625   :  { %v3188_v8 = vpop.f32.mrb[96].mxu0 }
0x3626   :  { %v3189_v9 = vadd.f32 %v3188_v8, %v5379_v16  ;;  %v3975_v25 = vpop.f32.mrb[97].mxu0 }
0x3627   :  { %v3191_v10 = vpop.f32.mrb[98].mxu0 }
0x3628   :  { %v3194_v33 = vadd.f32 %v5149_v13, %v3189_v9  ;;  %v3976_v4 = vpop.f32.mrb[99].mxu0 }
0x362a   :  { %4208 = vtanh.f32 %v3194_v33  ;;  %v3386_v15 = vmul.f32 -1.442695, %v3194_v33 }
0x362c   :  { %4210 = vpow2.f32 %v3386_v15 }
0x3634   :  { %v4209_v61 = vpop.eup %4208 }
0x3635   :  { %3204 = vrot.lane.b32.xlu0 %v4209_v61, %s4443_s23 }
0x3636   :  { %v4211_v46 = vpop.eup %4210 }
0x3637   :  { %v3198_v44 = vadd.f32 1.0, %v4211_v46 }
0x3639   :  { %4212 = vrcp.f32 %v3198_v44 }
0x3643   :  { %v4213_v35 = vpop.eup %4212 }
0x3644   :  { %v3202_v16 = vmul.f32 %v4213_v35, %v5354_v3 }
0x36a7   :  { %v3205_v57 = vpop.permute.xlu0 %3204 }
0x36a8   :  { %v3207_v7 = vmul.f32 %v4213_v35, %v3205_v57 }
0x36aa   :  { %3209 = vrot.lane.b32.xlu1 %v3207_v7, %s4457_s0 }
0x371c   :  { %v3210_v42 = vpop.permute.xlu1 %3209 }
0x371d   :  { %v3212_v6 = vadd.f32 %v3210_v42, %v3202_v16 }
0x371f   :  { %4214 = vtanh.f32 %v3212_v6 }
0x3729   :  { %v4215_v13 = vpop.eup %4214 }
0x372a   :  { %3215 = vrot.lane.b32.xlu0 %v4215_v13, %s4443_s23 }
0x379c   :  { %v3216_v59 = vpop.permute.xlu0 %3215 }
0x379d   :  { %v3218_v41 = vmul.f32 %v4213_v35, %v3216_v59 }
0x379f   :  { %v3219_v11 = vpack.c.bf16 %v3218_v41, %v3218_v41 }
0x37a1   :  { %3221 = vrot.lane.b32.xlu1 %v3219_v11, %s4457_s0 }
0x3813   :  { %v3222_v47 = vpop.permute.xlu1 %3221 }
0x3814   :  { %3982 = vmatmul.mubr.msk.bf16.vlgmr.msra.gmra.mrb[108].mxu1 %vm369_vm1, %v3222_v47 }
0x38e7   :  { %v3260_v12 = vpop.f32.mrb[108].mxu1 }
0x38e8   :  { %v3261_v2 = vadd.f32 %v5208_v48, %v3260_v12  ;;  %v3983_v3 = vpop.f32.mrb[109].mxu1 }
0x38e9   :  { %v3263_v52 = vpop.f32.mrb[110].mxu1 }
0x38ea   :  { %3267 = vst [vmem:[#allocation16 + $0x38] sm:$0xff] %v3261_v2  ;;  %v3984_v20 = vpop.f32.mrb[111].mxu1 }
0x38eb   :  { %4419 = shalt.err (!%p4416_p12)
}
0x38ec   :  { %s4420_s7 = scalar_lea.hbm %s5440_s14, 1024 }
0x38ed   :  { %p4421_p13 = scmp.ne.s32.totalorder %s5440_s14, %s4420_s7  ;;  %p4424_p0 = scmp.lt.u32.totalorder %s4420_s7, %s5440_s14 }
0x38ef   :  { %p4426_p1 = pnand %p4424_p0, %p4421_p13 }
0x38f1   :  { %4429 = shalt.err (!%p4426_p1)
}
0x38f2   :  { %3279 = dma.vmem_to_hbm [thread:$0]  %s3274_s13, 1024, %s5440_s14, [#allocation4], %s4448_s8, %s4448_s8, %s4449_s15  }
0x38f3   :  { %4440 = dma.done.wait [#allocation4], 1024  }
0x38f4   :  { %4441 = vsyncadd [#allocation4], 4294966272 }
0x38f5   :  { %3283 = vsyncpa [#allocation3], 1 }
0x38f6   :  { %3284 = vsyncpa [#allocation6], 1 }
0x38f7   :  { %3285 = vsyncpa [#allocation9], 1 }
0x38f8   :  { %3286 = vsyncpa [#allocation12], 1 }
0x38f9   :  { %3287 = vsyncpa [#allocation15], 1 }
0x38fa   :  { %3288 = vsyncpa [#allocation4], 1 }

</bundles_post_ra>
